<compile_context>
chip_gen: v6e
topology: v6e:2x2x1
jax: 0.10.0
libtpu: 0.0.40
codegen_flags: <defaults>
</compile_context>

<pallas_src>
import functools
import math

import jax
import jax.numpy as jnp
from jax.experimental import pallas as pl
from jax.experimental.pallas import tpu as pltpu


# ----------------------------- in-kernel helpers -----------------------------

def _erf_f32(x):
    # Abramowitz & Stegun 7.1.26 rational approximation (|abs error| < 1.5e-7).
    # The 1/(1+p*|x|) divide runs on the EUP via pl.reciprocal (review item).
    a1, a2, a3, a4, a5 = (0.254829592, -0.284496736, 1.421413741,
                          -1.453152027, 1.061405429)
    p = 0.3275911
    sign = jnp.where(x >= 0.0, 1.0, -1.0)
    ax = jnp.abs(x)
    t = pl.reciprocal(1.0 + p * ax, approx=True)
    poly = ((((a5 * t + a4) * t + a3) * t + a2) * t + a1) * t
    return sign * (1.0 - poly * jnp.exp(-ax * ax))


def _gelu_exact(x):
    # nn.GELU() default: 0.5 * x * (1 + erf(x / sqrt(2)))
    return 0.5 * x * (1.0 + _erf_f32(x * (1.0 / math.sqrt(2.0))))


# ----------------------------- fused layer kernel -----------------------------

def _fused_layer_kernel(
    x_ref, s_ref, pos_ref, ln_g_ref, ln_b_ref,
    w_qkv_x_ref, b_qkv_x_ref, w_qkv_s_ref, b_qkv_s_ref,
    w_xo_ref, b_xo_ref, w_so_ref, b_so_ref,
    w_f1_ref, b_f1_ref, w_f2_ref, b_f2_ref,
    w_g_ref, b_g_ref, gate_bias_ref,
    out_ref, next_s_ref,
    *, n_head,
):
    f32 = jnp.float32
    bf16 = jnp.bfloat16

    Bblk, Lx, D = x_ref.shape
    Ls = s_ref.shape[1]
    H = n_head
    Dh = D // H
    Mx, Ms = Bblk * Lx, Bblk * Ls
    scale = 1.0 / math.sqrt(Dh)

    x3 = x_ref[...].astype(f32)          # (Bblk, Lx, D)
    s3 = s_ref[...].astype(f32)          # (Bblk, Ls, D)

    # ---- s = state_norm(s) + state_ids(s): LayerNorm (eps=1e-5) + learned positions
    mu = jnp.mean(s3, axis=-1, keepdims=True)
    var = jnp.mean(jnp.square(s3 - mu), axis=-1, keepdims=True)
    s_n3 = (s3 - mu) * jax.lax.rsqrt(var + 1e-5) * ln_g_ref[...] + ln_b_ref[...]
    s_n3 = s_n3 + pos_ref[...]           # (Ls, D) broadcast over batch

    # ---- flatten batch into the matmul M dimension
    x2 = x3.reshape(Mx, D)               # residual / QKV input (f32)
    s_in2 = s3.reshape(Ms, D)            # original state (gate residual)
    s_n2 = s_n3.reshape(Ms, D)

    # ---- merged QKV projections (one (D, 3D) matmul per stream), bf16 in / f32 acc
    qkv_x = (jnp.dot(x2.astype(bf16), w_qkv_x_ref[...], preferred_element_type=f32)
             + b_qkv_x_ref[...])         # (Mx, 3D) f32
    qkv_s = (jnp.dot(s_n2.astype(bf16), w_qkv_s_ref[...], preferred_element_type=f32)
             + b_qkv_s_ref[...])         # (Ms, 3D) f32
    # single hoisted bf16 cast per stream; re-split batch rows for attention
    qkv_x3 = qkv_x.astype(bf16).reshape(Bblk, Lx, 3 * D)
    qkv_s3 = qkv_s.astype(bf16).reshape(Bblk, Ls, 3 * D)

    def heads(qkv3, base):
        # (Bblk, L, 3D) -> (H*Bblk, L, Dh); slab order is (head, batch).
        hs = jnp.stack(
            [qkv3[:, :, base + h * Dh: base + (h + 1) * Dh] for h in range(H)],
            axis=0)                                   # (H, Bblk, L, Dh)
        return hs.reshape(H * Bblk, qkv3.shape[1], Dh)

    qx, kx, vx = heads(qkv_x3, 0), heads(qkv_x3, D), heads(qkv_x3, 2 * D)
    qs, ks, vs = heads(qkv_s3, 0), heads(qkv_s3, D), heads(qkv_s3, 2 * D)

    def sdpa(q, k, v):
        # batched over (head, batch); f32 softmax with exact denominator.
        sc = jnp.einsum('bqd,bkd->bqk', q, k, preferred_element_type=f32) * scale
        sc = sc - jnp.max(sc, axis=-1, keepdims=True)
        p = jnp.exp(sc)
        p = p / jnp.sum(p, axis=-1, keepdims=True)
        return jnp.einsum('bqk,bkd->bqd', p.astype(bf16), v,
                          preferred_element_type=f32)

    # ---- 4 attention patterns, each ONE batched matmul pair
    x_self = sdpa(qx, kx, vx)     # x attends x          (H*Bblk, Lx, Dh)
    x_cross = sdpa(qx, ks, vs)    # x attends state      (H*Bblk, Lx, Dh)
    s_self = sdpa(qs, ks, vs)     # state attends state  (H*Bblk, Ls, Dh)
    s_cross = sdpa(qs, kx, vx)    # state attends x      (H*Bblk, Ls, Dh)

    def merge(o, L):
        # (H*Bblk, L, Dh) f32 -> (Bblk*L, D) bf16 (heads concatenated along lanes)
        o4 = o.reshape(H, Bblk, L, Dh)
        cat = jnp.concatenate([o4[h] for h in range(H)], axis=-1)  # (Bblk, L, D)
        return cat.reshape(Bblk * L, D).astype(bf16)

    # ---- concat-free 2D->D output projections: one K=D matmul per (stream, self/cross)
    w_xo = w_xo_ref[...]          # (2D, D) bf16
    w_so = w_so_ref[...]
    x_attn = (jnp.dot(merge(x_self, Lx), w_xo[:D, :], preferred_element_type=f32)
              + jnp.dot(merge(x_cross, Lx), w_xo[D:, :], preferred_element_type=f32)
              + b_xo_ref[...])
    s_attn = (jnp.dot(merge(s_self, Ls), w_so[:D, :], preferred_element_type=f32)
              + jnp.dot(merge(s_cross, Ls), w_so[D:, :], preferred_element_type=f32)
              + b_so_ref[...])

    # ---- residual + FFN (exact GELU, fused in-kernel) + second residual
    x_res = x_attn + x2
    h1 = (jnp.dot(x_res.astype(bf16), w_f1_ref[...], preferred_element_type=f32)
          + b_f1_ref[...])
    h1 = _gelu_exact(h1)
    ffn = (jnp.dot(h1.astype(bf16), w_f2_ref[...], preferred_element_type=f32)
           + b_f2_ref[...])
    out_ref[...] = (ffn + x_res).reshape(Bblk, Lx, D).astype(out_ref.dtype)

    # ---- FixedGate on the ORIGINAL (pre-norm) state: next_s = _s*g + z*(1-g)
    z = (jnp.dot(s_attn.astype(bf16), w_g_ref[...], preferred_element_type=f32)
         + b_g_ref[...])
    g = jax.nn.sigmoid(gate_bias_ref[...].astype(f32))
    next_s_ref[...] = (s_in2 * g + z * (1.0 - g)).reshape(Bblk, Ls, D).astype(
        next_s_ref.dtype)


# ----------------------------- wrapper -----------------------------

def _cost_estimate(B, Lx, Ls, D, F, H):
    Dh = D // H
    attn_pairs = Lx * Lx + Lx * Ls + Ls * Ls + Ls * Lx
    flops = 0
    flops += 2 * B * Lx * D * (3 * D) + 2 * B * Ls * D * (3 * D)   # QKV
    flops += 2 * 2 * B * H * attn_pairs * Dh                       # scores + PV
    flops += 2 * B * Lx * (2 * D) * D + 2 * B * Ls * (2 * D) * D   # output projections
    flops += 2 * 2 * B * Lx * D * F                                # FFN
    flops += 2 * B * Ls * D * D                                    # gate
    transcendentals = B * H * attn_pairs + B * Lx * F + D          # softmax/gelu/sigmoid
    bytes_accessed = (
        4 * 2 * B * (Lx + Ls) * D                                  # f32 activations in+out
        + 2 * (2 * D * 3 * D + 2 * (2 * D) * D + 2 * D * F + D * D)  # bf16 weights
        + 4 * (Ls * D + 12 * D + 2 * 3 * D + F)                    # f32 pos + biases (approx)
    )
    return pl.CostEstimate(flops=int(flops), transcendentals=int(transcendentals),
                           bytes_accessed=int(bytes_accessed))


def recurrent_attention_layer(params, x, s, *, batch_block=None):
    """Forward pass of RecurrentAttentionLayer. x: (B, Lx, D), s: (B, Ls, D)."""
    B, Lx, D = x.shape
    Ls = s.shape[1]
    H = int(params["n_head"])
    F = params["w_f1"].shape[1]
    assert D % H == 0

    if batch_block is None:
        # >=2 grid steps so both v7x TensorCores get work; blocks as fat as possible so
        # v5e/v6e (single TC, serial grid) amortize the per-step overhead.
        batch_block = max(1, B // 2)
    while B % batch_block:
        batch_block -= 1
    n_steps = B // batch_block

    pos = params["pos"][:Ls]                 # learned positional table slice (Ls, D)
    r1 = lambda a: a.reshape(1, -1)          # 1-D params -> (1, N) for lane broadcast

    def fixed(shape):
        nd = len(shape)
        return pl.BlockSpec(shape, lambda b, _nd=nd: (0,) * _nd)

    in_specs = [
        pl.BlockSpec((batch_block, Lx, D), lambda b: (b, 0, 0)),    # x
        pl.BlockSpec((batch_block, Ls, D), lambda b: (b, 0, 0)),    # s
        fixed((Ls, D)),                                   # pos
        fixed((1, D)), fixed((1, D)),                     # LN gamma / beta
        fixed((D, 3 * D)), fixed((1, 3 * D)),             # merged QKV (x stream)
        fixed((D, 3 * D)), fixed((1, 3 * D)),             # merged QKV (state stream)
        fixed((2 * D, D)), fixed((1, D)),                 # x output proj (2D -> D)
        fixed((2 * D, D)), fixed((1, D)),                 # s output proj (2D -> D)
        fixed((D, F)), fixed((1, F)),                     # FFN linear 1
        fixed((F, D)), fixed((1, D)),                     # FFN linear 2
        fixed((D, D)), fixed((1, D)),                     # gate proj
        fixed((1, D)),                                    # gate bias
    ]
    out_specs = (
        pl.BlockSpec((batch_block, Lx, D), lambda b: (b, 0, 0)),
        pl.BlockSpec((batch_block, Ls, D), lambda b: (b, 0, 0)),
    )

    out, next_s = pl.pallas_call(
        functools.partial(_fused_layer_kernel, n_head=H),
        out_shape=(jax.ShapeDtypeStruct((B, Lx, D), x.dtype),
                   jax.ShapeDtypeStruct((B, Ls, D), s.dtype)),
        grid=(n_steps,),
        in_specs=in_specs,
        out_specs=out_specs,
        compiler_params=pltpu.CompilerParams(
            dimension_semantics=("parallel",),
            # TODO(synk): when D scales up, re-budget resident weights against v7x's
            # 64 MiB VMEM and add K/N tiling of the QKV/FFN matmuls.
            vmem_limit_bytes=32 * 1024 * 1024),
        cost_estimate=_cost_estimate(B, Lx, Ls, D, F, H),
    )(
        x, s, pos,
        r1(params["ln_g"]), r1(params["ln_b"]),
        params["w_qkv_x"], r1(params["b_qkv_x"]),
        params["w_qkv_s"], r1(params["b_qkv_s"]),
        params["w_xo"], r1(params["b_xo"]),
        params["w_so"], r1(params["b_so"]),
        params["w_f1"], r1(params["b_f1"]),
        params["w_f2"], r1(params["b_f2"]),
        params["w_g"], r1(params["b_g"]),
        r1(params["gate_bias"]),
    )
    return out, next_s


# ----------------------------- parameter init -----------------------------

def init_params(key, d_model, ffn_hidden, n_head, max_len):
    keys = iter(jax.random.split(key, 32))

    def lin(din, dout):
        # large weights stored bf16 (f32 MXU accumulation in-kernel); biases f32
        w = (jax.random.normal(next(keys), (din, dout), jnp.float32) * 0.02
             ).astype(jnp.bfloat16)
        b = jax.random.normal(next(keys), (dout,), jnp.float32) * 0.02
        return w, b

    p = {"n_head": n_head}
    p["ln_g"] = jnp.ones((d_model,), jnp.float32)
    p["ln_b"] = jnp.zeros((d_model,), jnp.float32)
    p["pos"] = jax.random.normal(next(keys), (max_len, d_model), jnp.float32)

    p["w_qkv_x"], p["b_qkv_x"] = lin(d_model, 3 * d_model)
    p["w_qkv_s"], p["b_qkv_s"] = lin(d_model, 3 * d_model)
    p["w_xo"], p["b_xo"] = lin(2 * d_model, d_model)
    p["w_so"], p["b_so"] = lin(2 * d_model, d_model)
    p["w_f1"], p["b_f1"] = lin(d_model, ffn_hidden)
    p["w_f2"], p["b_f2"] = lin(ffn_hidden, d_model)
    p["w_g"], p["b_g"] = lin(d_model, d_model)
    p["gate_bias"] = jax.random.normal(next(keys), (d_model,), jnp.float32)
    # TODO(synk): dropout prob `p` from the reference __init__ is unused in the
    # reference forward pass (and x_mask/s_mask default to None); omitted here.
    return p


# ----------------------------- main -----------------------------

if __name__ == "__main__":
    # d_model=128 keeps activations/outputs lane-dense (full 128-lane vregs).
    d_model, ffn_hidden, n_head, max_len = 128, 256, 4, 64
    B, Lx, Ls = 4, 16, 16

    key = jax.random.PRNGKey(0)
    kp, kx, ks = jax.random.split(key, 3)
    params = init_params(kp, d_model, ffn_hidden, n_head, max_len)
    x = jax.random.normal(kx, (B, Lx, d_model), jnp.float32)
    s = jax.random.normal(ks, (B, Ls, d_model), jnp.float32)

    fwd = jax.jit(lambda xx, ss: recurrent_attention_layer(params, xx, ss))
    out, next_s = fwd(x, s)
    jax.block_until_ready(out)
    jax.block_until_ready(next_s)

    assert out.shape == (B, Lx, d_model) and next_s.shape == (B, Ls, d_model)
    assert bool(jnp.all(jnp.isfinite(out))) and bool(jnp.all(jnp.isfinite(next_s)))
    print("KERNEL_OK")
</pallas_src>

<mosaic_0001>
module attributes {stable_mosaic.version = 11 : i64} {
  func.func @_fused_layer_kernel(%arg0: i32, %arg1: memref<2x16x128xf32, #tpu.memory_space<vmem>>, %arg2: memref<2x16x128xf32, #tpu.memory_space<vmem>>, %arg3: memref<16x128xf32, #tpu.memory_space<vmem>>, %arg4: memref<1x128xf32, #tpu.memory_space<vmem>>, %arg5: memref<1x128xf32, #tpu.memory_space<vmem>>, %arg6: memref<128x384xbf16, #tpu.memory_space<vmem>>, %arg7: memref<1x384xf32, #tpu.memory_space<vmem>>, %arg8: memref<128x384xbf16, #tpu.memory_space<vmem>>, %arg9: memref<1x384xf32, #tpu.memory_space<vmem>>, %arg10: memref<256x128xbf16, #tpu.memory_space<vmem>>, %arg11: memref<1x128xf32, #tpu.memory_space<vmem>>, %arg12: memref<256x128xbf16, #tpu.memory_space<vmem>>, %arg13: memref<1x128xf32, #tpu.memory_space<vmem>>, %arg14: memref<128x256xbf16, #tpu.memory_space<vmem>>, %arg15: memref<1x256xf32, #tpu.memory_space<vmem>>, %arg16: memref<256x128xbf16, #tpu.memory_space<vmem>>, %arg17: memref<1x128xf32, #tpu.memory_space<vmem>>, %arg18: memref<128x128xbf16, #tpu.memory_space<vmem>>, %arg19: memref<1x128xf32, #tpu.memory_space<vmem>>, %arg20: memref<1x128xf32, #tpu.memory_space<vmem>>, %arg21: memref<2x16x128xf32, #tpu.memory_space<vmem>>, %arg22: memref<2x16x128xf32, #tpu.memory_space<vmem>>) attributes {dimension_semantics = [#tpu.dimension_semantics<parallel>], iteration_bounds = array<i64: 2>, scalar_prefetch = 0 : i64, scratch_operands = 0 : i64, tpu.core_type = #tpu.core_type<tc>, window_params = [{transform_indices = @transform_0, window_bounds = array<i64: 2, 16, 128>}, {transform_indices = @transform_1, window_bounds = array<i64: 2, 16, 128>}, {pipeline_mode = #tpu.pipeline_mode<synchronous>, transform_indices = @transform_2, window_bounds = array<i64: 16, 128>}, {pipeline_mode = #tpu.pipeline_mode<synchronous>, transform_indices = @transform_3, window_bounds = array<i64: 1, 128>}, {pipeline_mode = #tpu.pipeline_mode<synchronous>, transform_indices = @transform_4, window_bounds = array<i64: 1, 128>}, {pipeline_mode = #tpu.pipeline_mode<synchronous>, transform_indices = @transform_5, window_bounds = array<i64: 128, 384>}, {pipeline_mode = #tpu.pipeline_mode<synchronous>, transform_indices = @transform_6, window_bounds = array<i64: 1, 384>}, {pipeline_mode = #tpu.pipeline_mode<synchronous>, transform_indices = @transform_7, window_bounds = array<i64: 128, 384>}, {pipeline_mode = #tpu.pipeline_mode<synchronous>, transform_indices = @transform_8, window_bounds = array<i64: 1, 384>}, {pipeline_mode = #tpu.pipeline_mode<synchronous>, transform_indices = @transform_9, window_bounds = array<i64: 256, 128>}, {pipeline_mode = #tpu.pipeline_mode<synchronous>, transform_indices = @transform_10, window_bounds = array<i64: 1, 128>}, {pipeline_mode = #tpu.pipeline_mode<synchronous>, transform_indices = @transform_11, window_bounds = array<i64: 256, 128>}, {pipeline_mode = #tpu.pipeline_mode<synchronous>, transform_indices = @transform_12, window_bounds = array<i64: 1, 128>}, {pipeline_mode = #tpu.pipeline_mode<synchronous>, transform_indices = @transform_13, window_bounds = array<i64: 128, 256>}, {pipeline_mode = #tpu.pipeline_mode<synchronous>, transform_indices = @transform_14, window_bounds = array<i64: 1, 256>}, {pipeline_mode = #tpu.pipeline_mode<synchronous>, transform_indices = @transform_15, window_bounds = array<i64: 256, 128>}, {pipeline_mode = #tpu.pipeline_mode<synchronous>, transform_indices = @transform_16, window_bounds = array<i64: 1, 128>}, {pipeline_mode = #tpu.pipeline_mode<synchronous>, transform_indices = @transform_17, window_bounds = array<i64: 128, 128>}, {pipeline_mode = #tpu.pipeline_mode<synchronous>, transform_indices = @transform_18, window_bounds = array<i64: 1, 128>}, {pipeline_mode = #tpu.pipeline_mode<synchronous>, transform_indices = @transform_19, window_bounds = array<i64: 1, 128>}, {transform_indices = @transform_20, window_bounds = array<i64: 2, 16, 128>}, {transform_indices = @transform_21, window_bounds = array<i64: 2, 16, 128>}]} {
    %c0 = arith.constant 0 : index
    %c0_0 = arith.constant 0 : index
    %c0_1 = arith.constant 0 : index
    %0 = vector.load %arg1[%c0, %c0_0, %c0_1] : memref<2x16x128xf32, #tpu.memory_space<vmem>>, vector<2x16x128xf32>
    %c0_2 = arith.constant 0 : index
    %c0_3 = arith.constant 0 : index
    %c0_4 = arith.constant 0 : index
    %1 = vector.load %arg2[%c0_2, %c0_3, %c0_4] : memref<2x16x128xf32, #tpu.memory_space<vmem>>, vector<2x16x128xf32>
    %cst = arith.constant dense<0.000000e+00> : vector<2x16xf32>
    %2 = vector.multi_reduction <add>, %1, %cst [2] : vector<2x16x128xf32> to vector<2x16xf32>
    %3 = vector.shape_cast %2 : vector<2x16xf32> to vector<2x16x1xf32>
    %cst_5 = arith.constant 1.280000e+02 : f32
    %4 = vector.broadcast %cst_5 : f32 to vector<2x16x1xf32>
    %5 = arith.divf %3, %4 : vector<2x16x1xf32>
    %6 = vector.broadcast %5 : vector<2x16x1xf32> to vector<2x16x128xf32>
    %7 = arith.subf %1, %6 : vector<2x16x128xf32>
    %8 = arith.mulf %7, %7 : vector<2x16x128xf32>
    %cst_6 = arith.constant dense<0.000000e+00> : vector<2x16xf32>
    %9 = vector.multi_reduction <add>, %8, %cst_6 [2] : vector<2x16x128xf32> to vector<2x16xf32>
    %10 = vector.shape_cast %9 : vector<2x16xf32> to vector<2x16x1xf32>
    %cst_7 = arith.constant 1.280000e+02 : f32
    %11 = vector.broadcast %cst_7 : f32 to vector<2x16x1xf32>
    %12 = arith.divf %10, %11 : vector<2x16x1xf32>
    %13 = vector.broadcast %5 : vector<2x16x1xf32> to vector<2x16x128xf32>
    %14 = arith.subf %1, %13 : vector<2x16x128xf32>
    %cst_8 = arith.constant 9.99999974E-6 : f32
    %15 = vector.broadcast %cst_8 : f32 to vector<2x16x1xf32>
    %16 = arith.addf %12, %15 : vector<2x16x1xf32>
    %17 = math.rsqrt %16 : vector<2x16x1xf32>
    %18 = vector.broadcast %17 : vector<2x16x1xf32> to vector<2x16x128xf32>
    %19 = arith.mulf %14, %18 : vector<2x16x128xf32>
    %c0_9 = arith.constant 0 : index
    %c0_10 = arith.constant 0 : index
    %20 = vector.load %arg4[%c0_9, %c0_10] : memref<1x128xf32, #tpu.memory_space<vmem>>, vector<1x128xf32>
    %21 = vector.shape_cast %20 : vector<1x128xf32> to vector<1x1x128xf32>
    %22 = vector.broadcast %21 : vector<1x1x128xf32> to vector<2x16x128xf32>
    %23 = arith.mulf %19, %22 : vector<2x16x128xf32>
    %c0_11 = arith.constant 0 : index
    %c0_12 = arith.constant 0 : index
    %24 = vector.load %arg5[%c0_11, %c0_12] : memref<1x128xf32, #tpu.memory_space<vmem>>, vector<1x128xf32>
    %25 = vector.shape_cast %24 : vector<1x128xf32> to vector<1x1x128xf32>
    %26 = vector.broadcast %25 : vector<1x1x128xf32> to vector<2x16x128xf32>
    %27 = arith.addf %23, %26 : vector<2x16x128xf32>
    %c0_13 = arith.constant 0 : index
    %c0_14 = arith.constant 0 : index
    %28 = vector.load %arg3[%c0_13, %c0_14] : memref<16x128xf32, #tpu.memory_space<vmem>>, vector<16x128xf32>
    %29 = vector.shape_cast %28 : vector<16x128xf32> to vector<1x16x128xf32>
    %30 = vector.broadcast %29 : vector<1x16x128xf32> to vector<2x16x128xf32>
    %31 = arith.addf %27, %30 : vector<2x16x128xf32>
    %32 = vector.shape_cast %0 : vector<2x16x128xf32> to vector<32x128xf32>
    %33 = vector.shape_cast %1 : vector<2x16x128xf32> to vector<32x128xf32>
    %34 = vector.shape_cast %31 : vector<2x16x128xf32> to vector<32x128xf32>
    %35 = arith.truncf %32 : vector<32x128xf32> to vector<32x128xbf16>
    %c0_15 = arith.constant 0 : index
    %c0_16 = arith.constant 0 : index
    %36 = vector.load %arg6[%c0_15, %c0_16] : memref<128x384xbf16, #tpu.memory_space<vmem>>, vector<128x384xbf16>
    %cst_17 = arith.constant dense<0.000000e+00> : vector<32x384xf32>
    %37 = tpu.matmul %35, %36, %cst_17 {dimension_numbers = #tpu.dot_dimension_numbers<[1], [0], [0], [1], [0, 0, 1, 1], [], []>} : vector<32x128xbf16>, vector<128x384xbf16>, vector<32x384xf32> -> vector<32x384xf32>
    %c0_18 = arith.constant 0 : index
    %c0_19 = arith.constant 0 : index
    %38 = vector.load %arg7[%c0_18, %c0_19] : memref<1x384xf32, #tpu.memory_space<vmem>>, vector<1x384xf32>
    %39 = vector.broadcast %38 : vector<1x384xf32> to vector<32x384xf32>
    %40 = arith.addf %37, %39 : vector<32x384xf32>
    %41 = arith.truncf %34 : vector<32x128xf32> to vector<32x128xbf16>
    %c0_20 = arith.constant 0 : index
    %c0_21 = arith.constant 0 : index
    %42 = vector.load %arg8[%c0_20, %c0_21] : memref<128x384xbf16, #tpu.memory_space<vmem>>, vector<128x384xbf16>
    %cst_22 = arith.constant dense<0.000000e+00> : vector<32x384xf32>
    %43 = tpu.matmul %41, %42, %cst_22 {dimension_numbers = #tpu.dot_dimension_numbers<[1], [0], [0], [1], [0, 0, 1, 1], [], []>} : vector<32x128xbf16>, vector<128x384xbf16>, vector<32x384xf32> -> vector<32x384xf32>
    %c0_23 = arith.constant 0 : index
    %c0_24 = arith.constant 0 : index
    %44 = vector.load %arg9[%c0_23, %c0_24] : memref<1x384xf32, #tpu.memory_space<vmem>>, vector<1x384xf32>
    %45 = vector.broadcast %44 : vector<1x384xf32> to vector<32x384xf32>
    %46 = arith.addf %43, %45 : vector<32x384xf32>
    %47 = arith.truncf %40 : vector<32x384xf32> to vector<32x384xbf16>
    %48 = vector.shape_cast %47 : vector<32x384xbf16> to vector<2x16x384xbf16>
    %49 = arith.truncf %46 : vector<32x384xf32> to vector<32x384xbf16>
    %50 = vector.shape_cast %49 : vector<32x384xbf16> to vector<2x16x384xbf16>
    %51 = vector.extract_strided_slice %48 {offsets = [0, 0, 0], sizes = [2, 16, 32], strides = [1, 1, 1]} : vector<2x16x384xbf16> to vector<2x16x32xbf16>
    %52 = vector.extract_strided_slice %48 {offsets = [0, 0, 32], sizes = [2, 16, 32], strides = [1, 1, 1]} : vector<2x16x384xbf16> to vector<2x16x32xbf16>
    %53 = vector.extract_strided_slice %48 {offsets = [0, 0, 64], sizes = [2, 16, 32], strides = [1, 1, 1]} : vector<2x16x384xbf16> to vector<2x16x32xbf16>
    %54 = vector.extract_strided_slice %48 {offsets = [0, 0, 96], sizes = [2, 16, 32], strides = [1, 1, 1]} : vector<2x16x384xbf16> to vector<2x16x32xbf16>
    %55 = vector.shape_cast %51 : vector<2x16x32xbf16> to vector<1x2x16x32xbf16>
    %56 = vector.shape_cast %52 : vector<2x16x32xbf16> to vector<1x2x16x32xbf16>
    %57 = vector.shape_cast %53 : vector<2x16x32xbf16> to vector<1x2x16x32xbf16>
    %58 = vector.shape_cast %54 : vector<2x16x32xbf16> to vector<1x2x16x32xbf16>
    %59 = tpu.concatenate %55, %56, %57, %58 in 0 : vector<1x2x16x32xbf16>, vector<1x2x16x32xbf16>, vector<1x2x16x32xbf16>, vector<1x2x16x32xbf16> -> vector<4x2x16x32xbf16>
    %60 = vector.shape_cast %59 : vector<4x2x16x32xbf16> to vector<8x16x32xbf16>
    %61 = vector.extract_strided_slice %48 {offsets = [0, 0, 128], sizes = [2, 16, 32], strides = [1, 1, 1]} : vector<2x16x384xbf16> to vector<2x16x32xbf16>
    %62 = vector.extract_strided_slice %48 {offsets = [0, 0, 160], sizes = [2, 16, 32], strides = [1, 1, 1]} : vector<2x16x384xbf16> to vector<2x16x32xbf16>
    %63 = vector.extract_strided_slice %48 {offsets = [0, 0, 192], sizes = [2, 16, 32], strides = [1, 1, 1]} : vector<2x16x384xbf16> to vector<2x16x32xbf16>
    %64 = vector.extract_strided_slice %48 {offsets = [0, 0, 224], sizes = [2, 16, 32], strides = [1, 1, 1]} : vector<2x16x384xbf16> to vector<2x16x32xbf16>
    %65 = vector.shape_cast %61 : vector<2x16x32xbf16> to vector<1x2x16x32xbf16>
    %66 = vector.shape_cast %62 : vector<2x16x32xbf16> to vector<1x2x16x32xbf16>
    %67 = vector.shape_cast %63 : vector<2x16x32xbf16> to vector<1x2x16x32xbf16>
    %68 = vector.shape_cast %64 : vector<2x16x32xbf16> to vector<1x2x16x32xbf16>
    %69 = tpu.concatenate %65, %66, %67, %68 in 0 : vector<1x2x16x32xbf16>, vector<1x2x16x32xbf16>, vector<1x2x16x32xbf16>, vector<1x2x16x32xbf16> -> vector<4x2x16x32xbf16>
    %70 = vector.shape_cast %69 : vector<4x2x16x32xbf16> to vector<8x16x32xbf16>
    %71 = vector.extract_strided_slice %48 {offsets = [0, 0, 256], sizes = [2, 16, 32], strides = [1, 1, 1]} : vector<2x16x384xbf16> to vector<2x16x32xbf16>
    %72 = vector.extract_strided_slice %48 {offsets = [0, 0, 288], sizes = [2, 16, 32], strides = [1, 1, 1]} : vector<2x16x384xbf16> to vector<2x16x32xbf16>
    %73 = vector.extract_strided_slice %48 {offsets = [0, 0, 320], sizes = [2, 16, 32], strides = [1, 1, 1]} : vector<2x16x384xbf16> to vector<2x16x32xbf16>
    %74 = vector.extract_strided_slice %48 {offsets = [0, 0, 352], sizes = [2, 16, 32], strides = [1, 1, 1]} : vector<2x16x384xbf16> to vector<2x16x32xbf16>
    %75 = vector.shape_cast %71 : vector<2x16x32xbf16> to vector<1x2x16x32xbf16>
    %76 = vector.shape_cast %72 : vector<2x16x32xbf16> to vector<1x2x16x32xbf16>
    %77 = vector.shape_cast %73 : vector<2x16x32xbf16> to vector<1x2x16x32xbf16>
    %78 = vector.shape_cast %74 : vector<2x16x32xbf16> to vector<1x2x16x32xbf16>
    %79 = tpu.concatenate %75, %76, %77, %78 in 0 : vector<1x2x16x32xbf16>, vector<1x2x16x32xbf16>, vector<1x2x16x32xbf16>, vector<1x2x16x32xbf16> -> vector<4x2x16x32xbf16>
    %80 = vector.shape_cast %79 : vector<4x2x16x32xbf16> to vector<8x16x32xbf16>
    %81 = vector.extract_strided_slice %50 {offsets = [0, 0, 0], sizes = [2, 16, 32], strides = [1, 1, 1]} : vector<2x16x384xbf16> to vector<2x16x32xbf16>
    %82 = vector.extract_strided_slice %50 {offsets = [0, 0, 32], sizes = [2, 16, 32], strides = [1, 1, 1]} : vector<2x16x384xbf16> to vector<2x16x32xbf16>
    %83 = vector.extract_strided_slice %50 {offsets = [0, 0, 64], sizes = [2, 16, 32], strides = [1, 1, 1]} : vector<2x16x384xbf16> to vector<2x16x32xbf16>
    %84 = vector.extract_strided_slice %50 {offsets = [0, 0, 96], sizes = [2, 16, 32], strides = [1, 1, 1]} : vector<2x16x384xbf16> to vector<2x16x32xbf16>
    %85 = vector.shape_cast %81 : vector<2x16x32xbf16> to vector<1x2x16x32xbf16>
    %86 = vector.shape_cast %82 : vector<2x16x32xbf16> to vector<1x2x16x32xbf16>
    %87 = vector.shape_cast %83 : vector<2x16x32xbf16> to vector<1x2x16x32xbf16>
    %88 = vector.shape_cast %84 : vector<2x16x32xbf16> to vector<1x2x16x32xbf16>
    %89 = tpu.concatenate %85, %86, %87, %88 in 0 : vector<1x2x16x32xbf16>, vector<1x2x16x32xbf16>, vector<1x2x16x32xbf16>, vector<1x2x16x32xbf16> -> vector<4x2x16x32xbf16>
    %90 = vector.shape_cast %89 : vector<4x2x16x32xbf16> to vector<8x16x32xbf16>
    %91 = vector.extract_strided_slice %50 {offsets = [0, 0, 128], sizes = [2, 16, 32], strides = [1, 1, 1]} : vector<2x16x384xbf16> to vector<2x16x32xbf16>
    %92 = vector.extract_strided_slice %50 {offsets = [0, 0, 160], sizes = [2, 16, 32], strides = [1, 1, 1]} : vector<2x16x384xbf16> to vector<2x16x32xbf16>
    %93 = vector.extract_strided_slice %50 {offsets = [0, 0, 192], sizes = [2, 16, 32], strides = [1, 1, 1]} : vector<2x16x384xbf16> to vector<2x16x32xbf16>
    %94 = vector.extract_strided_slice %50 {offsets = [0, 0, 224], sizes = [2, 16, 32], strides = [1, 1, 1]} : vector<2x16x384xbf16> to vector<2x16x32xbf16>
    %95 = vector.shape_cast %91 : vector<2x16x32xbf16> to vector<1x2x16x32xbf16>
    %96 = vector.shape_cast %92 : vector<2x16x32xbf16> to vector<1x2x16x32xbf16>
    %97 = vector.shape_cast %93 : vector<2x16x32xbf16> to vector<1x2x16x32xbf16>
    %98 = vector.shape_cast %94 : vector<2x16x32xbf16> to vector<1x2x16x32xbf16>
    %99 = tpu.concatenate %95, %96, %97, %98 in 0 : vector<1x2x16x32xbf16>, vector<1x2x16x32xbf16>, vector<1x2x16x32xbf16>, vector<1x2x16x32xbf16> -> vector<4x2x16x32xbf16>
    %100 = vector.shape_cast %99 : vector<4x2x16x32xbf16> to vector<8x16x32xbf16>
    %101 = vector.extract_strided_slice %50 {offsets = [0, 0, 256], sizes = [2, 16, 32], strides = [1, 1, 1]} : vector<2x16x384xbf16> to vector<2x16x32xbf16>
    %102 = vector.extract_strided_slice %50 {offsets = [0, 0, 288], sizes = [2, 16, 32], strides = [1, 1, 1]} : vector<2x16x384xbf16> to vector<2x16x32xbf16>
    %103 = vector.extract_strided_slice %50 {offsets = [0, 0, 320], sizes = [2, 16, 32], strides = [1, 1, 1]} : vector<2x16x384xbf16> to vector<2x16x32xbf16>
    %104 = vector.extract_strided_slice %50 {offsets = [0, 0, 352], sizes = [2, 16, 32], strides = [1, 1, 1]} : vector<2x16x384xbf16> to vector<2x16x32xbf16>
    %105 = vector.shape_cast %101 : vector<2x16x32xbf16> to vector<1x2x16x32xbf16>
    %106 = vector.shape_cast %102 : vector<2x16x32xbf16> to vector<1x2x16x32xbf16>
    %107 = vector.shape_cast %103 : vector<2x16x32xbf16> to vector<1x2x16x32xbf16>
    %108 = vector.shape_cast %104 : vector<2x16x32xbf16> to vector<1x2x16x32xbf16>
    %109 = tpu.concatenate %105, %106, %107, %108 in 0 : vector<1x2x16x32xbf16>, vector<1x2x16x32xbf16>, vector<1x2x16x32xbf16>, vector<1x2x16x32xbf16> -> vector<4x2x16x32xbf16>
    %110 = vector.shape_cast %109 : vector<4x2x16x32xbf16> to vector<8x16x32xbf16>
    "tpu.trace_start"() <{level = 10 : i32, message = "bqd,bkd->bqk"}> : () -> ()
    %cst_25 = arith.constant dense<0.000000e+00> : vector<8x16x16xf32>
    %111 = tpu.matmul %60, %70, %cst_25 {dimension_numbers = #tpu.dot_dimension_numbers<[2], [2], [1], [1], [0, 0, 0, 1, 1, 1], [0], [0]>} : vector<8x16x32xbf16>, vector<8x16x32xbf16>, vector<8x16x16xf32> -> vector<8x16x16xf32>
    "tpu.trace_stop"() : () -> ()
    %cst_26 = arith.constant 0.176776692 : f32
    %112 = vector.broadcast %cst_26 : f32 to vector<8x16x16xf32>
    %113 = arith.mulf %111, %112 : vector<8x16x16xf32>
    %cst_27 = arith.constant dense<0xFF800000> : vector<8x16xf32>
    %114 = vector.multi_reduction <maximumf>, %113, %cst_27 [2] : vector<8x16x16xf32> to vector<8x16xf32>
    %115 = vector.shape_cast %114 : vector<8x16xf32> to vector<8x16x1xf32>
    %116 = vector.broadcast %115 : vector<8x16x1xf32> to vector<8x16x16xf32>
    %117 = arith.subf %113, %116 : vector<8x16x16xf32>
    %118 = math.exp %117 : vector<8x16x16xf32>
    %cst_28 = arith.constant dense<0.000000e+00> : vector<8x16xf32>
    %119 = vector.multi_reduction <add>, %118, %cst_28 [2] : vector<8x16x16xf32> to vector<8x16xf32>
    %120 = vector.shape_cast %119 : vector<8x16xf32> to vector<8x16x1xf32>
    %121 = vector.broadcast %120 : vector<8x16x1xf32> to vector<8x16x16xf32>
    %122 = arith.divf %118, %121 : vector<8x16x16xf32>
    %123 = arith.truncf %122 : vector<8x16x16xf32> to vector<8x16x16xbf16>
    "tpu.trace_start"() <{level = 10 : i32, message = "bqk,bkd->bqd"}> : () -> ()
    %cst_29 = arith.constant dense<0.000000e+00> : vector<8x16x32xf32>
    %124 = tpu.matmul %123, %80, %cst_29 {dimension_numbers = #tpu.dot_dimension_numbers<[2], [1], [1], [2], [0, 0, 0, 1, 1, 2], [0], [0]>} : vector<8x16x16xbf16>, vector<8x16x32xbf16>, vector<8x16x32xf32> -> vector<8x16x32xf32>
    "tpu.trace_stop"() : () -> ()
    "tpu.trace_start"() <{level = 10 : i32, message = "bqd,bkd->bqk"}> : () -> ()
    %cst_30 = arith.constant dense<0.000000e+00> : vector<8x16x16xf32>
    %125 = tpu.matmul %60, %100, %cst_30 {dimension_numbers = #tpu.dot_dimension_numbers<[2], [2], [1], [1], [0, 0, 0, 1, 1, 1], [0], [0]>} : vector<8x16x32xbf16>, vector<8x16x32xbf16>, vector<8x16x16xf32> -> vector<8x16x16xf32>
    "tpu.trace_stop"() : () -> ()
    %cst_31 = arith.constant 0.176776692 : f32
    %126 = vector.broadcast %cst_31 : f32 to vector<8x16x16xf32>
    %127 = arith.mulf %125, %126 : vector<8x16x16xf32>
    %cst_32 = arith.constant dense<0xFF800000> : vector<8x16xf32>
    %128 = vector.multi_reduction <maximumf>, %127, %cst_32 [2] : vector<8x16x16xf32> to vector<8x16xf32>
    %129 = vector.shape_cast %128 : vector<8x16xf32> to vector<8x16x1xf32>
    %130 = vector.broadcast %129 : vector<8x16x1xf32> to vector<8x16x16xf32>
    %131 = arith.subf %127, %130 : vector<8x16x16xf32>
    %132 = math.exp %131 : vector<8x16x16xf32>
    %cst_33 = arith.constant dense<0.000000e+00> : vector<8x16xf32>
    %133 = vector.multi_reduction <add>, %132, %cst_33 [2] : vector<8x16x16xf32> to vector<8x16xf32>
    %134 = vector.shape_cast %133 : vector<8x16xf32> to vector<8x16x1xf32>
    %135 = vector.broadcast %134 : vector<8x16x1xf32> to vector<8x16x16xf32>
    %136 = arith.divf %132, %135 : vector<8x16x16xf32>
    %137 = arith.truncf %136 : vector<8x16x16xf32> to vector<8x16x16xbf16>
    "tpu.trace_start"() <{level = 10 : i32, message = "bqk,bkd->bqd"}> : () -> ()
    %cst_34 = arith.constant dense<0.000000e+00> : vector<8x16x32xf32>
    %138 = tpu.matmul %137, %110, %cst_34 {dimension_numbers = #tpu.dot_dimension_numbers<[2], [1], [1], [2], [0, 0, 0, 1, 1, 2], [0], [0]>} : vector<8x16x16xbf16>, vector<8x16x32xbf16>, vector<8x16x32xf32> -> vector<8x16x32xf32>
    "tpu.trace_stop"() : () -> ()
    "tpu.trace_start"() <{level = 10 : i32, message = "bqd,bkd->bqk"}> : () -> ()
    %cst_35 = arith.constant dense<0.000000e+00> : vector<8x16x16xf32>
    %139 = tpu.matmul %90, %100, %cst_35 {dimension_numbers = #tpu.dot_dimension_numbers<[2], [2], [1], [1], [0, 0, 0, 1, 1, 1], [0], [0]>} : vector<8x16x32xbf16>, vector<8x16x32xbf16>, vector<8x16x16xf32> -> vector<8x16x16xf32>
    "tpu.trace_stop"() : () -> ()
    %cst_36 = arith.constant 0.176776692 : f32
    %140 = vector.broadcast %cst_36 : f32 to vector<8x16x16xf32>
    %141 = arith.mulf %139, %140 : vector<8x16x16xf32>
    %cst_37 = arith.constant dense<0xFF800000> : vector<8x16xf32>
    %142 = vector.multi_reduction <maximumf>, %141, %cst_37 [2] : vector<8x16x16xf32> to vector<8x16xf32>
    %143 = vector.shape_cast %142 : vector<8x16xf32> to vector<8x16x1xf32>
    %144 = vector.broadcast %143 : vector<8x16x1xf32> to vector<8x16x16xf32>
    %145 = arith.subf %141, %144 : vector<8x16x16xf32>
    %146 = math.exp %145 : vector<8x16x16xf32>
    %cst_38 = arith.constant dense<0.000000e+00> : vector<8x16xf32>
    %147 = vector.multi_reduction <add>, %146, %cst_38 [2] : vector<8x16x16xf32> to vector<8x16xf32>
    %148 = vector.shape_cast %147 : vector<8x16xf32> to vector<8x16x1xf32>
    %149 = vector.broadcast %148 : vector<8x16x1xf32> to vector<8x16x16xf32>
    %150 = arith.divf %146, %149 : vector<8x16x16xf32>
    %151 = arith.truncf %150 : vector<8x16x16xf32> to vector<8x16x16xbf16>
    "tpu.trace_start"() <{level = 10 : i32, message = "bqk,bkd->bqd"}> : () -> ()
    %cst_39 = arith.constant dense<0.000000e+00> : vector<8x16x32xf32>
    %152 = tpu.matmul %151, %110, %cst_39 {dimension_numbers = #tpu.dot_dimension_numbers<[2], [1], [1], [2], [0, 0, 0, 1, 1, 2], [0], [0]>} : vector<8x16x16xbf16>, vector<8x16x32xbf16>, vector<8x16x32xf32> -> vector<8x16x32xf32>
    "tpu.trace_stop"() : () -> ()
    "tpu.trace_start"() <{level = 10 : i32, message = "bqd,bkd->bqk"}> : () -> ()
    %cst_40 = arith.constant dense<0.000000e+00> : vector<8x16x16xf32>
    %153 = tpu.matmul %90, %70, %cst_40 {dimension_numbers = #tpu.dot_dimension_numbers<[2], [2], [1], [1], [0, 0, 0, 1, 1, 1], [0], [0]>} : vector<8x16x32xbf16>, vector<8x16x32xbf16>, vector<8x16x16xf32> -> vector<8x16x16xf32>
    "tpu.trace_stop"() : () -> ()
    %cst_41 = arith.constant 0.176776692 : f32
    %154 = vector.broadcast %cst_41 : f32 to vector<8x16x16xf32>
    %155 = arith.mulf %153, %154 : vector<8x16x16xf32>
    %cst_42 = arith.constant dense<0xFF800000> : vector<8x16xf32>
    %156 = vector.multi_reduction <maximumf>, %155, %cst_42 [2] : vector<8x16x16xf32> to vector<8x16xf32>
    %157 = vector.shape_cast %156 : vector<8x16xf32> to vector<8x16x1xf32>
    %158 = vector.broadcast %157 : vector<8x16x1xf32> to vector<8x16x16xf32>
    %159 = arith.subf %155, %158 : vector<8x16x16xf32>
    %160 = math.exp %159 : vector<8x16x16xf32>
    %cst_43 = arith.constant dense<0.000000e+00> : vector<8x16xf32>
    %161 = vector.multi_reduction <add>, %160, %cst_43 [2] : vector<8x16x16xf32> to vector<8x16xf32>
    %162 = vector.shape_cast %161 : vector<8x16xf32> to vector<8x16x1xf32>
    %163 = vector.broadcast %162 : vector<8x16x1xf32> to vector<8x16x16xf32>
    %164 = arith.divf %160, %163 : vector<8x16x16xf32>
    %165 = arith.truncf %164 : vector<8x16x16xf32> to vector<8x16x16xbf16>
    "tpu.trace_start"() <{level = 10 : i32, message = "bqk,bkd->bqd"}> : () -> ()
    %cst_44 = arith.constant dense<0.000000e+00> : vector<8x16x32xf32>
    %166 = tpu.matmul %165, %80, %cst_44 {dimension_numbers = #tpu.dot_dimension_numbers<[2], [1], [1], [2], [0, 0, 0, 1, 1, 2], [0], [0]>} : vector<8x16x16xbf16>, vector<8x16x32xbf16>, vector<8x16x32xf32> -> vector<8x16x32xf32>
    "tpu.trace_stop"() : () -> ()
    %c0_45 = arith.constant 0 : index
    %c0_46 = arith.constant 0 : index
    %167 = vector.load %arg10[%c0_45, %c0_46] : memref<256x128xbf16, #tpu.memory_space<vmem>>, vector<256x128xbf16>
    %c0_47 = arith.constant 0 : index
    %c0_48 = arith.constant 0 : index
    %168 = vector.load %arg12[%c0_47, %c0_48] : memref<256x128xbf16, #tpu.memory_space<vmem>>, vector<256x128xbf16>
    %169 = vector.shape_cast %124 : vector<8x16x32xf32> to vector<4x2x16x32xf32>
    %170 = vector.extract_strided_slice %169 {offsets = [0, 0, 0, 0], sizes = [1, 2, 16, 32], strides = [1, 1, 1, 1]} : vector<4x2x16x32xf32> to vector<1x2x16x32xf32>
    %171 = vector.shape_cast %170 : vector<1x2x16x32xf32> to vector<2x16x32xf32>
    %172 = vector.extract_strided_slice %169 {offsets = [1, 0, 0, 0], sizes = [1, 2, 16, 32], strides = [1, 1, 1, 1]} : vector<4x2x16x32xf32> to vector<1x2x16x32xf32>
    %173 = vector.shape_cast %172 : vector<1x2x16x32xf32> to vector<2x16x32xf32>
    %174 = vector.extract_strided_slice %169 {offsets = [2, 0, 0, 0], sizes = [1, 2, 16, 32], strides = [1, 1, 1, 1]} : vector<4x2x16x32xf32> to vector<1x2x16x32xf32>
    %175 = vector.shape_cast %174 : vector<1x2x16x32xf32> to vector<2x16x32xf32>
    %176 = vector.extract_strided_slice %169 {offsets = [3, 0, 0, 0], sizes = [1, 2, 16, 32], strides = [1, 1, 1, 1]} : vector<4x2x16x32xf32> to vector<1x2x16x32xf32>
    %177 = vector.shape_cast %176 : vector<1x2x16x32xf32> to vector<2x16x32xf32>
    %178 = tpu.concatenate %171, %173, %175, %177 in 2 : vector<2x16x32xf32>, vector<2x16x32xf32>, vector<2x16x32xf32>, vector<2x16x32xf32> -> vector<2x16x128xf32>
    %179 = vector.shape_cast %178 : vector<2x16x128xf32> to vector<32x128xf32>
    %180 = arith.truncf %179 : vector<32x128xf32> to vector<32x128xbf16>
    %181 = vector.extract_strided_slice %167 {offsets = [0, 0], sizes = [128, 128], strides = [1, 1]} : vector<256x128xbf16> to vector<128x128xbf16>
    %cst_49 = arith.constant dense<0.000000e+00> : vector<32x128xf32>
    %182 = tpu.matmul %180, %181, %cst_49 {dimension_numbers = #tpu.dot_dimension_numbers<[1], [0], [0], [1], [0, 0, 1, 1], [], []>} : vector<32x128xbf16>, vector<128x128xbf16>, vector<32x128xf32> -> vector<32x128xf32>
    %183 = vector.shape_cast %138 : vector<8x16x32xf32> to vector<4x2x16x32xf32>
    %184 = vector.extract_strided_slice %183 {offsets = [0, 0, 0, 0], sizes = [1, 2, 16, 32], strides = [1, 1, 1, 1]} : vector<4x2x16x32xf32> to vector<1x2x16x32xf32>
    %185 = vector.shape_cast %184 : vector<1x2x16x32xf32> to vector<2x16x32xf32>
    %186 = vector.extract_strided_slice %183 {offsets = [1, 0, 0, 0], sizes = [1, 2, 16, 32], strides = [1, 1, 1, 1]} : vector<4x2x16x32xf32> to vector<1x2x16x32xf32>
    %187 = vector.shape_cast %186 : vector<1x2x16x32xf32> to vector<2x16x32xf32>
    %188 = vector.extract_strided_slice %183 {offsets = [2, 0, 0, 0], sizes = [1, 2, 16, 32], strides = [1, 1, 1, 1]} : vector<4x2x16x32xf32> to vector<1x2x16x32xf32>
    %189 = vector.shape_cast %188 : vector<1x2x16x32xf32> to vector<2x16x32xf32>
    %190 = vector.extract_strided_slice %183 {offsets = [3, 0, 0, 0], sizes = [1, 2, 16, 32], strides = [1, 1, 1, 1]} : vector<4x2x16x32xf32> to vector<1x2x16x32xf32>
    %191 = vector.shape_cast %190 : vector<1x2x16x32xf32> to vector<2x16x32xf32>
    %192 = tpu.concatenate %185, %187, %189, %191 in 2 : vector<2x16x32xf32>, vector<2x16x32xf32>, vector<2x16x32xf32>, vector<2x16x32xf32> -> vector<2x16x128xf32>
    %193 = vector.shape_cast %192 : vector<2x16x128xf32> to vector<32x128xf32>
    %194 = arith.truncf %193 : vector<32x128xf32> to vector<32x128xbf16>
    %195 = vector.extract_strided_slice %167 {offsets = [128, 0], sizes = [128, 128], strides = [1, 1]} : vector<256x128xbf16> to vector<128x128xbf16>
    %cst_50 = arith.constant dense<0.000000e+00> : vector<32x128xf32>
    %196 = tpu.matmul %194, %195, %cst_50 {dimension_numbers = #tpu.dot_dimension_numbers<[1], [0], [0], [1], [0, 0, 1, 1], [], []>} : vector<32x128xbf16>, vector<128x128xbf16>, vector<32x128xf32> -> vector<32x128xf32>
    %197 = arith.addf %182, %196 : vector<32x128xf32>
    %c0_51 = arith.constant 0 : index
    %c0_52 = arith.constant 0 : index
    %198 = vector.load %arg11[%c0_51, %c0_52] : memref<1x128xf32, #tpu.memory_space<vmem>>, vector<1x128xf32>
    %199 = vector.broadcast %198 : vector<1x128xf32> to vector<32x128xf32>
    %200 = arith.addf %197, %199 : vector<32x128xf32>
    %201 = vector.shape_cast %152 : vector<8x16x32xf32> to vector<4x2x16x32xf32>
    %202 = vector.extract_strided_slice %201 {offsets = [0, 0, 0, 0], sizes = [1, 2, 16, 32], strides = [1, 1, 1, 1]} : vector<4x2x16x32xf32> to vector<1x2x16x32xf32>
    %203 = vector.shape_cast %202 : vector<1x2x16x32xf32> to vector<2x16x32xf32>
    %204 = vector.extract_strided_slice %201 {offsets = [1, 0, 0, 0], sizes = [1, 2, 16, 32], strides = [1, 1, 1, 1]} : vector<4x2x16x32xf32> to vector<1x2x16x32xf32>
    %205 = vector.shape_cast %204 : vector<1x2x16x32xf32> to vector<2x16x32xf32>
    %206 = vector.extract_strided_slice %201 {offsets = [2, 0, 0, 0], sizes = [1, 2, 16, 32], strides = [1, 1, 1, 1]} : vector<4x2x16x32xf32> to vector<1x2x16x32xf32>
    %207 = vector.shape_cast %206 : vector<1x2x16x32xf32> to vector<2x16x32xf32>
    %208 = vector.extract_strided_slice %201 {offsets = [3, 0, 0, 0], sizes = [1, 2, 16, 32], strides = [1, 1, 1, 1]} : vector<4x2x16x32xf32> to vector<1x2x16x32xf32>
    %209 = vector.shape_cast %208 : vector<1x2x16x32xf32> to vector<2x16x32xf32>
    %210 = tpu.concatenate %203, %205, %207, %209 in 2 : vector<2x16x32xf32>, vector<2x16x32xf32>, vector<2x16x32xf32>, vector<2x16x32xf32> -> vector<2x16x128xf32>
    %211 = vector.shape_cast %210 : vector<2x16x128xf32> to vector<32x128xf32>
    %212 = arith.truncf %211 : vector<32x128xf32> to vector<32x128xbf16>
    %213 = vector.extract_strided_slice %168 {offsets = [0, 0], sizes = [128, 128], strides = [1, 1]} : vector<256x128xbf16> to vector<128x128xbf16>
    %cst_53 = arith.constant dense<0.000000e+00> : vector<32x128xf32>
    %214 = tpu.matmul %212, %213, %cst_53 {dimension_numbers = #tpu.dot_dimension_numbers<[1], [0], [0], [1], [0, 0, 1, 1], [], []>} : vector<32x128xbf16>, vector<128x128xbf16>, vector<32x128xf32> -> vector<32x128xf32>
    %215 = vector.shape_cast %166 : vector<8x16x32xf32> to vector<4x2x16x32xf32>
    %216 = vector.extract_strided_slice %215 {offsets = [0, 0, 0, 0], sizes = [1, 2, 16, 32], strides = [1, 1, 1, 1]} : vector<4x2x16x32xf32> to vector<1x2x16x32xf32>
    %217 = vector.shape_cast %216 : vector<1x2x16x32xf32> to vector<2x16x32xf32>
    %218 = vector.extract_strided_slice %215 {offsets = [1, 0, 0, 0], sizes = [1, 2, 16, 32], strides = [1, 1, 1, 1]} : vector<4x2x16x32xf32> to vector<1x2x16x32xf32>
    %219 = vector.shape_cast %218 : vector<1x2x16x32xf32> to vector<2x16x32xf32>
    %220 = vector.extract_strided_slice %215 {offsets = [2, 0, 0, 0], sizes = [1, 2, 16, 32], strides = [1, 1, 1, 1]} : vector<4x2x16x32xf32> to vector<1x2x16x32xf32>
    %221 = vector.shape_cast %220 : vector<1x2x16x32xf32> to vector<2x16x32xf32>
    %222 = vector.extract_strided_slice %215 {offsets = [3, 0, 0, 0], sizes = [1, 2, 16, 32], strides = [1, 1, 1, 1]} : vector<4x2x16x32xf32> to vector<1x2x16x32xf32>
    %223 = vector.shape_cast %222 : vector<1x2x16x32xf32> to vector<2x16x32xf32>
    %224 = tpu.concatenate %217, %219, %221, %223 in 2 : vector<2x16x32xf32>, vector<2x16x32xf32>, vector<2x16x32xf32>, vector<2x16x32xf32> -> vector<2x16x128xf32>
    %225 = vector.shape_cast %224 : vector<2x16x128xf32> to vector<32x128xf32>
    %226 = arith.truncf %225 : vector<32x128xf32> to vector<32x128xbf16>
    %227 = vector.extract_strided_slice %168 {offsets = [128, 0], sizes = [128, 128], strides = [1, 1]} : vector<256x128xbf16> to vector<128x128xbf16>
    %cst_54 = arith.constant dense<0.000000e+00> : vector<32x128xf32>
    %228 = tpu.matmul %226, %227, %cst_54 {dimension_numbers = #tpu.dot_dimension_numbers<[1], [0], [0], [1], [0, 0, 1, 1], [], []>} : vector<32x128xbf16>, vector<128x128xbf16>, vector<32x128xf32> -> vector<32x128xf32>
    %229 = arith.addf %214, %228 : vector<32x128xf32>
    %c0_55 = arith.constant 0 : index
    %c0_56 = arith.constant 0 : index
    %230 = vector.load %arg13[%c0_55, %c0_56] : memref<1x128xf32, #tpu.memory_space<vmem>>, vector<1x128xf32>
    %231 = vector.broadcast %230 : vector<1x128xf32> to vector<32x128xf32>
    %232 = arith.addf %229, %231 : vector<32x128xf32>
    %233 = arith.addf %200, %32 : vector<32x128xf32>
    %234 = arith.truncf %233 : vector<32x128xf32> to vector<32x128xbf16>
    %c0_57 = arith.constant 0 : index
    %c0_58 = arith.constant 0 : index
    %235 = vector.load %arg14[%c0_57, %c0_58] : memref<128x256xbf16, #tpu.memory_space<vmem>>, vector<128x256xbf16>
    %cst_59 = arith.constant dense<0.000000e+00> : vector<32x256xf32>
    %236 = tpu.matmul %234, %235, %cst_59 {dimension_numbers = #tpu.dot_dimension_numbers<[1], [0], [0], [1], [0, 0, 1, 1], [], []>} : vector<32x128xbf16>, vector<128x256xbf16>, vector<32x256xf32> -> vector<32x256xf32>
    %c0_60 = arith.constant 0 : index
    %c0_61 = arith.constant 0 : index
    %237 = vector.load %arg15[%c0_60, %c0_61] : memref<1x256xf32, #tpu.memory_space<vmem>>, vector<1x256xf32>
    %238 = vector.broadcast %237 : vector<1x256xf32> to vector<32x256xf32>
    %239 = arith.addf %236, %238 : vector<32x256xf32>
    %cst_62 = arith.constant 5.000000e-01 : f32
    %240 = vector.broadcast %cst_62 : f32 to vector<32x256xf32>
    %241 = arith.mulf %240, %239 : vector<32x256xf32>
    %cst_63 = arith.constant 0.707106769 : f32
    %242 = vector.broadcast %cst_63 : f32 to vector<32x256xf32>
    %243 = arith.mulf %239, %242 : vector<32x256xf32>
    %cst_64 = arith.constant 0.000000e+00 : f32
    %244 = vector.broadcast %cst_64 : f32 to vector<32x256xf32>
    %245 = arith.cmpf oge, %243, %244 : vector<32x256xf32>
    %cst_65 = arith.constant 1.000000e+00 : f32
    %cst_66 = arith.constant -1.000000e+00 : f32
    %246 = vector.broadcast %cst_65 : f32 to vector<32x256xf32>
    %247 = vector.broadcast %cst_66 : f32 to vector<32x256xf32>
    %248 = arith.select %245, %246, %247 : vector<32x256xi1>, vector<32x256xf32>
    %249 = math.absf %243 : vector<32x256xf32>
    %cst_67 = arith.constant 0.327591091 : f32
    %250 = vector.broadcast %cst_67 : f32 to vector<32x256xf32>
    %251 = arith.mulf %250, %249 : vector<32x256xf32>
    %cst_68 = arith.constant 1.000000e+00 : f32
    %252 = vector.broadcast %cst_68 : f32 to vector<32x256xf32>
    %253 = arith.addf %252, %251 : vector<32x256xf32>
    %254 = tpu.reciprocal %253 {approx = true} : vector<32x256xf32> -> vector<32x256xf32>
    %cst_69 = arith.constant 1.06140542 : f32
    %255 = vector.broadcast %cst_69 : f32 to vector<32x256xf32>
    %256 = arith.mulf %255, %254 : vector<32x256xf32>
    %cst_70 = arith.constant -1.45315206 : f32
    %257 = vector.broadcast %cst_70 : f32 to vector<32x256xf32>
    %258 = arith.addf %256, %257 : vector<32x256xf32>
    %259 = arith.mulf %258, %254 : vector<32x256xf32>
    %cst_71 = arith.constant 1.42141378 : f32
    %260 = vector.broadcast %cst_71 : f32 to vector<32x256xf32>
    %261 = arith.addf %259, %260 : vector<32x256xf32>
    %262 = arith.mulf %261, %254 : vector<32x256xf32>
    %cst_72 = arith.constant -0.284496725 : f32
    %263 = vector.broadcast %cst_72 : f32 to vector<32x256xf32>
    %264 = arith.addf %262, %263 : vector<32x256xf32>
    %265 = arith.mulf %264, %254 : vector<32x256xf32>
    %cst_73 = arith.constant 0.254829586 : f32
    %266 = vector.broadcast %cst_73 : f32 to vector<32x256xf32>
    %267 = arith.addf %265, %266 : vector<32x256xf32>
    %268 = arith.mulf %267, %254 : vector<32x256xf32>
    %cst_74 = arith.constant 0.000000e+00 : f32
    %269 = vector.broadcast %cst_74 : f32 to vector<32x256xf32>
    %270 = arith.subf %269, %249 : vector<32x256xf32>
    %271 = arith.mulf %270, %249 : vector<32x256xf32>
    %272 = math.exp %271 : vector<32x256xf32>
    %273 = arith.mulf %268, %272 : vector<32x256xf32>
    %cst_75 = arith.constant 1.000000e+00 : f32
    %274 = vector.broadcast %cst_75 : f32 to vector<32x256xf32>
    %275 = arith.subf %274, %273 : vector<32x256xf32>
    %276 = arith.mulf %248, %275 : vector<32x256xf32>
    %cst_76 = arith.constant 1.000000e+00 : f32
    %277 = vector.broadcast %cst_76 : f32 to vector<32x256xf32>
    %278 = arith.addf %277, %276 : vector<32x256xf32>
    %279 = arith.mulf %241, %278 : vector<32x256xf32>
    %280 = arith.truncf %279 : vector<32x256xf32> to vector<32x256xbf16>
    %c0_77 = arith.constant 0 : index
    %c0_78 = arith.constant 0 : index
    %281 = vector.load %arg16[%c0_77, %c0_78] : memref<256x128xbf16, #tpu.memory_space<vmem>>, vector<256x128xbf16>
    %cst_79 = arith.constant dense<0.000000e+00> : vector<32x128xf32>
    %282 = tpu.matmul %280, %281, %cst_79 {dimension_numbers = #tpu.dot_dimension_numbers<[1], [0], [0], [1], [0, 0, 1, 1], [], []>} : vector<32x256xbf16>, vector<256x128xbf16>, vector<32x128xf32> -> vector<32x128xf32>
    %c0_80 = arith.constant 0 : index
    %c0_81 = arith.constant 0 : index
    %283 = vector.load %arg17[%c0_80, %c0_81] : memref<1x128xf32, #tpu.memory_space<vmem>>, vector<1x128xf32>
    %284 = vector.broadcast %283 : vector<1x128xf32> to vector<32x128xf32>
    %285 = arith.addf %282, %284 : vector<32x128xf32>
    %286 = arith.addf %285, %233 : vector<32x128xf32>
    %287 = vector.shape_cast %286 : vector<32x128xf32> to vector<2x16x128xf32>
    %c0_82 = arith.constant 0 : index
    %c0_83 = arith.constant 0 : index
    %c0_84 = arith.constant 0 : index
    %288 = vector.load %arg21[%c0_82, %c0_83, %c0_84] : memref<2x16x128xf32, #tpu.memory_space<vmem>>, vector<2x16x128xf32>
    tpu.vector_store %arg21[%c0_82, %c0_83, %c0_84], %287 {strides = array<i32>} : memref<2x16x128xf32, #tpu.memory_space<vmem>>, vector<2x16x128xf32>,
    %289 = arith.truncf %232 : vector<32x128xf32> to vector<32x128xbf16>
    %c0_85 = arith.constant 0 : index
    %c0_86 = arith.constant 0 : index
    %290 = vector.load %arg18[%c0_85, %c0_86] : memref<128x128xbf16, #tpu.memory_space<vmem>>, vector<128x128xbf16>
    %cst_87 = arith.constant dense<0.000000e+00> : vector<32x128xf32>
    %291 = tpu.matmul %289, %290, %cst_87 {dimension_numbers = #tpu.dot_dimension_numbers<[1], [0], [0], [1], [0, 0, 1, 1], [], []>} : vector<32x128xbf16>, vector<128x128xbf16>, vector<32x128xf32> -> vector<32x128xf32>
    %c0_88 = arith.constant 0 : index
    %c0_89 = arith.constant 0 : index
    %292 = vector.load %arg19[%c0_88, %c0_89] : memref<1x128xf32, #tpu.memory_space<vmem>>, vector<1x128xf32>
    %293 = vector.broadcast %292 : vector<1x128xf32> to vector<32x128xf32>
    %294 = arith.addf %291, %293 : vector<32x128xf32>
    %c0_90 = arith.constant 0 : index
    %c0_91 = arith.constant 0 : index
    %295 = vector.load %arg20[%c0_90, %c0_91] : memref<1x128xf32, #tpu.memory_space<vmem>>, vector<1x128xf32>
    %296 = arith.negf %295 : vector<1x128xf32>
    %297 = math.exp %296 : vector<1x128xf32>
    %cst_92 = arith.constant 1.000000e+00 : f32
    %298 = vector.broadcast %cst_92 : f32 to vector<1x128xf32>
    %299 = arith.addf %298, %297 : vector<1x128xf32>
    %300 = arith.divf %298, %299 : vector<1x128xf32>
    %301 = vector.broadcast %300 : vector<1x128xf32> to vector<32x128xf32>
    %302 = arith.mulf %33, %301 : vector<32x128xf32>
    %cst_93 = arith.constant 1.000000e+00 : f32
    %303 = vector.broadcast %cst_93 : f32 to vector<1x128xf32>
    %304 = arith.subf %303, %300 : vector<1x128xf32>
    %305 = vector.broadcast %304 : vector<1x128xf32> to vector<32x128xf32>
    %306 = arith.mulf %294, %305 : vector<32x128xf32>
    %307 = arith.addf %302, %306 : vector<32x128xf32>
    %308 = vector.shape_cast %307 : vector<32x128xf32> to vector<2x16x128xf32>
    %c0_94 = arith.constant 0 : index
    %c0_95 = arith.constant 0 : index
    %c0_96 = arith.constant 0 : index
    %309 = vector.load %arg22[%c0_94, %c0_95, %c0_96] : memref<2x16x128xf32, #tpu.memory_space<vmem>>, vector<2x16x128xf32>
    tpu.vector_store %arg22[%c0_94, %c0_95, %c0_96], %308 {strides = array<i32>} : memref<2x16x128xf32, #tpu.memory_space<vmem>>, vector<2x16x128xf32>,
    return
  }
  func.func @transform_0(%arg0: i32) -> (i32, i32, i32) {
    %c0_i32 = arith.constant 0 : i32
    %c0_i32_0 = arith.constant 0 : i32
    %c0_i32_1 = arith.constant 0 : i32
    return %arg0, %c0_i32, %c0_i32_0 : i32, i32, i32
  }
  func.func @transform_1(%arg0: i32) -> (i32, i32, i32) {
    %c0_i32 = arith.constant 0 : i32
    %c0_i32_0 = arith.constant 0 : i32
    %c0_i32_1 = arith.constant 0 : i32
    return %arg0, %c0_i32, %c0_i32_0 : i32, i32, i32
  }
  func.func @transform_2(%arg0: i32) -> (i32, i32) {
    %c0_i32 = arith.constant 0 : i32
    %c0_i32_0 = arith.constant 0 : i32
    %c0_i32_1 = arith.constant 0 : i32
    return %c0_i32, %c0_i32_0 : i32, i32
  }
  func.func @transform_3(%arg0: i32) -> (i32, i32) {
    %c0_i32 = arith.constant 0 : i32
    %c0_i32_0 = arith.constant 0 : i32
    %c0_i32_1 = arith.constant 0 : i32
    return %c0_i32, %c0_i32_0 : i32, i32
  }
  func.func @transform_4(%arg0: i32) -> (i32, i32) {
    %c0_i32 = arith.constant 0 : i32
    %c0_i32_0 = arith.constant 0 : i32
    %c0_i32_1 = arith.constant 0 : i32
    return %c0_i32, %c0_i32_0 : i32, i32
  }
  func.func @transform_5(%arg0: i32) -> (i32, i32) {
    %c0_i32 = arith.constant 0 : i32
    %c0_i32_0 = arith.constant 0 : i32
    %c0_i32_1 = arith.constant 0 : i32
    return %c0_i32, %c0_i32_0 : i32, i32
  }
  func.func @transform_6(%arg0: i32) -> (i32, i32) {
    %c0_i32 = arith.constant 0 : i32
    %c0_i32_0 = arith.constant 0 : i32
    %c0_i32_1 = arith.constant 0 : i32
    return %c0_i32, %c0_i32_0 : i32, i32
  }
  func.func @transform_7(%arg0: i32) -> (i32, i32) {
    %c0_i32 = arith.constant 0 : i32
    %c0_i32_0 = arith.constant 0 : i32
    %c0_i32_1 = arith.constant 0 : i32
    return %c0_i32, %c0_i32_0 : i32, i32
  }
  func.func @transform_8(%arg0: i32) -> (i32, i32) {
    %c0_i32 = arith.constant 0 : i32
    %c0_i32_0 = arith.constant 0 : i32
    %c0_i32_1 = arith.constant 0 : i32
    return %c0_i32, %c0_i32_0 : i32, i32
  }
  func.func @transform_9(%arg0: i32) -> (i32, i32) {
    %c0_i32 = arith.constant 0 : i32
    %c0_i32_0 = arith.constant 0 : i32
    %c0_i32_1 = arith.constant 0 : i32
    return %c0_i32, %c0_i32_0 : i32, i32
  }
  func.func @transform_10(%arg0: i32) -> (i32, i32) {
    %c0_i32 = arith.constant 0 : i32
    %c0_i32_0 = arith.constant 0 : i32
    %c0_i32_1 = arith.constant 0 : i32
    return %c0_i32, %c0_i32_0 : i32, i32
  }
  func.func @transform_11(%arg0: i32) -> (i32, i32) {
    %c0_i32 = arith.constant 0 : i32
    %c0_i32_0 = arith.constant 0 : i32
    %c0_i32_1 = arith.constant 0 : i32
    return %c0_i32, %c0_i32_0 : i32, i32
  }
  func.func @transform_12(%arg0: i32) -> (i32, i32) {
    %c0_i32 = arith.constant 0 : i32
    %c0_i32_0 = arith.constant 0 : i32
    %c0_i32_1 = arith.constant 0 : i32
    return %c0_i32, %c0_i32_0 : i32, i32
  }
  func.func @transform_13(%arg0: i32) -> (i32, i32) {
    %c0_i32 = arith.constant 0 : i32
    %c0_i32_0 = arith.constant 0 : i32
    %c0_i32_1 = arith.constant 0 : i32
    return %c0_i32, %c0_i32_0 : i32, i32
  }
  func.func @transform_14(%arg0: i32) -> (i32, i32) {
    %c0_i32 = arith.constant 0 : i32
    %c0_i32_0 = arith.constant 0 : i32
    %c0_i32_1 = arith.constant 0 : i32
    return %c0_i32, %c0_i32_0 : i32, i32
  }
  func.func @transform_15(%arg0: i32) -> (i32, i32) {
    %c0_i32 = arith.constant 0 : i32
    %c0_i32_0 = arith.constant 0 : i32
    %c0_i32_1 = arith.constant 0 : i32
    return %c0_i32, %c0_i32_0 : i32, i32
  }
  func.func @transform_16(%arg0: i32) -> (i32, i32) {
    %c0_i32 = arith.constant 0 : i32
    %c0_i32_0 = arith.constant 0 : i32
    %c0_i32_1 = arith.constant 0 : i32
    return %c0_i32, %c0_i32_0 : i32, i32
  }
  func.func @transform_17(%arg0: i32) -> (i32, i32) {
    %c0_i32 = arith.constant 0 : i32
    %c0_i32_0 = arith.constant 0 : i32
    %c0_i32_1 = arith.constant 0 : i32
    return %c0_i32, %c0_i32_0 : i32, i32
  }
  func.func @transform_18(%arg0: i32) -> (i32, i32) {
    %c0_i32 = arith.constant 0 : i32
    %c0_i32_0 = arith.constant 0 : i32
    %c0_i32_1 = arith.constant 0 : i32
    return %c0_i32, %c0_i32_0 : i32, i32
  }
  func.func @transform_19(%arg0: i32) -> (i32, i32) {
    %c0_i32 = arith.constant 0 : i32
    %c0_i32_0 = arith.constant 0 : i32
    %c0_i32_1 = arith.constant 0 : i32
    return %c0_i32, %c0_i32_0 : i32, i32
  }
  func.func @transform_20(%arg0: i32) -> (i32, i32, i32) {
    %c0_i32 = arith.constant 0 : i32
    %c0_i32_0 = arith.constant 0 : i32
    %c0_i32_1 = arith.constant 0 : i32
    return %arg0, %c0_i32, %c0_i32_0 : i32, i32, i32
  }
  func.func @transform_21(%arg0: i32) -> (i32, i32, i32) {
    %c0_i32 = arith.constant 0 : i32
    %c0_i32_0 = arith.constant 0 : i32
    %c0_i32_1 = arith.constant 0 : i32
    return %arg0, %c0_i32, %c0_i32_0 : i32, i32, i32
  }
}

</mosaic_0001>

<bundles_post_ra>
// kernel: _lambda_.1
= control target key start
LH: loop header
LB: loop body
LE: loop exit
PB: predicated region body
PF: predicated region fallthrough
CT: control target
= control target key end

     0   :  { %s11222_s0 = inlined_call_operand.hbm [shape: f32[4,16,128], index: 0, kind: input, shape index: {}]   ;;  %s11223_s1 = inlined_call_operand.hbm [shape: f32[4,16,128], index: 1, kind: input, shape index: {}]   ;;  %s11224_s2 = inlined_call_operand.vmem [shape: f32[16,128], index: 2, kind: input, shape index: {}]   ;;  %s11225_s3 = inlined_call_operand.vmem [shape: f32[1,128], index: 3, kind: input, shape index: {}]   ;;  %s11226_s4 = inlined_call_operand.vmem [shape: f32[1,128], index: 4, kind: input, shape index: {}]   ;;  %s11227_s5 = inlined_call_operand.hbm [shape: bf16[128,384], index: 5, kind: input, shape index: {}]   ;;  %s11228_s6 = inlined_call_operand.vmem [shape: f32[1,384], index: 6, kind: input, shape index: {}]   ;;  %s11229_s7 = inlined_call_operand.hbm [shape: bf16[128,384], index: 7, kind: input, shape index: {}]   ;;  %s11230_s8 = inlined_call_operand.vmem [shape: f32[1,384], index: 8, kind: input, shape index: {}]   ;;  %s11231_s9 = inlined_call_operand.hbm [shape: bf16[256,128], index: 9, kind: input, shape index: {}]   ;;  %s11232_s10 = inlined_call_operand.vmem [shape: f32[1,128], index: 10, kind: input, shape index: {}]   ;;  %s11233_s11 = inlined_call_operand.hbm [shape: bf16[256,128], index: 11, kind: input, shape index: {}]   ;;  %s11234_s12 = inlined_call_operand.vmem [shape: f32[1,128], index: 12, kind: input, shape index: {}]   ;;  %s11235_s13 = inlined_call_operand.hbm [shape: bf16[128,256], index: 13, kind: input, shape index: {}]   ;;  %s11236_s14 = inlined_call_operand.vmem [shape: f32[1,256], index: 14, kind: input, shape index: {}]   ;;  %s11237_s15 = inlined_call_operand.hbm [shape: bf16[256,128], index: 15, kind: input, shape index: {}]   ;;  %s11238_s16 = inlined_call_operand.vmem [shape: f32[1,128], index: 16, kind: input, shape index: {}]   ;;  %s11239_s17 = inlined_call_operand.hbm [shape: bf16[128,128], index: 17, kind: input, shape index: {}]   ;;  %s11240_s18 = inlined_call_operand.vmem [shape: f32[1,128], index: 18, kind: input, shape index: {}]   ;;  %s11241_s19 = inlined_call_operand.vmem [shape: f32[1,128], index: 19, kind: input, shape index: {}]   ;;  %s11242_s20 = inlined_call_operand.hbm [shape: f32[4,16,128], index: 20, kind: output, shape index: {0}]   ;;  %s11243_s21 = inlined_call_operand.hbm [shape: f32[4,16,128], index: 21, kind: output, shape index: {1}]  }
   0x1   :  { %11290 = sst [smem:[#allocation64_spill]] %s11222_s0 }
   0x2   :  { %11291 = sst [smem:[#allocation65_spill]] %s11223_s1 }
   0x3   :  { %11292 = sst [smem:[#allocation66_spill]] %s11224_s2 }
   0x4   :  { %11293 = sst [smem:[#allocation67_spill]] %s11225_s3 }
   0x5   :  { %11294 = sst [smem:[#allocation68_spill]] %s11226_s4 }
   0x6   :  { %11295 = sst [smem:[#allocation69_spill]] %s11227_s5 }
   0x7   :  { %11296 = sst [smem:[#allocation70_spill]] %s11229_s7 }
   0x8   :  { %11297 = sst [smem:[#allocation71_spill]] %s11231_s9 }
   0x9   :  { %11298 = sst [smem:[#allocation72_spill]] %s11233_s11 }
   0xa   :  { %11299 = sst [smem:[#allocation73_spill]] %s11235_s13 }
   0xb   :  { %11300 = sst [smem:[#allocation74_spill]] %s11237_s15 }
   0xc   :  { %11301 = sst [smem:[#allocation75_spill]] %s11238_s16 }
   0xd   :  { %11302 = sst [smem:[#allocation76_spill]] %s11239_s17 }
   0xe   :  { %11303 = sst [smem:[#allocation77_spill]] %s11240_s18 }
   0xf   :  { %11304 = sst [smem:[#allocation78_spill]] %s11242_s20 }
  0x10   :  { %11305 = sst [smem:[#allocation79_spill]] %s11243_s21 }
  0x11   :  { %27 = vsyncpa [#allocation3], 0 }
  0x12   :  { %29 = vsyncpa [#allocation3 + $0x1], 0 }
  0x13   :  { %30 = vsyncpa [#allocation6], 0 }
  0x14   :  { %32 = vsyncpa [#allocation6 + $0x1], 0 }
  0x15   :  { %33 = vsyncpa [#allocation9], 0 }
  0x16   :  { %34 = vsyncpa [#allocation12], 0 }
  0x17   :  { %35 = vsyncpa [#allocation15], 0 }
  0x18   :  { %36 = vsyncpa [#allocation4], 0 }
  0x19   :  { %38 = vsyncpa [#allocation4 + $0x1], 0 }
  0x1a   :  { %39 = vsyncpa [#allocation19], 0 }
  0x1b   :  { %41 = vsyncpa [#allocation19 + $0x1], 0  ;;  %s9080_s2 = smov 0   ;;  %s9082_s25 = smov 0  }
  0x1c   :  { %s9084_s26 = smov 0   ;;  %s9086_s27 = smov 0  }
  0x1d LB: > { %11306 = sst [smem:[#allocation28_spill]] %s8930_s2  ;;  %s8944_s3 = smov [#allocation7]   ;;  %s8942_s27 = sphi %s9086_s27, %s11427_s27   ;;  %s8938_s26 = sphi %s9084_s26, %s11429_s26   ;;  %s8934_s25 = sphi %s9082_s25, %s11431_s25   ;;  %s8930_s2 = sphi %s9080_s2, %s11430_s2  }
  0x1e   : > { %11307 = sst [smem:[#allocation29_spill]] %s8938_s26  ;;  %s555_s28 = sshll.u32 %s8944_s3, 4  ;;  %s556_s28 = int_to_ptr.vmem [resolvable:$true] %s555_s28 }
  0x1f   : > { %s9101_s29 = sadd.s32 4294967295, %s8942_s27   ;;  %p6888_p0 = scmp.ge.s32.totalorder %s8942_s27, 1 }
  0x20   : > { %p11249_p1 = scmp.eq.s32.totalorder %s9101_s29, 0  ;;  %p534_p2 = scmp.lt.s32.totalorder %s8942_s27, 3 }
  0x21   : > { %s8945_s4 = smov [#allocation8]   ;;  %s8946_s22 = smov [#allocation11]  }
  0x22   : > { %p9106_p3 = pnand %p6888_p0, %p534_p2  ;;  %s571_s30 = sshll.u32 %s8945_s4, 4  ;;  %s572_s30 = int_to_ptr.vmem [resolvable:$true] %s571_s30 }
  0x23   : > { %s603_s23 = sshll.u32 %s8946_s22, 4  ;;  %s8601_s24 = scalar_lea.vmem %s556_s28, 3072  ;;  %s604_s23 = int_to_ptr.vmem [resolvable:$true] %s603_s23 }
  0x24   : > { %s11308_s0 = scalar_select %p9106_p3, 1, 0 }
  0x25   : > { %p7912_p5 = pneg %p9106_p3  ;;  %p8602_p8 = scmp.ne.s32.totalorder %s556_s28, %s8601_s24 }
  0x26   : > { %p8609_p11 = scmp.lt.s32.totalorder %s556_s28, %s556_s28  ;;  %p8610_p12 = scmp.lt.s32.totalorder %s8601_s24, %s8601_s24 }
  0x27   : > { %p9115_p6 = pnand %p7912_p5, %p11249_p1 }
  0x28   : > { %p8611_p13 = por %p8610_p12, %p8609_p11 }
  0x29   : > { %p9121_p7 = pneg %p9115_p6 }
  0x2b   : > { %p8604_p9 = pnand %p8602_p8, %p9121_p7 }
  0x2d   : > { %p8605_p10 = pneg %p8604_p9 }
  0x2f   : > { %p8612_p0 = pnand %p8611_p13, %p8605_p10 }
  0x31   : > { %8615 = shalt.err (!%p8612_p0)
}
  0x32   : > { %s8947_s3 = smov 192   ;;  %s8948_s4 = smov 12  }
  0x33   : > { %s11311_s16 = sld [smem:[#allocation69_spill]]  ;;  %s8627_s21 = scalar_lea.vmem %s572_s30, 3072 }
  0x34   : > { %p8628_p2 = scmp.ne.s32.totalorder %s572_s30, %s8627_s21  ;;  %p8635_p9 = scmp.lt.s32.totalorder %s572_s30, %s572_s30 }
  0x35   : > { %p8636_p4 = scmp.lt.s32.totalorder %s8627_s21, %s8627_s21 }
  0x36   : > { %p8630_p5 = pnand %p8628_p2, %p9121_p7 }
  0x37   : > { %p8637_p1 = por %p8636_p4, %p8635_p9 }
  0x38   : > { %p8631_p8 = pneg %p8630_p5 }
  0x39   : > { %7915 = dma.hbm_to_vmem [thread:$0]  (!%p9115_p6), %s11311_s16, 3072, %s556_s28, [#allocation6], %s8947_s3, %s8947_s3, %s8948_s4  }
  0x3a   : > { %p8638_p11 = pnand %p8637_p1, %p8631_p8 }
  0x3c   : > { %8641 = shalt.err (!%p8638_p11)
}
  0x3d   : > { %s11312_s7 = sld [smem:[#allocation70_spill]]  ;;  %s8653_s20 = scalar_lea.vmem %s604_s23, 2048 }
  0x3e   : > { %p8654_p10 = scmp.ne.s32.totalorder %s604_s23, %s8653_s20  ;;  %p8661_p0 = scmp.lt.s32.totalorder %s604_s23, %s604_s23 }
  0x3f   : > { %p8662_p2 = scmp.lt.s32.totalorder %s8653_s20, %s8653_s20 }
  0x40   : > { %p8656_p12 = pnand %p8654_p10, %p9121_p7 }
  0x41   : > { %p8663_p5 = por %p8662_p2, %p8661_p0 }
  0x42   : > { %p8657_p13 = pneg %p8656_p12 }
  0x43   : > { %7918 = dma.hbm_to_vmem [thread:$0]  (!%p9115_p6), %s11312_s7, 3072, %s572_s30, [#allocation9], %s8947_s3, %s8947_s3, %s8948_s4  }
  0x44   : > { %p8664_p3 = pnand %p8663_p5, %p8657_p13 }
  0x46   : > { %8667 = shalt.err (!%p8664_p3)
}
  0x47   : > { %s8949_s16 = smov 64   ;;  %s8950_s21 = smov 4  }
  0x48   : > { %s11313_s11 = sld [smem:[#allocation72_spill]]  ;;  %s8951_s30 = smov [#allocation14]  }
  0x49   : > { %s635_s3 = sshll.u32 %s8951_s30, 4  ;;  %s8952_s4 = smov [#allocation10]   ;;  %s636_s3 = int_to_ptr.vmem [resolvable:$true] %s635_s3 }
  0x4a   : > { %s587_s22 = sshll.u32 %s8952_s4, 4  ;;  %s8679_s24 = scalar_lea.vmem %s636_s3, 2048  ;;  %s588_s22 = int_to_ptr.vmem [resolvable:$true] %s587_s22 }
  0x4b   : > { %p8680_p1 = scmp.ne.s32.totalorder %s636_s3, %s8679_s24  ;;  %p8687_p8 = scmp.lt.s32.totalorder %s636_s3, %s636_s3 }
  0x4c   : > { %p8688_p9 = scmp.lt.s32.totalorder %s8679_s24, %s8679_s24 }
  0x4d   : > { %p8682_p3 = pnand %p8680_p1, %p9121_p7 }
  0x4e   : > { %7924 = dma.hbm_to_vmem [thread:$0]  (!%p9115_p6), %s11313_s11, 2048, %s604_s23, [#allocation12], %s8949_s16, %s8949_s16, %s8950_s21  }
  0x4f   : > { %p8683_p4 = pneg %p8682_p3  ;;  %p8689_p11 = por %p8688_p9, %p8687_p8 }
  0x51   : > { %p8690_p10 = pnand %p8689_p11, %p8683_p4 }
  0x53   : > { %8693 = shalt.err (!%p8690_p10)
}
  0x54   : > { %s11314_s15 = sld [smem:[#allocation74_spill]]  ;;  %s8705_s18 = scalar_lea.vmem %s588_s22, 2048 }
  0x55   : > { %p8706_p12 = scmp.ne.s32.totalorder %s588_s22, %s8705_s18  ;;  %p8713_p2 = scmp.lt.s32.totalorder %s588_s22, %s588_s22 }
  0x56   : > { %p8714_p5 = scmp.lt.s32.totalorder %s8705_s18, %s8705_s18 }
  0x57   : > { %p8708_p13 = pnand %p8706_p12, %p9121_p7 }
  0x58   : > { %p8715_p1 = por %p8714_p5, %p8713_p2 }
  0x59   : > { %p8709_p0 = pneg %p8708_p13 }
  0x5a   : > { %7930 = dma.hbm_to_vmem [thread:$0]  (!%p9115_p6), %s11314_s15, 2048, %s636_s3, [#allocation15], %s8949_s16, %s8949_s16, %s8950_s21  }
  0x5b   : > { %p8716_p3 = pnand %p8715_p1, %p8709_p0 }
  0x5d   : > { %8719 = shalt.err (!%p8716_p3)
}
  0x5e   : > { %s11315_s9 = sld [smem:[#allocation71_spill]]  ;;  %s8953_s3 = smov [#allocation13]  }
  0x5f   : > { %s619_s4 = sshll.u32 %s8953_s3, 4  ;;  %s620_s4 = int_to_ptr.vmem [resolvable:$true] %s619_s4 }
  0x60   : > { %s8731_s24 = scalar_lea.vmem %s620_s4, 2048  ;;  %p8739_p11 = scmp.lt.s32.totalorder %s620_s4, %s620_s4 }
  0x61   : > { %p8732_p4 = scmp.ne.s32.totalorder %s620_s4, %s8731_s24  ;;  %p8740_p10 = scmp.lt.s32.totalorder %s8731_s24, %s8731_s24 }
  0x63   : > { %p8734_p8 = pnand %p8732_p4, %p9121_p7  ;;  %p8741_p12 = por %p8740_p10, %p8739_p11 }
  0x64   : > { %7921 = dma.hbm_to_vmem [thread:$0]  (!%p9115_p6), %s11315_s9, 2048, %s588_s22, [#allocation9], %s8949_s16, %s8949_s16, %s8950_s21  }
  0x65   : > { %p8735_p9 = pneg %p8734_p8 }
  0x67   : > { %p8742_p13 = pnand %p8741_p12, %p8735_p9 }
  0x69   : > { %8745 = shalt.err (!%p8742_p13)
}
  0x6a   : > { %s11251_s23 = smov 128   ;;  %s11253_s20 = smov 8  }
  0x6b   : > { %s11316_s13 = sld [smem:[#allocation73_spill]]  ;;  %s8956_s28 = smov [#allocation16]  }
  0x6c   : > { %s651_s30 = sshll.u32 %s8956_s28, 4  ;;  %s652_s30 = int_to_ptr.vmem [resolvable:$true] %s651_s30 }
  0x6d   : > { %s8757_s3 = scalar_lea.vmem %s652_s30, 1024  ;;  %p8765_p1 = scmp.lt.s32.totalorder %s652_s30, %s652_s30 }
  0x6e   : > { %p8758_p0 = scmp.ne.s32.totalorder %s652_s30, %s8757_s3  ;;  %p8766_p3 = scmp.lt.s32.totalorder %s8757_s3, %s8757_s3 }
  0x70   : > { %p8760_p2 = pnand %p8758_p0, %p9121_p7  ;;  %p8767_p4 = por %p8766_p3, %p8765_p1 }
  0x71   : > { %7927 = dma.hbm_to_vmem [thread:$0]  (!%p9115_p6), %s11316_s13, 2048, %s620_s4, [#allocation12], %s11251_s23, %s11251_s23, %s11253_s20  }
  0x72   : > { %p8761_p5 = pneg %p8760_p2 }
  0x74   : > { %p8768_p8 = pnand %p8767_p4, %p8761_p5 }
  0x76   : > { %8771 = shalt.err (!%p8768_p8)
}
  0x77   : > { %s11317_s17 = sld [smem:[#allocation76_spill]]  ;;  %s6887_s5 = sadd.s32 4294967294, %s8942_s27  }
  0x78   : > { %s9191_s1 = sadd.s32 1, %s8942_s27   ;;  %s54_s22 = sadd.s32 1, %s8938_s26 }
  0x79   : > { %11318 = sst [smem:[#allocation30_spill]] %s9191_s1  ;;  %s51_s18 = ssub.s32 %s8942_s27, %s9191_s1 }
  0x7a   : > { %p61_p7 = scmp.ne.s32.totalorder %s8938_s26, %s8934_s25  ;;  %p52_p9 = scmp.eq.s32.totalorder %s51_s18, 0 }
  0x7b   : > { %p62_p11 = scmp.eq.s32.totalorder %s8942_s27, 0  ;;  %p67_p10 = scmp.ne.s32.totalorder %s8934_s25, %s8930_s2 }
  0x7c   : > { %p495_p12 = scmp.eq.s32.totalorder %s9101_s29, 1  ;;  %p11320_p0 = scmp.eq.s32.totalorder %s9101_s29, 0 }
  0x7d   : > { %7933 = dma.hbm_to_vmem [thread:$0]  (!%p9115_p6), %s11317_s17, 1024, %s652_s30, [#allocation15], %s8949_s16, %s8949_s16, %s8950_s21  }
  0x7e   : > { %s9203_s28 = scalar_select %p52_p9, %s8938_s26, %s54_s22  }
  0x7f   : > { %p63_p13 = por %p62_p11, %p61_p7  ;;  %p9207_p2 = por %p11320_p0, %p67_p10 }
  0x80   : > { %11319 = sst [smem:[#allocation31_spill]] %s9203_s28  ;;  %p9211_p6 = por %p495_p12, %p61_p7 }
  0x81   : > { %p501_p5 = scmp.eq.s32.totalorder %s6887_s5, 1  ;;  %p7955_p1 = scmp.lt.s32.totalorder %s8942_s27, 2 }
  0x82   : > { %s11322_s16 = scalar_select %p9211_p6, 1, 0 }
  0x83   : > { %s671_s21 = sand.u32 1, %s8938_s26   ;;  %p9217_p3 = por %p501_p5, %p67_p10 }
  0x84   : > { %s9221_s24 = sshll.u32 %s671_s21, 5  ;;  %s7119_s4 = sshll.u32 %s8942_s27, 9 }
  0x85   : > { %s11323_s30 = scalar_select %p9217_p3, 1, 0 }
  0x86   : > { %s11325_s23 = sld [smem:[#allocation64_spill]]  ;;  %s675_s7 = scalar_lea.vmem [#allocation2], %s9221_s24 }
  0x87   : > { %11324 = sst [smem:[#allocation32_spill]] %s11323_s30  ;;  %s683_s5 = sshll.u32 %s675_s7, 4  ;;  %s9234_s5 = int_to_ptr.vmem [resolvable:$true] %s683_s5 }
  0x88   : > { %p9230_p4 = pnand %p7955_p1, %p63_p13  ;;  %s11327_s15 = sld [smem:[#allocation65_spill]] }
  0x89   : > { %s9241_s22 = scalar_lea.sflag [#allocation3], %s671_s21 }
  0x8a   : > { %p8774_p7 = pneg %p9230_p4 }
  0x8c   : > { %s9227_s20 = scalar_lea.hbm %s11325_s23, %s7119_s4  ;;  %s8777_s26 = scalar_lea.hbm %s11325_s23, 1024 }
  0x8d   : > { %s8772_s18 = scalar_lea.hbm %s9227_s20, 512  ;;  %p8778_p10 = scmp.lt.s32.totalorder %s9227_s20, %s11325_s23 }
  0x8e   : > { %s9239_s17 = scalar_lea.hbm %s11327_s15, %s7119_s4  ;;  %p8773_p8 = scmp.ne.s32.totalorder %s9227_s20, %s8772_s18 }
  0x8f   : > { %p8779_p12 = scmp.lt.s32.totalorder %s8777_s26, %s8772_s18 }
  0x90   : > { %p8775_p9 = pnand %p8774_p7, %p8773_p8 }
  0x91   : > { %p8780_p13 = por %p8779_p12, %p8778_p10 }
  0x92   : > { %p8776_p11 = pneg %p8775_p9 }
  0x94   : > { %p8781_p0 = pnand %p8780_p13, %p8776_p11 }
  0x96   : > { %8784 = shalt.err (!%p8781_p0)
}
  0x97   : > { %s8785_s11 = scalar_lea.vmem %s9234_s5, 512  ;;  %s8957_s13 = smov [#allocation2]  }
  0x98   : > { %p8786_p5 = scmp.ne.s32.totalorder %s9234_s5, %s8785_s11  ;;  %s8790_s28 = sshll.u32 %s8957_s13, 4  ;;  %s8791_s28 = int_to_ptr.vmem [resolvable:$false] %s8790_s28 }
  0x99   : > { %s8792_s21 = scalar_lea.vmem %s8791_s28, 1024  ;;  %p8793_p9 = scmp.lt.s32.totalorder %s9234_s5, %s8791_s28 }
  0x9a   : > { %p8788_p1 = pnand %p8786_p5, %p8774_p7  ;;  %p8794_p3 = scmp.lt.s32.totalorder %s8792_s21, %s8785_s11 }
  0x9c   : > { %p8789_p8 = pneg %p8788_p1  ;;  %p8795_p6 = por %p8794_p3, %p8793_p9 }
  0x9e   : > { %p8796_p10 = pnand %p8795_p6, %p8789_p8 }
  0xa0   : > { %8799 = shalt.err (!%p8796_p10)
}
  0xa1   : > { %s11328_s26 = smov 8   ;;  %s11329_s1 = smov 128  }
  0xa2   : > { %7937 = dma.hbm_to_vmem [thread:$0]  (!%p9230_p4), %s9227_s20, 512, %s9234_s5, %s9241_s22, %s11329_s1, %s11329_s1, %s11328_s26  }
  0xa3   : > { %s697_s30 = scalar_lea.vmem [#allocation5], %s9221_s24  ;;  %s693_s18 = sand.u32 1, %s8942_s27  }
  0xa4   : > { %s705_s4 = sshll.u32 %s697_s30, 4  ;;  %s694_s7 = scalar_lea.sflag [#allocation6], %s693_s18  ;;  %s9273_s4 = int_to_ptr.vmem [resolvable:$true] %s705_s4 }
  0xa5   : > { %s8800_s11 = scalar_lea.hbm %s9239_s17, 512  ;;  %s8805_s21 = scalar_lea.hbm %s11327_s15, 1024 }
  0xa6   : > { %p8801_p6 = scmp.ne.s32.totalorder %s9239_s17, %s8800_s11  ;;  %p8806_p12 = scmp.lt.s32.totalorder %s9239_s17, %s11327_s15 }
  0xa7   : > { %p8807_p13 = scmp.lt.s32.totalorder %s8805_s21, %s8800_s11 }
  0xa8   : > { %p8803_p3 = pnand %p8801_p6, %p8774_p7 }
  0xa9   : > { %p8808_p0 = por %p8807_p13, %p8806_p12 }
  0xaa   : > { %p8804_p11 = pneg %p8803_p3 }
  0xac   : > { %p8809_p5 = pnand %p8808_p0, %p8804_p11 }
  0xae   : > { %8812 = shalt.err (!%p8809_p5)
}
  0xaf   : > { %s8813_s20 = scalar_lea.vmem %s9273_s4, 512  ;;  %s8958_s24 = smov [#allocation5]  }
  0xb0   : > { %p8814_p1 = scmp.ne.s32.totalorder %s9273_s4, %s8813_s20  ;;  %s8818_s5 = sshll.u32 %s8958_s24, 4  ;;  %s8819_s5 = int_to_ptr.vmem [resolvable:$false] %s8818_s5 }
  0xb1   : > { %s8820_s22 = scalar_lea.vmem %s8819_s5, 1024  ;;  %p8821_p10 = scmp.lt.s32.totalorder %s9273_s4, %s8819_s5 }
  0xb2   : > { %p8816_p8 = pnand %p8814_p1, %p8774_p7  ;;  %p8822_p6 = scmp.lt.s32.totalorder %s8820_s22, %s8813_s20 }
  0xb4   : > { %p8817_p9 = pneg %p8816_p8  ;;  %p8823_p3 = por %p8822_p6, %p8821_p10 }
  0xb6   : > { %p8824_p12 = pnand %p8823_p3, %p8817_p9 }
  0xb8   : > { %8827 = shalt.err (!%p8824_p12)
}
  0xb9   : > { %7940 = dma.hbm_to_vmem [thread:$0]  (!%p9230_p4), %s9239_s17, 512, %s9273_s4, %s694_s7, %s11329_s1, %s11329_s1, %s11328_s26  }
  0xba   : > { %p11330_p7 = scmp.ne.s32.totalorder %s11308_s0, 0 }
  0xbc   : > { %717 = sbr.rel (%p11330_p7) target bundleno = 3688 (0xe68), region = 100 }
  0xc1   : > { %s9303_s2 = sand.u32 1, %s8934_s25  }
  0xc2   : > { %s9306_s23 = sshll.u32 %s9303_s2, 5  ;;  %s720_s30 = scalar_lea.sflag [#allocation3], %s9303_s2 }
  0xc3   : > { %s9310_s9 = scalar_lea.vmem [#allocation2], %s9306_s23 }
  0xc4   : > { %8897 = dma.done.wait (%p9207_p2), %s720_s30, 512  }
  0xc5   : > { %8899 = vsyncadd (%p9207_p2), %s720_s30, 4294966784  ;;  %s728_s17 = sand.u32 1, %s9101_s29   ;;  %s9318_s26 = scalar_lea.vmem [#allocation5], %s9306_s23 }
  0xc6   : > { %s729_s0 = scalar_lea.sflag [#allocation6], %s728_s17 }
  0xc7   : > { %8901 = dma.done.wait (%p9207_p2), %s729_s0, 512  }
  0xc8   : > { %8903 = vsyncadd (%p9207_p2), %s729_s0, 4294966784  ;;  %p11331_p4 = scmp.eq.s32.totalorder %s9101_s29, 0 }
  0xca   : > { %8905 = dma.done.wait (%p11331_p4), [#allocation6], 3072   ;;  %p11332_p11 = pmov %p11331_p4 }
  0xcb   : > { %p11333_p13 = pmov %p11331_p4 }
  0xcc   : > { %8907 = vsyncadd (%p11332_p11), [#allocation6], 4294964224 }
  0xcd   : > { %8909 = dma.done.wait (%p11333_p13), [#allocation9], 5120   ;;  %p11334_p0 = pmov %p11331_p4 }
  0xcf   : > { %8911 = vsyncadd (%p11334_p0), [#allocation9], 4294962176  ;;  %p11335_p5 = pmov %p11334_p0 }
  0xd0   : > { %p11336_p1 = pmov %p11334_p0 }
  0xd1   : > { %8913 = dma.done.wait (%p11335_p5), [#allocation12], 4096  }
  0xd2   : > { %8915 = vsyncadd (%p11336_p1), [#allocation12], 4294963200  ;;  %p11337_p2 = pmov %p11334_p0 }
  0xd3   : > { %p11338_p8 = pmov %p11334_p0 }
  0xd4   : > { %8917 = dma.done.wait (%p11337_p2), [#allocation15], 3072  }
  0xd5   : > { %8919 = vsyncadd (%p11338_p8), [#allocation15], 4294964224  ;;  %v11262_v0 = vmov 0   ;;  %v9342_v1 = vld [vmem:[%s9318_s26] sm:$0xff]  ;;  %v8138_v2 = vld [vmem:[#allocation7 + $0xac] ss:$12 sps:$4 sm:$0xff]  }
  0xd6   : > { %1126 = vmatprep.mubr.bf16.mxu0 %v11262_v0  ;;  %842 = vadd.xlane.f32.xlu0 %v9342_v1  ;;  %v9346_v3 = vld [vmem:[%s9318_s26 + $0x10] sm:$0xff]  ;;  %v9350_v5 = vld [vmem:[%s9318_s26 + $0x8] sm:$0xff]  ;;  %v9353_v8 = vld [vmem:[%s9318_s26 + $0x18] sm:$0xff]  ;;  %s8961_s4 = smov 96   ;;  %s8962_s18 = smov 64   ;;  %vm1585_vm0 = vcmask 261120  }
  0xd7   : > { %v8140_v4 = vld [vmem:[#allocation7 + $0xa8] ss:$12 sps:$4 sm:$0xff]   ;;  %846 = vadd.xlane.f32.xlu1 %v9346_v3  ;;  %1094 = vmatprep.subr.bf16.mxu0 %v8138_v2  ;;  %v8143_v7 = vld [vmem:[#allocation7 + $0x90] ss:$12 sps:$4 sm:$0xff]   ;;  %v8146_v10 = vld [vmem:[#allocation7 + $0x78] ss:$12 sps:$4 sm:$0xff]  }
  0xd8   : > { %v8141_v6 = vld [vmem:[#allocation7 + $0x94] ss:$12 sps:$4 sm:$0xff]   ;;  %1095 = vmatpush1.bf16.msra.mxu0 %v8140_v4  ;;  %v8144_v9 = vld [vmem:[#allocation7 + $0x7c] ss:$12 sps:$4 sm:$0xff]   ;;  %v8147_v11 = vld [vmem:[#allocation7 + $0x64] ss:$12 sps:$4 sm:$0xff]  }
  0xd9   : > { %1096 = vmatprep.subr.bf16.mxu0 %v8141_v6  ;;  %v8149_v12 = vld [vmem:[#allocation7 + $0x60] ss:$12 sps:$4 sm:$0xff]   ;;  %v8152_v17 = vld [vmem:[#allocation7 + $0x48] ss:$12 sps:$4 sm:$0xff]   ;;  %v8155_v19 = vld [vmem:[#allocation7 + $0x30] ss:$12 sps:$4 sm:$0xff]  }
  0xda   : > { %844 = vadd.xlane.f32.xlu0 %v9350_v5  ;;  %v834_v13 = vld [vmem:[%s9310_s9] sm:$0xff]  ;;  %v835_v14 = vld [vmem:[%s9310_s9 + $0x8] sm:$0xff]  ;;  %v836_v24 = vld [vmem:[%s9310_s9 + $0x10] sm:$0xff]  ;;  %s8963_s7 = smov 32   ;;  %s11341_s28 = sld [smem:[#allocation67_spill]]  ;;  %vm8964_vm1 = vmmov 0  }
  0xdb   : > { %848 = vadd.xlane.f32.xlu1 %v9353_v8  ;;  %v8150_v15 = vld [vmem:[#allocation7 + $0x4c] ss:$12 sps:$4 sm:$0xff]   ;;  %v915_v16 = vpack.c.bf16 %v835_v14, %v834_v13  ;;  %v8153_v18 = vld [vmem:[#allocation7 + $0x34] ss:$12 sps:$4 sm:$0xff]   ;;  %v8156_v20 = vld [vmem:[#allocation7 + $0x1c] ss:$12 sps:$4 sm:$0xff]   ;;  %v951_v13 = vlaneseq }
  0xdc   : > { %1097 = vmatpush1.bf16.msra.mxu0 %v8143_v7  ;;  %v8158_v21 = vld [vmem:[#allocation7 + $0x18] ss:$12 sps:$4 sm:$0xff]   ;;  %v8161_v23 = vld [vmem:[#allocation7] ss:$12 sps:$4 sm:$0xff]   ;;  %v8162_v27 = vld [vmem:[#allocation7 + $0xb0] ss:$12 sps:$4 sm:$0xff]  }
  0xdd   : > { %1098 = vmatprep.subr.bf16.mxu0 %v8144_v9  ;;  %7368 = vmatprep.mubr.bf16.mxu1 %v915_v16  ;;  %v8159_v22 = vld [vmem:[#allocation7 + $0x4] ss:$12 sps:$4 sm:$0xff]   ;;  %v837_v25 = vld [vmem:[%s9310_s9 + $0x18] sm:$0xff]  ;;  %v8164_v29 = vld [vmem:[#allocation7 + $0x80] ss:$12 sps:$4 sm:$0xff]   ;;  %v9385_v14 = vshrl.u32 %v951_v13, 7 }
  0xde   : > { %v916_v26 = vpack.c.bf16 %v837_v25, %v836_v24  ;;  %7352 = vmatprep.subr.bf16.mxu1 %v8162_v27  ;;  %v8163_v28 = vld [vmem:[#allocation7 + $0x98] ss:$12 sps:$4 sm:$0xff]   ;;  %v8165_v31 = vld [vmem:[#allocation7 + $0x68] ss:$12 sps:$4 sm:$0xff]   ;;  %v8166_v32 = vld [vmem:[#allocation7 + $0x50] ss:$12 sps:$4 sm:$0xff]  }
  0xdf   : > { %7353 = vmatpush3.bf16.msra.mxu1 %v8162_v27  ;;  %v8169_v35 = vld [vmem:[#allocation8 + $0xa8] ss:$12 sps:$4 sm:$0xff]   ;;  %v8171_v37 = vld [vmem:[#allocation8 + $0xac] ss:$12 sps:$4 sm:$0xff]   ;;  %v8173_v54 = vld [vmem:[#allocation8 + $0x90] ss:$12 sps:$4 sm:$0xff]  }
  0xe0   : > { %1099 = vmatpush1.bf16.msra.mxu0 %v8146_v10  ;;  %7354 = vmatprep.subr.bf16.mxu1 %v8163_v28  ;;  %v8167_v41 = vld [vmem:[#allocation7 + $0x38] ss:$12 sps:$4 sm:$0xff]   ;;  %v8168_v50 = vld [vmem:[#allocation7 + $0x20] ss:$12 sps:$4 sm:$0xff]   ;;  %v8172_v52 = vld [vmem:[#allocation7 + $0x8] ss:$12 sps:$4 sm:$0xff]  }
  0xe1   : > { %1100 = vmatprep.subr.bf16.mxu0 %v8147_v11  ;;  %v8175_v53 = vld [vmem:[#allocation8 + $0x94] ss:$12 sps:$4 sm:$0xff]   ;;  %v8176_v55 = vld [vmem:[#allocation8 + $0xb0] ss:$12 sps:$4 sm:$0xff]   ;;  %v8177_v57 = vld [vmem:[#allocation8 + $0x78] ss:$12 sps:$4 sm:$0xff]  }
  0xe2   : > { %v8179_v56 = vld [vmem:[#allocation8 + $0x7c] ss:$12 sps:$4 sm:$0xff]   ;;  %v8180_v58 = vld [vmem:[#allocation8 + $0x98] ss:$12 sps:$4 sm:$0xff]   ;;  %v8181_v60 = vld [vmem:[#allocation8 + $0x60] ss:$12 sps:$4 sm:$0xff]  }
  0xe3   : > { %7355 = vmatpush3.bf16.msra.mxu1 %v8163_v28  ;;  %v8183_v59 = vld [vmem:[#allocation8 + $0x64] ss:$12 sps:$4 sm:$0xff]   ;;  %v8184_v61 = vld [vmem:[#allocation8 + $0x80] ss:$12 sps:$4 sm:$0xff]   ;;  %v8185_v63 = vld [vmem:[#allocation8 + $0x48] ss:$12 sps:$4 sm:$0xff]  }
  0xe4   : > { %1101 = vmatpush1.bf16.msra.mxu0 %v8149_v12  ;;  %7356 = vmatprep.subr.bf16.mxu1 %v8164_v29  ;;  %v8187_v62 = vld [vmem:[#allocation8 + $0x4c] ss:$12 sps:$4 sm:$0xff]   ;;  %v8191_v2 = vld [vmem:[#allocation8 + $0x34] ss:$12 sps:$4 sm:$0xff]   ;;  %v8192_v4 = vld [vmem:[#allocation8 + $0x50] ss:$12 sps:$4 sm:$0xff]  }
  0xe5   : > { %1102 = vmatprep.subr.bf16.mxu0 %v8150_v15  ;;  %v8195_v6 = vld [vmem:[#allocation8 + $0x1c] ss:$12 sps:$4 sm:$0xff]   ;;  %v8196_v7 = vld [vmem:[#allocation8 + $0x38] ss:$12 sps:$4 sm:$0xff]   ;;  %v8200_v9 = vld [vmem:[#allocation8 + $0x20] ss:$12 sps:$4 sm:$0xff]  }
  0xe6   : > { %v8197_v10 = vld [vmem:[#allocation8] ss:$12 sps:$4 sm:$0xff]   ;;  %v11264_v11 = vmov 0.0   ;;  %v8201_v12 = vld [vmem:[#allocation8 + $0x8] ss:$12 sps:$4 sm:$0xff]   ;;  %v9388_v15 = vsub.s32 0, %v9385_v14 }
  0xe7   : > { %7357 = vmatpush3.bf16.msra.mxu1 %v8164_v29  ;;  %s11342_s24 = sld [smem:[#allocation68_spill]]  ;;  %vm1978_vm2 = vcmask 130048   ;;  %vm5319_vm3 = vcmask 523264   ;;  %vm5324_vm4 = vcmask 785408   ;;  %s828_s22 = scalar_lea.vmem [#allocation18], %s9306_s23 }
  0xe8   : > { %1103 = vmatpush1.bf16.msra.mxu0 %v8152_v17  ;;  %7358 = vmatprep.subr.bf16.mxu1 %v8165_v31  ;;  %11339 = vst [vmem:[#allocation33_spill] sm:$0xff] %v9388_v15  ;;  %v9396_v17 = vsub.s32 1, %v9385_v14  ;;  %s11343_s30 = sld [smem:[#allocation66_spill]]  ;;  %s6693_s17 = sshll.u32 %s828_s22, 4  ;;  %s11128_s17 = int_to_ptr.vmem [resolvable:$true] %s6693_s17 }
  0xe9   : > { %1104 = vmatprep.subr.bf16.mxu0 %v8153_v18  ;;  %s11418_s5 = sld [smem:[#allocation77_spill]]  ;;  %s7123_s0 = sshll.u32 %s9101_s29, 9 }
  0xea   : > { %11340 = vst [vmem:[#allocation34_spill] sm:$0xff] %v9396_v17  ;;  %s11419_s1 = sld [smem:[#allocation79_spill]]  ;;  %p11420_p10 = scmp.ne.s32.totalorder %s11322_s16, 0 }
  0xeb   : > { %7359 = vmatpush3.bf16.msra.mxu1 %v8165_v31 }
  0xec   : > { %1105 = vmatpush1.bf16.msra.mxu0 %v8155_v19  ;;  %7360 = vmatprep.subr.bf16.mxu1 %v8166_v32 }
  0xed   : > { %1106 = vmatprep.subr.bf16.mxu0 %v8156_v20 }
  0xef   : > { %7361 = vmatpush3.bf16.msra.mxu1 %v8166_v32 }
  0xf0   : > { %1107 = vmatpush1.bf16.msra.mxu0 %v8158_v21  ;;  %7362 = vmatprep.subr.bf16.mxu1 %v8167_v41 }
  0xf1   : > { %1108 = vmatprep.subr.bf16.mxu0 %v8159_v22 }
  0xf3   : > { %7363 = vmatpush3.bf16.msra.mxu1 %v8167_v41 }
  0xf4   : > { %1109 = vmatpush1.bf16.msra.mxu0 %v8161_v23  ;;  %7364 = vmatprep.subr.bf16.mxu1 %v8168_v50 }
  0xf5   : > { %1375 = vmatprep.subr.bf16.mxu0 %v8171_v37 }
  0xf7   : > { %1127 = vmatmul.mubr.bf16.vlgmr.msra.gmra.mxu0 %v915_v16  ;;  %7365 = vmatpush3.bf16.msra.mxu1 %v8168_v50  ;;  %v9393_v16 = vld [vmem:[%s11228_s6] sm:$0x7] }
  0xf8   : > { %1136 = vmatprep.mubr.bf16.mxu0 %v11262_v0  ;;  %1376 = vmatpush1.bf16.msra.mxu0 %v8169_v35  ;;  %v954_v19 = vrot.slane %v9393_v16, %v9388_v15  ;;  %v958_v21 = vrot.slane %v9393_v16, %v9396_v17 }
  0xf9   : > { %7366 = vmatprep.subr.bf16.mxu1 %v8172_v52  ;;  %1377 = vmatprep.subr.bf16.mxu0 %v8175_v53 }
  0xfb   : > { %7367 = vmatpush3.bf16.msra.mxu1 %v8172_v52 }
  0xfc   : > { %1378 = vmatpush1.bf16.msra.mxu0 %v8173_v54  ;;  %7372 = vmatprep.subr.bf16.mxu1 %v8176_v55 }
  0xfd   : > { %1379 = vmatprep.subr.bf16.mxu0 %v8179_v56 }
  0xfe   : > { %7369 = vmatmul.mubr.bf16.vlgmr.msra.gmra.mxu1 %v916_v26 }
  0xff   : > { %1137 = vmatmul.mubr.bf16.gmra.mxu0 %v916_v26  ;;  %7373 = vmatpush3.bf16.msra.mxu1 %v8176_v55 }
 0x100   : > { %1407 = vmatprep.mubr.bf16.mxu0 %v11262_v0  ;;  %1380 = vmatpush1.bf16.msra.mxu0 %v8177_v57  ;;  %v6917_v57 = vld [vmem:[%s11341_s28] ss:$0 sm:$0xff] }
 0x101   : > { %7374 = vmatprep.subr.bf16.mxu1 %v8180_v58  ;;  %1381 = vmatprep.subr.bf16.mxu0 %v8183_v59 }
 0x103   : > { %7375 = vmatpush3.bf16.msra.mxu1 %v8180_v58 }
 0x104   : > { %1382 = vmatpush1.bf16.msra.mxu0 %v8181_v60  ;;  %7376 = vmatprep.subr.bf16.mxu1 %v8184_v61 }
 0x105   : > { %1383 = vmatprep.subr.bf16.mxu0 %v8187_v62 }
 0x107   : > { %7377 = vmatpush3.bf16.msra.mxu1 %v8184_v61  ;;  %v6918_v61 = vld [vmem:[%s11342_s24] ss:$0 sm:$0xff] }
 0x108   : > { %1384 = vmatpush1.bf16.msra.mxu0 %v8185_v63 }
 0x109   : > { %1385 = vmatprep.subr.bf16.mxu0 %v8191_v2 }
 0x15f   : > { %v843_v30 = vpop.xlane.xlu0 %842 }
 0x160   : > { %v851_v33 = vmul.f32 0.0078125, %v843_v30  ;;  %v847_v34 = vpop.xlane.xlu1 %846 }
 0x161   : > { %v853_v36 = vmul.f32 0.0078125, %v847_v34 }
 0x162   : > { %v9364_v38 = vsub.f32 %v9342_v1, %v851_v33  ;;  %v8188_v1 = vld [vmem:[#allocation8 + $0x68] ss:$12 sps:$4 sm:$0xff]  }
 0x163   : > { %v845_v39 = vpop.xlane.xlu0 %844  ;;  %v9367_v40 = vsub.f32 %v9346_v3, %v853_v36  ;;  %7378 = vmatprep.subr.bf16.mxu1 %v8188_v1  ;;  %v8189_v3 = vld [vmem:[#allocation8 + $0x30] ss:$12 sps:$4 sm:$0xff]  }
 0x164   : > { %v852_v42 = vmul.f32 0.0078125, %v845_v39  ;;  %v859_v43 = vmul.f32 %v9364_v38, %v9364_v38  ;;  %v849_v44 = vpop.xlane.xlu1 %848  ;;  %7379 = vmatpush3.bf16.msra.mxu1 %v8188_v1  ;;  %1386 = vmatpush1.bf16.msra.mxu0 %v8189_v3 }
 0x165   : > { %v854_v45 = vmul.f32 0.0078125, %v849_v44  ;;  %v861_v46 = vmul.f32 %v9367_v40, %v9367_v40  ;;  %7380 = vmatprep.subr.bf16.mxu1 %v8192_v4  ;;  %1387 = vmatprep.subr.bf16.mxu0 %v8195_v6 }
 0x166   : > { %863 = vadd.xlane.f32.xlu0 %v859_v43  ;;  %v9374_v47 = vsub.f32 %v9350_v5, %v852_v42  ;;  %v8193_v5 = vld [vmem:[#allocation8 + $0x18] ss:$12 sps:$4 sm:$0xff]  }
 0x167   : > { %v9377_v48 = vsub.f32 %v9353_v8, %v854_v45  ;;  %v8199_v8 = vld [vmem:[#allocation8 + $0x4] ss:$12 sps:$4 sm:$0xff]  }
 0x168   : > { %v860_v49 = vmul.f32 %v9374_v47, %v9374_v47  ;;  %7381 = vmatpush3.bf16.msra.mxu1 %v8192_v4  ;;  %1388 = vmatpush1.bf16.msra.mxu0 %v8193_v5  ;;  %v909_v5 = vld [vmem:[%s11343_s30] sm:$0xff] }
 0x169   : > { %v862_v51 = vmul.f32 %v9377_v48, %v9377_v48  ;;  %7382 = vmatprep.subr.bf16.mxu1 %v8196_v7  ;;  %1389 = vmatprep.subr.bf16.mxu0 %v8199_v8 }
 0x16a   : > { %867 = vadd.xlane.f32.xlu0 %v861_v46  ;;  %865 = vadd.xlane.f32.xlu1 %v860_v49 }
 0x16c   : > { %7383 = vmatpush3.bf16.msra.mxu1 %v8196_v7  ;;  %1390 = vmatpush1.bf16.msra.mxu0 %v8197_v10 }
 0x16d   : > { %7384 = vmatprep.subr.bf16.mxu1 %v8200_v9  ;;  %7392 = vmatprep.subr.bf16.mxu0 %v11264_v11 }
 0x16e   : > { %869 = vadd.xlane.f32.xlu1 %v862_v51 }
 0x170   : > { %7385 = vmatpush3.bf16.msra.mxu1 %v8200_v9 }
 0x171   : > { %7386 = vmatprep.subr.bf16.mxu1 %v8201_v12 }
 0x174   : > { %7387 = vmatpush3.bf16.msra.mxu1 %v8201_v12 }
 0x175   : > { %7404 = vmatprep.subr.bf16.mxu1 %v11264_v11 }
 0x1b7   : > { %v1128_v18 = vpop.f32.mrf.mxu0 }
 0x1b8   : > { %v1129_v23 = vadd.f32 %v1128_v18, %v954_v19 }
 0x1b9   : > { %v1130_v20 = vpop.f32.mrf.mxu0 }
 0x1ba   : > { %v1131_v26 = vadd.f32 %v1130_v20, %v958_v21 }
 0x1bb   : > { %v1132_v22 = vpop.f32.mrf.mxu0 }
 0x1bc   : > { %v1133_v24 = vadd.f32 %v1132_v22, %v954_v19 }
 0x1bd   : > { %v1134_v25 = vpop.f32.mrf.mxu0 }
 0x1be   : > { %v9402_v27 = vpack.c.bf16 %v1133_v24, %v1129_v23  ;;  %v1135_v28 = vadd.f32 %v1134_v25, %v958_v21 }
 0x1bf   : > { %v1138_v29 = vpop.f32.mrf.mxu0 }
 0x1c0   : > { %v9404_v30 = vpack.c.bf16 %v1135_v28, %v1131_v26  ;;  %1491 = vrot.lane.b32.xlu1 %v9402_v27, %s8961_s4  ;;  %v1139_v33 = vadd.f32 %v1138_v29, %v954_v19 }
 0x1c1   : > { %v1140_v31 = vpop.f32.mrf.mxu0 }
 0x1c2   : > { %1505 = vrot.lane.b32.xlu0 %v9404_v30, %s8961_s4  ;;  %v1141_v36 = vadd.f32 %v1140_v31, %v958_v21  ;;  %v9452_v18 = vsel %vm1585_vm0, %v9404_v30, 0  ;;  %v7370_v31 = vpop.f32.mrf.mxu1 }
 0x1c3   : > { %v1142_v32 = vpop.f32.mrf.mxu0 }
 0x1c4   : > { %v1143_v34 = vadd.f32 %v1142_v32, %v954_v19 }
 0x1c5   : > { %v1144_v35 = vpop.f32.mrf.mxu0 }
 0x1c6   : > { %v9410_v37 = vpack.c.bf16 %v1143_v34, %v1139_v33  ;;  %v1145_v39 = vadd.f32 %v1144_v35, %v958_v21 }
 0x1c8   : > { %v9412_v41 = vpack.c.bf16 %v1145_v39, %v1141_v36  ;;  %1493 = vrot.lane.b32.xlu0 %v9410_v37, %s8961_s4  ;;  %v961_v36 = vsub.s32 2, %v9385_v14  ;;  %v1181_v39 = vpop.f32.mrf.mxu1 }
 0x1ca   : > { %1507 = vrot.lane.b32.xlu1 %v9412_v41, %s8961_s4  ;;  %v9465_v21 = vsel %vm1585_vm0, %v9412_v41, 0  ;;  %v7371_v14 = vpop.f32.mrf.mxu1 }
 0x1cc   : > { %1495 = vrot.lane.b32.xlu0 %v9402_v27, %s8962_s18 }
 0x1ce   : > { %1509 = vrot.lane.b32.xlu1 %v9404_v30, %s8962_s18 }
 0x1d0   : > { %1497 = vrot.lane.b32.xlu0 %v9410_v37, %s8962_s18 }
 0x1d2   : > { %1511 = vrot.lane.b32.xlu1 %v9412_v41, %s8962_s18 }
 0x1d4   : > { %1499 = vrot.lane.b32.xlu0 %v9402_v27, %s8963_s7 }
 0x1d6   : > { %1513 = vrot.lane.b32.xlu1 %v9404_v30, %s8963_s7 }
 0x1da   : > { %1515 = vrot.lane.b32.xlu1 %v9412_v41, %s8963_s7 }
 0x1de   : > { %1501 = vrot.lane.b32.xlu1 %v9410_v37, %s8963_s7 }
 0x1ef   : > { %v864_v42 = vpop.xlane.xlu0 %863 }
 0x1f0   : > { %v871_v43 = vmul.f32 0.0078125, %v864_v42 }
 0x1f2   : > { %v875_v44 = vadd.f32 1e-05, %v871_v43  ;;  %v962_v43 = vrot.slane %v9393_v16, %v961_v36 }
 0x1f3   : > { %v866_v45 = vpop.xlane.xlu1 %865  ;;  %v868_v46 = vpop.xlane.xlu0 %867 }
 0x1f4   : > { %8282 = vrsqrt.f32 %v875_v44  ;;  %v872_v49 = vmul.f32 0.0078125, %v866_v45  ;;  %v873_v50 = vmul.f32 0.0078125, %v868_v46  ;;  %v1190_v46 = vadd.f32 %v7370_v31, %v962_v43 }
 0x1f6   : > { %v876_v51 = vadd.f32 1e-05, %v872_v49  ;;  %v877_v52 = vadd.f32 1e-05, %v873_v50  ;;  %v1193_v49 = vadd.f32 %v7371_v14, %v962_v43  ;;  %v1182_v50 = vadd.f32 %v1181_v39, %v962_v43 }
 0x1f7   : > { %v870_v53 = vpop.xlane.xlu1 %869 }
 0x1f8   : > { %8284 = vrsqrt.f32 %v876_v51  ;;  %v874_v54 = vmul.f32 0.0078125, %v870_v53  ;;  %v1184_v51 = vpop.f32.mrf.mxu1  ;;  %v9535_v53 = vpack.c.bf16 %v1193_v49, %v1190_v46 }
 0x1f9   : > { %8286 = vrsqrt.f32 %v877_v52  ;;  %v1185_v52 = vadd.f32 %v1184_v51, %v962_v43 }
 0x1fa   : > { %v878_v55 = vadd.f32 1e-05, %v874_v54 }
 0x1fb   : > { %v9539_v54 = vpack.c.bf16 %v1185_v52, %v1182_v50 }
 0x1fc   : > { %8288 = vrsqrt.f32 %v878_v55 }
 0x201   : > { %v8283_v56 = vpop.eup %8282 }
 0x202   : > { %v883_v58 = vmul.f32 %v8283_v56, %v9364_v38  ;;  %v910_v38 = vld [vmem:[%s11343_s30 + $0x8] sm:$0xff]  ;;  %v9554_v56 = vld [vmem:[%s11230_s8] sm:$0x7] }
 0x204   : > { %v894_v59 = vmul.f32 %v6917_v57, %v883_v58  ;;  %v1235_v58 = vrot.slane %v9554_v56, %v9388_v15 }
 0x205   : > { %v8285_v60 = vpop.eup %8284 }
 0x206   : > { %v8287_v62 = vpop.eup %8286  ;;  %v884_v63 = vmul.f32 %v8285_v60, %v9374_v47  ;;  %v905_v3 = vadd.f32 %v6918_v61, %v894_v59 }
 0x207   : > { %v885_v1 = vmul.f32 %v8287_v62, %v9367_v40 }
 0x208   : > { %v895_v2 = vmul.f32 %v6917_v57, %v884_v63  ;;  %v911_v9 = vadd.f32 %v909_v5, %v905_v3 }
 0x209   : > { %v8289_v4 = vpop.eup %8288  ;;  %v896_v6 = vmul.f32 %v6917_v57, %v885_v1  ;;  %v9561_v1 = vrot.slane %v9554_v56, %v961_v36 }
 0x20a   : > { %v906_v7 = vadd.f32 %v6918_v61, %v895_v2  ;;  %v886_v8 = vmul.f32 %v8289_v4, %v9377_v48 }
 0x20b   : > { %v907_v12 = vadd.f32 %v6918_v61, %v896_v6 }
 0x20c   : > { %v912_v10 = vadd.f32 %v910_v38, %v906_v7  ;;  %v897_v47 = vmul.f32 %v6917_v57, %v886_v8 }
 0x20d   : > { %v913_v19 = vadd.f32 %v909_v5, %v907_v12 }
 0x20e   : > { %v1196_v40 = vpack.c.bf16 %v912_v10, %v911_v9  ;;  %v908_v13 = vadd.f32 %v6918_v61, %v897_v47 }
 0x210   : > { %1408 = vmatmul.mubr.bf16.vlgmr.msra.gmra.mxu0 %v1196_v40  ;;  %7388 = vmatprep.mubr.bf16.mxu1 %v1196_v40  ;;  %v914_v20 = vadd.f32 %v910_v38, %v908_v13 }
 0x211   : > { %7393 = vmatpush3.bf16.xpose.msra.mxu0 %v9452_v18  ;;  %1417 = vmatprep.mubr.bf16.mxu0 %v11262_v0 }
 0x212   : > { %v1197_v48 = vpack.c.bf16 %v914_v20, %v913_v19  ;;  %7398 = vmatprep.subr.bf16.mxu0 %v11264_v11 }
 0x214   : > { %7389 = vmatmul.mubr.bf16.vlgmr.msra.gmra.mxu1 %v1197_v48 }
 0x215   : > { %7406 = vmatprep.mubr.msk.bf16.mxu1 %vm8964_vm1, %v11264_v11 }
 0x218   : > { %1418 = vmatmul.mubr.bf16.gmra.mxu0 %v1197_v48 }
 0x219   : > { %7394 = vmatprep.mubr.msk.bf16.mxu0 %vm8964_vm1, %v11264_v11 }
 0x220   : > { %7395 = vmatmul.mubr.msk.bf16.vlgmr.msra.gmra.mxu0 %vm1585_vm0, %v9402_v27 }
 0x221   : > { %7399 = vmatpush3.bf16.xpose.msra.mxu0 %v9465_v21  ;;  %7400 = vmatprep.mubr.msk.bf16.mxu0 %vm8964_vm1, %v11264_v11 }
 0x222   : > { %7410 = vmatprep.subr.bf16.mxu0 %v11264_v11 }
 0x228   : > { %7401 = vmatmul.mubr.msk.bf16.vlgmr.msra.gmra.mxu0 %vm1585_vm0, %v9410_v37 }
 0x229   : > { %7412 = vmatprep.mubr.msk.bf16.mxu0 %vm8964_vm1, %v11264_v11 }
 0x232   : > { %v9480_v24 = vpop.permute.xlu1 %1491 }
 0x234   : > { %v1506_v22 = vpop.permute.xlu0 %1505 }
 0x235   : > { %v9476_v23 = vsel %vm1585_vm0, %v1506_v22, 0 }
 0x236   : > { %7405 = vmatpush3.bf16.xpose.msra.mxu1 %v9476_v23 }
 0x237   : > { %7416 = vmatprep.subr.bf16.mxu1 %v11264_v11 }
 0x23a   : > { %v9487_v28 = vpop.permute.xlu0 %1493 }
 0x23c   : > { %v1508_v25 = vpop.permute.xlu1 %1507 }
 0x23d   : > { %v9483_v26 = vsel %vm1585_vm0, %v1508_v25, 0  ;;  %7407 = vmatmul.mubr.msk.bf16.vlgmr.msra.gmra.mxu1 %vm1585_vm0, %v9480_v24 }
 0x23e   : > { %7411 = vmatpush3.bf16.xpose.msra.mxu0 %v9483_v26  ;;  %7418 = vmatprep.mubr.msk.bf16.mxu1 %vm8964_vm1, %v11264_v11  ;;  %v9498_v32 = vpop.permute.xlu0 %1495 }
 0x23f   : > { %7422 = vmatprep.subr.bf16.mxu0 %v11264_v11 }
 0x240   : > { %v1510_v29 = vpop.permute.xlu1 %1509 }
 0x241   : > { %v9494_v30 = vsel %vm1585_vm0, %v1510_v29, 0 }
 0x242   : > { %7417 = vmatpush3.bf16.xpose.msra.mxu1 %v9494_v30  ;;  %v9515_v42 = vpop.permute.xlu0 %1497 }
 0x243   : > { %7428 = vmatprep.subr.bf16.mxu1 %v11264_v11 }
 0x244   : > { %v1512_v33 = vpop.permute.xlu1 %1511 }
 0x245   : > { %v9501_v34 = vsel %vm1585_vm0, %v1512_v33, 0  ;;  %7413 = vmatmul.mubr.msk.bf16.vlgmr.msra.gmra.mxu0 %vm1585_vm0, %v9487_v28 }
 0x246   : > { %7423 = vmatpush3.bf16.xpose.msra.mxu0 %v9501_v34  ;;  %7424 = vmatprep.mubr.msk.bf16.mxu0 %vm8964_vm1, %v11264_v11  ;;  %v9531_v16 = vpop.permute.xlu0 %1499 }
 0x247   : > { %7434 = vmatprep.subr.bf16.mxu0 %v11264_v11 }
 0x248   : > { %v1514_v35 = vpop.permute.xlu1 %1513 }
 0x249   : > { %v9511_v41 = vsel %vm1585_vm0, %v1514_v35, 0  ;;  %7419 = vmatmul.mubr.msk.bf16.vlgmr.msra.gmra.mxu1 %vm1585_vm0, %v9498_v32 }
 0x24a   : > { %7429 = vmatpush3.bf16.xpose.msra.mxu1 %v9511_v41  ;;  %7430 = vmatprep.mubr.msk.bf16.mxu1 %vm8964_vm1, %v11264_v11 }
 0x24b   : > { %7440 = vmatprep.subr.bf16.mxu1 %v11264_v11 }
 0x24c   : > { %v1516_v44 = vpop.permute.xlu1 %1515 }
 0x24d   : > { %v9523_v45 = vsel %vm1585_vm0, %v1516_v44, 0  ;;  %7425 = vmatmul.mubr.msk.bf16.vlgmr.msra.gmra.mxu0 %vm1585_vm0, %v9515_v42 }
 0x24e   : > { %7435 = vmatpush3.bf16.xpose.msra.mxu0 %v9523_v45  ;;  %7436 = vmatprep.mubr.msk.bf16.mxu0 %vm8964_vm1, %v11264_v11 }
 0x24f   : > { %7446 = vmatprep.subr.bf16.mxu0 %v11264_v11 }
 0x250   : > { %v9541_v55 = vpop.permute.xlu1 %1501 }
 0x251   : > { %7431 = vmatmul.mubr.msk.bf16.vlgmr.msra.gmra.mxu1 %vm1585_vm0, %v9531_v16 }
 0x252   : > { %7442 = vmatprep.mubr.msk.bf16.mxu1 %vm8964_vm1, %v11264_v11  ;;  %7441 = vmatpush3.bf16.msra.mxu1 %v9539_v54 }
 0x253   : > { %7452 = vmatprep.subr.bf16.mxu1 %v11264_v11 }
 0x255   : > { %7437 = vmatmul.mubr.msk.bf16.vlgmr.msra.gmra.mxu0 %vm1585_vm0, %v9541_v55 }
 0x256   : > { %7447 = vmatpush3.bf16.msra.mxu0 %v9535_v53  ;;  %7448 = vmatprep.mubr.msk.bf16.mxu0 %vm8964_vm1, %v11264_v11 }
 0x257   : > { %7458 = vmatprep.subr.bf16.mxu0 %v11264_v11 }
 0x2d0   : > { %v1409_v57 = vpop.f32.mrf.mxu0 }
 0x2d1   : > { %v1410_v62 = vadd.f32 %v1409_v57, %v1235_v58 }
 0x2d2   : > { %v9558_v59 = vpop.f32.mrf.mxu0 }
 0x2d4   : > { %v1413_v60 = vpop.f32.mrf.mxu0  ;;  %v7390_v61 = vpop.f32.mrf.mxu1 }
 0x2d5   : > { %v1414_v63 = vadd.f32 %v1413_v60, %v1235_v58  ;;  %v1471_v6 = vadd.f32 %v7390_v61, %v9561_v1 }
 0x2d6   : > { %v9563_v2 = vpop.f32.mrf.mxu0  ;;  %v9565_v3 = vpop.f32.mrf.mxu1 }
 0x2d7   : > { %v9567_v4 = vpack.c.bf16 %v1414_v63, %v1410_v62 }
 0x2d8   : > { %v1419_v5 = vpop.f32.mrf.mxu0  ;;  %v7391_v38 = vpop.f32.mrf.mxu1 }
 0x2d9   : > { %v1474_v7 = vadd.f32 %v7391_v38, %v9561_v1  ;;  %v1420_v47 = vadd.f32 %v1419_v5, %v1235_v58 }
 0x2da   : > { %v9571_v8 = vpop.f32.mrf.mxu0  ;;  %v9595_v50 = vpop.f32.mrf.mxu1 }
 0x2db   : > { %v9573_v9 = vpack.c.bf16 %v1474_v7, %v1471_v6 }
 0x2dc   : > { %v1423_v10 = vpop.f32.mrf.mxu0 }
 0x2dd   : > { %v1424_v12 = vadd.f32 %v1423_v10, %v1235_v58 }
 0x2de   : > { %v9575_v40 = vpop.f32.mrf.mxu0 }
 0x2df   : > { %v9577_v13 = vpack.c.bf16 %v1424_v12, %v1420_v47 }
 0x2e0   : > { %v1626_v19 = vpop.f32.mrf.mxu0 }
 0x2e1   : > { %v9579_v20 = vmul.f32 0.17677669, %v1626_v19 }
 0x2e2   : > { %v7396_v48 = vpop.f32.mrf.mxu0 }
 0x2e3   : > { %v1979_v22 = vsel %vm1978_vm2, %v9579_v20, -inf }
 0x2e4   : > { %1980 = vmax.xlane.f32.xlu0 %v1979_v22  ;;  %v1629_v25 = vpop.f32.mrf.mxu0 }
 0x2e5   : > { %v9583_v29 = vmul.f32 0.17677669, %v1629_v25 }
 0x2e6   : > { %v7397_v31 = vpop.f32.mrf.mxu0 }
 0x2e7   : > { %v1982_v33 = vsel %vm1978_vm2, %v9583_v29, -inf }
 0x2e8   : > { %1983 = vmax.xlane.f32.xlu1 %v1982_v33  ;;  %v1673_v35 = vpop.f32.mrf.mxu0 }
 0x2e9   : > { %v9587_v36 = vmul.f32 0.17677669, %v1673_v35 }
 0x2ea   : > { %v7402_v39 = vpop.f32.mrf.mxu0 }
 0x2eb   : > { %v1985_v43 = vsel %vm1978_vm2, %v9587_v36, -inf }
 0x2ec   : > { %1986 = vmax.xlane.f32.xlu0 %v1985_v43  ;;  %v1676_v44 = vpop.f32.mrf.mxu0 }
 0x2ed   : > { %v9591_v14 = vmul.f32 0.17677669, %v1676_v44 }
 0x2ee   : > { %v7403_v46 = vpop.f32.mrf.mxu0 }
 0x2ef   : > { %v1988_v49 = vsel %vm1978_vm2, %v9591_v14, -inf }
 0x2f0   : > { %1989 = vmax.xlane.f32.xlu0 %v1988_v49 }
 0x2fd   : > { %v1720_v51 = vpop.f32.mrf.mxu1 }
 0x2fe   : > { %v9597_v52 = vmul.f32 0.17677669, %v1720_v51 }
 0x2ff   : > { %v7408_v57 = vpop.f32.mrf.mxu1 }
 0x300   : > { %v1991_v58 = vsel %vm1978_vm2, %v9597_v52, -inf }
 0x301   : > { %v1723_v60 = vpop.f32.mrf.mxu1  ;;  %1992 = vmax.xlane.f32.xlu0 %v1991_v58 }
 0x302   : > { %v9601_v61 = vmul.f32 0.17677669, %v1723_v60 }
 0x303   : > { %v7409_v62 = vpop.f32.mrf.mxu1 }
 0x304   : > { %v1994_v63 = vsel %vm1978_vm2, %v9601_v61, -inf }
 0x305   : > { %1995 = vmax.xlane.f32.xlu1 %v1994_v63  ;;  %v1767_v5 = vpop.f32.mrf.mxu0 }
 0x306   : > { %v9605_v38 = vmul.f32 0.17677669, %v1767_v5 }
 0x307   : > { %v7414_v6 = vpop.f32.mrf.mxu0 }
 0x308   : > { %v1997_v7 = vsel %vm1978_vm2, %v9605_v38, -inf }
 0x309   : > { %v1814_v10 = vpop.f32.mrf.mxu1  ;;  %1998 = vmax.xlane.f32.xlu0 %v1997_v7  ;;  %v1770_v47 = vpop.f32.mrf.mxu0 }
 0x30a   : > { %v9609_v12 = vmul.f32 0.17677669, %v1814_v10  ;;  %v9611_v19 = vmul.f32 0.17677669, %v1770_v47 }
 0x30b   : > { %v7415_v48 = vpop.f32.mrf.mxu0  ;;  %v7420_v22 = vpop.f32.mrf.mxu1 }
 0x30c   : > { %v2003_v25 = vsel %vm1978_vm2, %v9609_v12, -inf  ;;  %v2000_v31 = vsel %vm1978_vm2, %v9611_v19, -inf }
 0x30d   : > { %v1817_v33 = vpop.f32.mrf.mxu1  ;;  %2004 = vmax.xlane.f32.xlu0 %v2003_v25  ;;  %2001 = vmax.xlane.f32.xlu1 %v2000_v31  ;;  %v1861_v35 = vpop.f32.mrf.mxu0 }
 0x30e   : > { %v9617_v39 = vmul.f32 0.17677669, %v1817_v33  ;;  %v9619_v43 = vmul.f32 0.17677669, %v1861_v35 }
 0x30f   : > { %v7421_v44 = vpop.f32.mrf.mxu1  ;;  %v7426_v46 = vpop.f32.mrf.mxu0 }
 0x310   : > { %v2006_v49 = vsel %vm1978_vm2, %v9617_v39, -inf  ;;  %v2009_v51 = vsel %vm1978_vm2, %v9619_v43, -inf }
 0x311   : > { %v1908_v57 = vpop.f32.mrf.mxu1  ;;  %2007 = vmax.xlane.f32.xlu1 %v2006_v49  ;;  %2010 = vmax.xlane.f32.xlu0 %v2009_v51  ;;  %v1864_v58 = vpop.f32.mrf.mxu0 }
 0x312   : > { %v9625_v60 = vmul.f32 0.17677669, %v1908_v57  ;;  %v9627_v62 = vmul.f32 0.17677669, %v1864_v58 }
 0x313   : > { %v7427_v63 = vpop.f32.mrf.mxu0  ;;  %v7432_v5 = vpop.f32.mrf.mxu1 }
 0x314   : > { %v2015_v6 = vsel %vm1978_vm2, %v9625_v60, -inf  ;;  %v2012_v7 = vsel %vm1978_vm2, %v9627_v62, -inf }
 0x315   : > { %v1911_v10 = vpop.f32.mrf.mxu1  ;;  %2016 = vmax.xlane.f32.xlu0 %v2015_v6  ;;  %2013 = vmax.xlane.f32.xlu1 %v2012_v7  ;;  %v1955_v47 = vpop.f32.mrf.mxu0 }
 0x316   : > { %v9633_v48 = vmul.f32 0.17677669, %v1911_v10  ;;  %v9635_v22 = vmul.f32 0.17677669, %v1955_v47 }
 0x317   : > { %v7433_v25 = vpop.f32.mrf.mxu1  ;;  %v7438_v31 = vpop.f32.mrf.mxu0 }
 0x318   : > { %v2018_v33 = vsel %vm1978_vm2, %v9633_v48, -inf  ;;  %v2021_v35 = vsel %vm1978_vm2, %v9635_v22, -inf }
 0x319   : > { %2019 = vmax.xlane.f32.xlu1 %v2018_v33  ;;  %2022 = vmax.xlane.f32.xlu0 %v2021_v35  ;;  %v1958_v44 = vpop.f32.mrf.mxu0 }
 0x31a   : > { %v9647_v49 = vmul.f32 0.17677669, %v1958_v44 }
 0x31b   : > { %v7439_v46 = vpop.f32.mrf.mxu0 }
 0x31c   : > { %v2024_v51 = vsel %vm1978_vm2, %v9647_v49, -inf }
 0x32a   : > { %1521 = vrot.lane.b32.xlu1 %v9535_v53, %s8961_s4 }
 0x32e   : > { %1525 = vrot.lane.b32.xlu1 %v9539_v54, %s8962_s18 }
 0x32f   : > { %1519 = vrot.lane.b32.xlu0 %v9539_v54, %s8961_s4 }
 0x352   : > { %2025 = vmax.xlane.f32.xlu1 %v2024_v51 }
 0x363   : > { %1527 = vrot.lane.b32.xlu1 %v9535_v53, %s8962_s18 }
 0x36d   : > { %v1981_v57 = vpop.xlane.xlu0 %1980 }
 0x36e   : > { %v2027_v58 = vsub.f32 %v9579_v20, %v1981_v57 }
 0x370   : > { %v2043_v63 = vmul.f32 1.442695, %v2027_v58 }
 0x371   : > { %v1984_v5 = vpop.xlane.xlu1 %1983 }
 0x372   : > { %8290 = vpow2.f32 %v2043_v63  ;;  %v2028_v6 = vsub.f32 %v9583_v29, %v1984_v5 }
 0x374   : > { %v2045_v7 = vmul.f32 1.442695, %v2028_v6 }
 0x375   : > { %v1987_v10 = vpop.xlane.xlu0 %1986 }
 0x376   : > { %v2029_v47 = vsub.f32 %v9587_v36, %v1987_v10  ;;  %8292 = vpow2.f32 %v2045_v7 }
 0x378   : > { %v2047_v25 = vmul.f32 1.442695, %v2029_v47 }
 0x379   : > { %v1990_v31 = vpop.xlane.xlu0 %1989 }
 0x37a   : > { %8294 = vpow2.f32 %v2047_v25  ;;  %v2030_v33 = vsub.f32 %v9591_v14, %v1990_v31 }
 0x37c   : > { %v2049_v35 = vmul.f32 1.442695, %v2030_v33 }
 0x37e   : > { %8296 = vpow2.f32 %v2049_v35 }
 0x37f   : > { %v9657_v44 = vpop.eup %8290 }
 0x380   : > { %v2075_v20 = vsel %vm1978_vm2, %v9657_v44, 0.0 }
 0x381   : > { %2076 = vadd.xlane.f32.xlu0 %v2075_v20 }
 0x383   : > { %v9661_v46 = vpop.eup %8292 }
 0x384   : > { %v2078_v36 = vsel %vm1978_vm2, %v9661_v46, 0.0 }
 0x387   : > { %v9663_v29 = vpop.eup %8294  ;;  %2079 = vadd.xlane.f32.xlu1 %v2078_v36 }
 0x388   : > { %v2081_v51 = vsel %vm1978_vm2, %v9663_v29, 0.0 }
 0x389   : > { %2082 = vadd.xlane.f32.xlu0 %v2081_v51 }
 0x38a   : > { %v1993_v57 = vpop.xlane.xlu0 %1992 }
 0x38b   : > { %v9669_v14 = vpop.eup %8296  ;;  %v2031_v58 = vsub.f32 %v9597_v52, %v1993_v57 }
 0x38c   : > { %v2084_v63 = vsel %vm1978_vm2, %v9669_v14, 0.0 }
 0x38d   : > { %2085 = vadd.xlane.f32.xlu1 %v2084_v63  ;;  %v2051_v5 = vmul.f32 1.442695, %v2031_v58 }
 0x38e   : > { %v1996_v6 = vpop.xlane.xlu1 %1995 }
 0x38f   : > { %8298 = vpow2.f32 %v2051_v5  ;;  %v2032_v7 = vsub.f32 %v9601_v61, %v1996_v6 }
 0x391   : > { %v2053_v10 = vmul.f32 1.442695, %v2032_v7 }
 0x392   : > { %v1999_v47 = vpop.xlane.xlu0 %1998 }
 0x393   : > { %8300 = vpow2.f32 %v2053_v10  ;;  %v2033_v25 = vsub.f32 %v9605_v38, %v1999_v47 }
 0x395   : > { %v2055_v31 = vmul.f32 1.442695, %v2033_v25 }
 0x396   : > { %v2005_v33 = vpop.xlane.xlu0 %2004  ;;  %v2002_v35 = vpop.xlane.xlu1 %2001 }
 0x397   : > { %8302 = vpow2.f32 %v2055_v31  ;;  %v2035_v52 = vsub.f32 %v9609_v12, %v2005_v33  ;;  %v2034_v20 = vsub.f32 %v9611_v19, %v2002_v35 }
 0x399   : > { %v2059_v36 = vmul.f32 1.442695, %v2035_v52  ;;  %v2057_v51 = vmul.f32 1.442695, %v2034_v20 }
 0x39a   : > { %v2008_v57 = vpop.xlane.xlu1 %2007  ;;  %v2011_v58 = vpop.xlane.xlu0 %2010 }
 0x39b   : > { %8304 = vpow2.f32 %v2059_v36  ;;  %v2036_v61 = vsub.f32 %v9617_v39, %v2008_v57  ;;  %v2037_v63 = vsub.f32 %v9619_v43, %v2011_v58 }
 0x39c   : > { %v9680_v5 = vpop.eup %8298  ;;  %8306 = vpow2.f32 %v2057_v51 }
 0x39d   : > { %v2061_v38 = vmul.f32 1.442695, %v2036_v61  ;;  %v2063_v6 = vmul.f32 1.442695, %v2037_v63  ;;  %v2087_v7 = vsel %vm1978_vm2, %v9680_v5, 0.0 }
 0x39e   : > { %v2017_v12 = vpop.xlane.xlu0 %2016  ;;  %v2014_v10 = vpop.xlane.xlu1 %2013  ;;  %2088 = vadd.xlane.f32.xlu0 %v2087_v7 }
 0x39f   : > { %8308 = vpow2.f32 %v2061_v38  ;;  %v2039_v19 = vsub.f32 %v9625_v60, %v2017_v12  ;;  %v2038_v47 = vsub.f32 %v9627_v62, %v2014_v10 }
 0x3a0   : > { %v9686_v25 = vpop.eup %8300  ;;  %8310 = vpow2.f32 %v2063_v6 }
 0x3a1   : > { %v2067_v39 = vmul.f32 1.442695, %v2039_v19  ;;  %v2065_v43 = vmul.f32 1.442695, %v2038_v47  ;;  %v2090_v31 = vsel %vm1978_vm2, %v9686_v25, 0.0 }
 0x3a2   : > { %v2020_v33 = vpop.xlane.xlu1 %2019  ;;  %v2023_v35 = vpop.xlane.xlu0 %2022  ;;  %2091 = vadd.xlane.f32.xlu1 %v2090_v31 }
 0x3a3   : > { %8312 = vpow2.f32 %v2067_v39  ;;  %v2040_v52 = vsub.f32 %v9633_v48, %v2020_v33  ;;  %v2041_v20 = vsub.f32 %v9635_v22, %v2023_v35  ;;  %v1239_v33 = vrot.slane %v9554_v56, %v9396_v17 }
 0x3a4   : > { %v9692_v36 = vpop.eup %8302  ;;  %8314 = vpow2.f32 %v2065_v43 }
 0x3a5   : > { %v2069_v60 = vmul.f32 1.442695, %v2040_v52  ;;  %v2071_v62 = vmul.f32 1.442695, %v2041_v20  ;;  %v2093_v51 = vsel %vm1978_vm2, %v9692_v36, 0.0  ;;  %v1416_v35 = vadd.f32 %v9563_v2, %v1239_v33 }
 0x3a6   : > { %2094 = vadd.xlane.f32.xlu0 %v2093_v51  ;;  %v1412_v52 = vadd.f32 %v9558_v59, %v1239_v33 }
 0x3a7   : > { %8316 = vpow2.f32 %v2069_v60  ;;  %v9736_v60 = vpop.permute.xlu1 %1521 }
 0x3a8   : > { %v9696_v57 = vpop.eup %8304  ;;  %8318 = vpow2.f32 %v2071_v62  ;;  %v9734_v20 = vpack.c.bf16 %v1416_v35, %v1412_v52  ;;  %11344 = vst [vmem:[#allocation35_spill] sm:$0xff] %v9736_v60 }
 0x3a9   : > { %v9698_v58 = vpop.eup %8306  ;;  %v2099_v48 = vsel %vm1978_vm2, %v9696_v57, 0.0 }
 0x3aa   : > { %2100 = vadd.xlane.f32.xlu0 %v2099_v48  ;;  %v2096_v22 = vsel %vm1978_vm2, %v9698_v58, 0.0 }
 0x3ab   : > { %2097 = vadd.xlane.f32.xlu1 %v2096_v22  ;;  %v9742_v62 = vpop.permute.xlu1 %1525  ;;  %v1426_v22 = vadd.f32 %v9575_v40, %v1239_v33 }
 0x3ac   : > { %v9704_v61 = vpop.eup %8308  ;;  %11345 = vst [vmem:[#allocation36_spill] sm:$0xff] %v9742_v62 }
 0x3ad   : > { %v9706_v63 = vpop.eup %8310  ;;  %v2102_v38 = vsel %vm1978_vm2, %v9704_v61, 0.0 }
 0x3ae   : > { %v2105_v6 = vsel %vm1978_vm2, %v9706_v63, 0.0 }
 0x3af   : > { %2106 = vadd.xlane.f32.xlu0 %v2105_v6  ;;  %2103 = vadd.xlane.f32.xlu1 %v2102_v38  ;;  %v1422_v38 = vadd.f32 %v9571_v8, %v1239_v33 }
 0x3b0   : > { %v9712_v7 = vpop.eup %8312 }
 0x3b1   : > { %v9714_v12 = vpop.eup %8314  ;;  %v2111_v10 = vsel %vm1978_vm2, %v9712_v7, 0.0  ;;  %v9755_v6 = vpack.c.bf16 %v1426_v22, %v1422_v38 }
 0x3b2   : > { %v2108_v19 = vsel %vm1978_vm2, %v9714_v12, 0.0 }
 0x3b3   : > { %2112 = vadd.xlane.f32.xlu0 %v2111_v10  ;;  %2109 = vadd.xlane.f32.xlu1 %v2108_v19 }
 0x3b4   : > { %v9720_v47 = vpop.eup %8316 }
 0x3b5   : > { %v9722_v39 = vpop.eup %8318  ;;  %v2114_v43 = vsel %vm1978_vm2, %v9720_v47, 0.0 }
 0x3b6   : > { %v2117_v31 = vsel %vm1978_vm2, %v9722_v39, 0.0 }
 0x3b7   : > { %2118 = vadd.xlane.f32.xlu0 %v2117_v31  ;;  %2115 = vadd.xlane.f32.xlu1 %v2114_v43 }
 0x3cd   : > { %1531 = vrot.lane.b32.xlu0 %v9539_v54, %s8963_s7 }
 0x3d1   : > { %1553 = vrot.lane.b32.xlu0 %v9734_v20, %s8961_s4 }
 0x3d5   : > { %1557 = vrot.lane.b32.xlu0 %v9734_v20, %s8962_s18 }
 0x3d9   : > { %1561 = vrot.lane.b32.xlu0 %v9734_v20, %s8963_s7 }
 0x3db   : > { %v2026_v56 = vpop.xlane.xlu1 %2025 }
 0x3dc   : > { %v2042_v59 = vsub.f32 %v9647_v49, %v2026_v56  ;;  %v9759_v49 = vpop.permute.xlu0 %1519 }
 0x3dd   : > { %11346 = vst [vmem:[#allocation37_spill] sm:$0xff] %v9759_v49 }
 0x3de   : > { %v2073_v2 = vmul.f32 1.442695, %v2042_v59 }
 0x3df   : > { %v9763_v10 = vpop.permute.xlu1 %1527 }
 0x3e0   : > { %8320 = vpow2.f32 %v2073_v2  ;;  %11347 = vst [vmem:[#allocation38_spill] sm:$0xff] %v9763_v10 }
 0x3ed   : > { %v9747_v51 = vpop.eup %8320 }
 0x3ee   : > { %v2120_v48 = vsel %vm1978_vm2, %v9747_v51, 0.0 }
 0x3ef   : > { %2121 = vadd.xlane.f32.xlu1 %v2120_v48 }
 0x400   : > { %1533 = vrot.lane.b32.xlu1 %v9535_v53, %s8963_s7 }
 0x404   : > { %1555 = vrot.lane.b32.xlu1 %v9755_v6, %s8961_s4 }
 0x408   : > { %1559 = vrot.lane.b32.xlu1 %v9755_v6, %s8962_s18 }
 0x40a   : > { %v2077_v19 = vpop.xlane.xlu0 %2076 }
 0x40b   : > { %8322 = vrcp.f32 %v2077_v19 }
 0x40c   : > { %1563 = vrot.lane.b32.xlu1 %v9755_v6, %s8963_s7 }
 0x410   : > { %v2080_v8 = vpop.xlane.xlu1 %2079 }
 0x411   : > { %8324 = vrcp.f32 %v2080_v8 }
 0x412   : > { %v2083_v40 = vpop.xlane.xlu0 %2082 }
 0x413   : > { %8326 = vrcp.f32 %v2083_v40 }
 0x416   : > { %v2086_v43 = vpop.xlane.xlu1 %2085 }
 0x417   : > { %8328 = vrcp.f32 %v2086_v43 }
 0x418   : > { %v8323_v31 = vpop.eup %8322 }
 0x419   : > { %v2124_v35 = vmul.f32 %v8323_v31, %v9657_v44 }
 0x41e   : > { %v8325_v33 = vpop.eup %8324 }
 0x41f   : > { %v2126_v52 = vmul.f32 %v8325_v33, %v9661_v46 }
 0x420   : > { %v8327_v56 = vpop.eup %8326 }
 0x421   : > { %v2155_v59 = vpack.c.bf16 %v2126_v52, %v2124_v35  ;;  %v2128_v48 = vmul.f32 %v8327_v56, %v9663_v29 }
 0x423   : > { %7443 = vmatmul.mubr.msk.bf16.vlgmr.msra.gmra.mxu1 %vm1978_vm2, %v2155_v59 }
 0x424   : > { %v8329_v2 = vpop.eup %8328  ;;  %7453 = vmatpush3.bf16.msra.mxu1 %v9759_v49  ;;  %7454 = vmatprep.mubr.msk.bf16.mxu1 %vm8964_vm1, %v11264_v11 }
 0x425   : > { %v2130_v22 = vmul.f32 %v8329_v2, %v9669_v14  ;;  %7464 = vmatprep.subr.bf16.mxu1 %v11264_v11 }
 0x427   : > { %v2156_v38 = vpack.c.bf16 %v2130_v22, %v2128_v48  ;;  %v2089_v44 = vpop.xlane.xlu0 %2088 }
 0x428   : > { %8330 = vrcp.f32 %v2089_v44 }
 0x429   : > { %7449 = vmatmul.mubr.msk.bf16.vlgmr.msra.gmra.mxu0 %vm1978_vm2, %v2156_v38 }
 0x42a   : > { %7459 = vmatpush3.bf16.msra.mxu0 %v9736_v60  ;;  %7460 = vmatprep.mubr.msk.bf16.mxu0 %vm8964_vm1, %v11264_v11 }
 0x42b   : > { %7470 = vmatprep.subr.bf16.mxu0 %v11264_v11  ;;  %v2092_v46 = vpop.xlane.xlu1 %2091 }
 0x42c   : > { %8332 = vrcp.f32 %v2092_v46 }
 0x42f   : > { %v2095_v29 = vpop.xlane.xlu0 %2094 }
 0x430   : > { %8334 = vrcp.f32 %v2095_v29 }
 0x433   : > { %v2101_v14 = vpop.xlane.xlu0 %2100 }
 0x434   : > { %v2098_v19 = vpop.xlane.xlu1 %2097 }
 0x435   : > { %8336 = vrcp.f32 %v2098_v19  ;;  %v8331_v8 = vpop.eup %8330 }
 0x436   : > { %8338 = vrcp.f32 %v2101_v14  ;;  %v2132_v33 = vmul.f32 %v8331_v8, %v9680_v5 }
 0x438   : > { %v2107_v40 = vpop.xlane.xlu0 %2106  ;;  %v2104_v43 = vpop.xlane.xlu1 %2103 }
 0x439   : > { %v8333_v31 = vpop.eup %8332  ;;  %8340 = vrcp.f32 %v2104_v43 }
 0x43a   : > { %v2134_v35 = vmul.f32 %v8333_v31, %v9686_v25  ;;  %8342 = vrcp.f32 %v2107_v40 }
 0x43c   : > { %v2110_v52 = vpop.xlane.xlu1 %2109  ;;  %v2157_v56 = vpack.c.bf16 %v2134_v35, %v2132_v33  ;;  %v2113_v59 = vpop.xlane.xlu0 %2112 }
 0x43d   : > { %8344 = vrcp.f32 %v2110_v52  ;;  %v8335_v2 = vpop.eup %8334 }
 0x43e   : > { %7455 = vmatmul.mubr.msk.bf16.vlgmr.msra.gmra.mxu1 %vm1978_vm2, %v2157_v56  ;;  %8346 = vrcp.f32 %v2113_v59  ;;  %v2136_v25 = vmul.f32 %v8335_v2, %v9692_v36  ;;  %v1463_v2 = vadd.f32 %v9565_v3, %v9561_v1 }
 0x43f   : > { %7465 = vmatpush3.bf16.msra.mxu1 %v9742_v62  ;;  %7466 = vmatprep.mubr.msk.bf16.mxu1 %vm8964_vm1, %v11264_v11 }
 0x440   : > { %v2116_v48 = vpop.xlane.xlu1 %2115  ;;  %7476 = vmatprep.subr.bf16.mxu1 %v11264_v11  ;;  %v2119_v46 = vpop.xlane.xlu0 %2118 }
 0x441   : > { %8348 = vrcp.f32 %v2116_v48 }
 0x442   : > { %v8337_v5 = vpop.eup %8336  ;;  %8350 = vrcp.f32 %v2119_v46 }
 0x443   : > { %v2138_v22 = vmul.f32 %v8337_v5, %v9698_v58  ;;  %v8339_v38 = vpop.eup %8338 }
 0x444   : > { %v2140_v14 = vmul.f32 %v8339_v38, %v9696_v57  ;;  %v9797_v40 = vpop.permute.xlu0 %1531 }
 0x445   : > { %v2158_v44 = vpack.c.bf16 %v2138_v22, %v2136_v25  ;;  %11348 = vst [vmem:[#allocation39_spill] sm:$0xff] %v9797_v40  ;;  %v9868_v22 = vsel %vm1585_vm0, %v9755_v6, 0 }
 0x446   : > { %v8341_v29 = vpop.eup %8340 }
 0x447   : > { %7461 = vmatmul.mubr.msk.bf16.vlgmr.msra.gmra.mxu0 %vm1978_vm2, %v2158_v44  ;;  %v2142_v19 = vmul.f32 %v8341_v29, %v9704_v61  ;;  %v8343_v8 = vpop.eup %8342 }
 0x448   : > { %7471 = vmatpush3.bf16.msra.mxu0 %v9763_v10  ;;  %7472 = vmatprep.mubr.msk.bf16.mxu0 %vm8964_vm1, %v11264_v11  ;;  %v2144_v43 = vmul.f32 %v8343_v8, %v9706_v63 }
 0x449   : > { %7482 = vmatprep.subr.bf16.mxu0 %v11264_v11  ;;  %v2159_v36 = vpack.c.bf16 %v2142_v19, %v2140_v14 }
 0x44a   : > { %v8345_v58 = vpop.eup %8344 }
 0x44b   : > { %7467 = vmatmul.mubr.msk.bf16.vlgmr.msra.gmra.mxu1 %vm1978_vm2, %v2159_v36  ;;  %v2146_v31 = vmul.f32 %v8345_v58, %v9714_v12  ;;  %v8347_v33 = vpop.eup %8346  ;;  %v9814_v12 = vsel %vm1585_vm0, %v9734_v20, 0 }
 0x44c   : > { %7477 = vmatpush3.bf16.msra.mxu1 %v9797_v40  ;;  %7478 = vmatprep.mubr.msk.bf16.mxu1 %vm8964_vm1, %v11264_v11  ;;  %v2148_v35 = vmul.f32 %v8347_v33, %v9712_v7  ;;  %v1554_v7 = vpop.permute.xlu0 %1553 }
 0x44d   : > { %v2160_v57 = vpack.c.bf16 %v2146_v31, %v2144_v43  ;;  %7488 = vmatprep.subr.bf16.mxu1 %v11264_v11 }
 0x44e   : > { %v8349_v61 = vpop.eup %8348 }
 0x44f   : > { %7473 = vmatmul.mubr.msk.bf16.vlgmr.msra.gmra.mxu0 %vm1978_vm2, %v2160_v57  ;;  %v2150_v52 = vmul.f32 %v8349_v61, %v9720_v47  ;;  %v9821_v47 = vsel %vm1585_vm0, %v1554_v7, 0 }
 0x450   : > { %7484 = vmatprep.mubr.msk.bf16.mxu0 %vm8964_vm1, %v11264_v11  ;;  %v1558_v20 = vpop.permute.xlu0 %1557 }
 0x451   : > { %v2161_v63 = vpack.c.bf16 %v2150_v52, %v2148_v35  ;;  %v9830_v56 = vsel %vm1585_vm0, %v1558_v20, 0 }
 0x453   : > { %7479 = vmatmul.mubr.msk.bf16.vlgmr.msra.gmra.mxu1 %vm1978_vm2, %v2161_v63 }
 0x454   : > { %7489 = vmatpush3.bf16.xpose.msra.mxu1 %v9814_v12  ;;  %7490 = vmatprep.mubr.msk.bf16.mxu1 %vm8964_vm1, %v11264_v11 }
 0x455   : > { %7500 = vmatprep.subr.bf16.mxu1 %v11264_v11 }
 0x45b   : > { %7491 = vmatmul.mubr.msk.bf16.vlgmr.msra.gmra.mxu1 %vm1585_vm0, %v9402_v27  ;;  %v1562_v27 = vpop.permute.xlu0 %1561 }
 0x45c   : > { %7501 = vmatpush3.bf16.xpose.msra.mxu1 %v9821_v47  ;;  %7502 = vmatprep.mubr.msk.bf16.mxu1 %vm8964_vm1, %v11264_v11  ;;  %v9839_v59 = vsel %vm1585_vm0, %v1562_v27, 0 }
 0x45d   : > { %7512 = vmatprep.subr.bf16.mxu1 %v11264_v11 }
 0x463   : > { %7503 = vmatmul.mubr.msk.bf16.vlgmr.msra.gmra.mxu1 %vm1585_vm0, %v9480_v24  ;;  %v1466_v24 = vadd.f32 %v9595_v50, %v9561_v1  ;;  %v8351_v1 = vpop.eup %8350 }
 0x464   : > { %7513 = vmatpush3.bf16.xpose.msra.mxu1 %v9830_v56  ;;  %7514 = vmatprep.mubr.msk.bf16.mxu1 %vm8964_vm1, %v11264_v11 }
 0x465   : > { %7524 = vmatprep.subr.bf16.mxu1 %v11264_v11  ;;  %v9851_v48 = vpack.c.bf16 %v1466_v24, %v1463_v2 }
 0x46b   : > { %7515 = vmatmul.mubr.msk.bf16.vlgmr.msra.gmra.mxu1 %vm1585_vm0, %v9498_v32 }
 0x46c   : > { %7525 = vmatpush3.bf16.xpose.msra.mxu1 %v9839_v59  ;;  %7526 = vmatprep.mubr.msk.bf16.mxu1 %vm8964_vm1, %v11264_v11 }
 0x46d   : > { %7536 = vmatprep.subr.bf16.mxu1 %v11264_v11 }
 0x473   : > { %7527 = vmatmul.mubr.msk.bf16.vlgmr.msra.gmra.mxu1 %vm1585_vm0, %v9531_v16  ;;  %v2152_v16 = vmul.f32 %v8351_v1, %v9722_v39 }
 0x474   : > { %7537 = vmatpush3.bf16.msra.mxu1 %v9851_v48  ;;  %7538 = vmatprep.mubr.msk.bf16.mxu1 %vm8964_vm1, %v11264_v11 }
 0x475   : > { %7548 = vmatprep.subr.bf16.mxu1 %v11264_v11 }
 0x478   : > { %v2122_v32 = vpop.xlane.xlu1 %2121 }
 0x479   : > { %8352 = vrcp.f32 %v2122_v32 }
 0x47c   : > { %v9859_v5 = vpop.permute.xlu1 %1533 }
 0x47d   : > { %11349 = vst [vmem:[#allocation40_spill] sm:$0xff] %v9859_v5  ;;  %7483 = vmatpush3.bf16.msra.mxu0 %v9859_v5 }
 0x47e   : > { %7494 = vmatprep.subr.bf16.mxu0 %v11264_v11 }
 0x480   : > { %v1556_v38 = vpop.permute.xlu1 %1555 }
 0x481   : > { %v9875_v44 = vsel %vm1585_vm0, %v1556_v38, 0 }
 0x484   : > { %v1560_v39 = vpop.permute.xlu1 %1559 }
 0x486   : > { %v8353_v3 = vpop.eup %8352 }
 0x487   : > { %v2154_v50 = vmul.f32 %v8353_v3, %v9747_v51  ;;  %v9884_v51 = vsel %vm1585_vm0, %v1560_v39, 0 }
 0x489   : > { %v2162_v25 = vpack.c.bf16 %v2154_v50, %v2152_v16 }
 0x48b   : > { %7485 = vmatmul.mubr.msk.bf16.vlgmr.msra.gmra.mxu0 %vm1978_vm2, %v2162_v25 }
 0x48c   : > { %7495 = vmatpush3.bf16.xpose.msra.mxu0 %v9868_v22  ;;  %7496 = vmatprep.mubr.msk.bf16.mxu0 %vm8964_vm1, %v11264_v11 }
 0x48d   : > { %7506 = vmatprep.subr.bf16.mxu0 %v11264_v11 }
 0x493   : > { %7497 = vmatmul.mubr.msk.bf16.vlgmr.msra.gmra.mxu0 %vm1585_vm0, %v9410_v37  ;;  %v1564_v37 = vpop.permute.xlu1 %1563 }
 0x494   : > { %7507 = vmatpush3.bf16.xpose.msra.mxu0 %v9875_v44  ;;  %7508 = vmatprep.mubr.msk.bf16.mxu0 %vm8964_vm1, %v11264_v11  ;;  %v9893_v6 = vsel %vm1585_vm0, %v1564_v37, 0 }
 0x495   : > { %7518 = vmatprep.subr.bf16.mxu0 %v11264_v11 }
 0x49b   : > { %7509 = vmatmul.mubr.msk.bf16.vlgmr.msra.gmra.mxu0 %vm1585_vm0, %v9487_v28 }
 0x49c   : > { %7519 = vmatpush3.bf16.xpose.msra.mxu0 %v9884_v51  ;;  %7520 = vmatprep.mubr.msk.bf16.mxu0 %vm8964_vm1, %v11264_v11 }
 0x49d   : > { %7530 = vmatprep.subr.bf16.mxu0 %v11264_v11 }
 0x4a3   : > { %7521 = vmatmul.mubr.msk.bf16.vlgmr.msra.gmra.mxu0 %vm1585_vm0, %v9515_v42 }
 0x4a4   : > { %7531 = vmatpush3.bf16.xpose.msra.mxu0 %v9893_v6  ;;  %7532 = vmatprep.mubr.msk.bf16.mxu0 %vm8964_vm1, %v11264_v11 }
 0x4a5   : > { %7542 = vmatprep.subr.bf16.mxu0 %v11264_v11 }
 0x4ab   : > { %7533 = vmatmul.mubr.msk.bf16.vlgmr.msra.gmra.mxu0 %vm1585_vm0, %v9541_v55 }
 0x4ac   : > { %7543 = vmatpush3.bf16.msra.mxu0 %v9573_v9  ;;  %7544 = vmatprep.mubr.msk.bf16.mxu0 %vm8964_vm1, %v11264_v11 }
 0x4ad   : > { %7554 = vmatprep.subr.bf16.mxu0 %v11264_v11 }
 0x4e3   : > { %v9907_v28 = vpop.f32.mrf.mxu1 }
 0x4e4   : > { %11350 = vst [vmem:[#allocation41_spill] sm:$0xff] %v9907_v28 }
 0x4e5   : > { %v7444_v42 = vpop.f32.mrf.mxu1 }
 0x4e7   : > { %v9909_v46 = vpop.f32.mrf.mxu1 }
 0x4e8   : > { %11351 = vst [vmem:[#allocation42_spill] sm:$0xff] %v9909_v46 }
 0x4e9   : > { %v9911_v29 = vpop.f32.mrf.mxu0  ;;  %v7445_v14 = vpop.f32.mrf.mxu1 }
 0x4ea   : > { %11352 = vst [vmem:[#allocation43_spill] sm:$0xff] %v9911_v29 }
 0x4eb   : > { %v7450_v19 = vpop.f32.mrf.mxu0 }
 0x4ed   : > { %v9913_v8 = vpop.f32.mrf.mxu0 }
 0x4ee   : > { %11353 = vst [vmem:[#allocation44_spill] sm:$0xff] %v9913_v8 }
 0x4ef   : > { %v7451_v36 = vpop.f32.mrf.mxu0 }
 0x4fe   : > { %v9915_v55 = vpop.f32.mrf.mxu1 }
 0x500   : > { %v7456_v58 = vpop.f32.mrf.mxu1 }
 0x502   : > { %v9917_v43 = vpop.f32.mrf.mxu1 }
 0x504   : > { %v7457_v33 = vpop.f32.mrf.mxu1 }
 0x507   : > { %v9921_v57 = vpop.f32.mrf.mxu0 }
 0x509   : > { %v7462_v61 = vpop.f32.mrf.mxu0 }
 0x50b   : > { %v9923_v35 = vpop.f32.mrf.mxu0  ;;  %v9927_v63 = vpop.f32.mrf.mxu1 }
 0x50c   : > { %11354 = vst [vmem:[#allocation45_spill] sm:$0xff] %v9927_v63 }
 0x50d   : > { %v7463_v7 = vpop.f32.mrf.mxu0  ;;  %v7468_v20 = vpop.f32.mrf.mxu1 }
 0x50f   : > { %v9929_v27 = vpop.f32.mrf.mxu1  ;;  %v9931_v24 = vpop.f32.mrf.mxu0 }
 0x510   : > { %11355 = vst [vmem:[#allocation46_spill] sm:$0xff] %v9931_v24 }
 0x511   : > { %v7469_v32 = vpop.f32.mrf.mxu1  ;;  %v7474_v1 = vpop.f32.mrf.mxu0 }
 0x513   : > { %v9935_v3 = vpop.f32.mrf.mxu0  ;;  %v9937_v16 = vpop.f32.mrf.mxu1 }
 0x514   : > { %11356 = vst [vmem:[#allocation47_spill] sm:$0xff] %v9935_v3  ;;  %11357 = vst [vmem:[#allocation48_spill] sm:$0xff] %v9937_v16 }
 0x515   : > { %v7475_v25 = vpop.f32.mrf.mxu0  ;;  %v7480_v38 = vpop.f32.mrf.mxu1 }
 0x517   : > { %v9941_v39 = vpop.f32.mrf.mxu1 }
 0x518   : > { %11358 = vst [vmem:[#allocation49_spill] sm:$0xff] %v9941_v39 }
 0x519   : > { %v7481_v42 = vpop.f32.mrf.mxu1 }
 0x51b   : > { %v2552_v14 = vpop.f32.mrf.mxu1 }
 0x51c   : > { %v9945_v19 = vmul.f32 0.17677669, %v2552_v14 }
 0x51d   : > { %v7492_v36 = vpop.f32.mrf.mxu1 }
 0x51e   : > { %v2883_v58 = vsel %vm1978_vm2, %v9945_v19, -inf }
 0x51f   : > { %2884 = vmax.xlane.f32.xlu0 %v2883_v58  ;;  %v2555_v33 = vpop.f32.mrf.mxu1 }
 0x520   : > { %v9949_v61 = vmul.f32 0.17677669, %v2555_v33 }
 0x521   : > { %v7493_v7 = vpop.f32.mrf.mxu1 }
 0x522   : > { %v2886_v20 = vsel %vm1978_vm2, %v9949_v61, -inf }
 0x523   : > { %2887 = vmax.xlane.f32.xlu1 %v2886_v20  ;;  %v2640_v32 = vpop.f32.mrf.mxu1 }
 0x524   : > { %v9969_v17 = vmul.f32 0.17677669, %v2640_v32 }
 0x525   : > { %v7504_v1 = vpop.f32.mrf.mxu1 }
 0x527   : > { %v2643_v25 = vpop.f32.mrf.mxu1 }
 0x528   : > { %v9953_v38 = vmul.f32 0.17677669, %v2643_v25 }
 0x529   : > { %v7505_v42 = vpop.f32.mrf.mxu1 }
 0x52a   : > { %v2898_v14 = vsel %vm1978_vm2, %v9953_v38, -inf }
 0x52b   : > { %2899 = vmax.xlane.f32.xlu1 %v2898_v14  ;;  %v2728_v36 = vpop.f32.mrf.mxu1 }
 0x52c   : > { %v9979_v29 = vmul.f32 0.17677669, %v2728_v36 }
 0x52d   : > { %v7516_v58 = vpop.f32.mrf.mxu1 }
 0x52f   : > { %v2731_v0 = vpop.f32.mrf.mxu1 }
 0x530   : > { %v9981_v32 = vmul.f32 0.17677669, %v2731_v0 }
 0x531   : > { %v7517_v33 = vpop.f32.mrf.mxu1 }
 0x532   : > { %v2910_v36 = vsel %vm1978_vm2, %v9981_v32, -inf }
 0x533   : > { %v2816_v37 = vpop.f32.mrf.mxu1 }
 0x534   : > { %v9995_v28 = vmul.f32 0.17677669, %v2816_v37 }
 0x535   : > { %v7528_v7 = vpop.f32.mrf.mxu1 }
 0x537   : > { %v2819_v50 = vpop.f32.mrf.mxu1 }
 0x539   : > { %v7529_v2 = vpop.f32.mrf.mxu1 }
 0x54b   : > { %v9957_v52 = vpop.f32.mrf.mxu0 }
 0x54c   : > { %11359 = vst [vmem:[#allocation50_spill] sm:$0xff] %v9957_v52 }
 0x54d   : > { %v7486_v20 = vpop.f32.mrf.mxu0 }
 0x54f   : > { %v9959_v1 = vpop.f32.mrf.mxu0 }
 0x550   : > { %11360 = vst [vmem:[#allocation51_spill] sm:$0xff] %v9959_v1 }
 0x551   : > { %v7487_v42 = vpop.f32.mrf.mxu0 }
 0x553   : > { %v2596_v31 = vpop.f32.mrf.mxu0 }
 0x554   : > { %v9963_v11 = vmul.f32 0.17677669, %v2596_v31  ;;  %v2895_v31 = vsel %vm1978_vm2, %v9969_v17, -inf }
 0x555   : > { %v7498_v14 = vpop.f32.mrf.mxu0 }
 0x556   : > { %v2889_v58 = vsel %vm1978_vm2, %v9963_v11, -inf }
 0x557   : > { %2890 = vmax.xlane.f32.xlu0 %v2889_v58  ;;  %v2599_v33 = vpop.f32.mrf.mxu0 }
 0x558   : > { %v9967_v7 = vmul.f32 0.17677669, %v2599_v33 }
 0x559   : > { %v7499_v2 = vpop.f32.mrf.mxu0 }
 0x55a   : > { %v2892_v20 = vsel %vm1978_vm2, %v9967_v7, -inf }
 0x55b   : > { %2893 = vmax.xlane.f32.xlu0 %v2892_v20  ;;  %v2684_v25 = vpop.f32.mrf.mxu0 }
 0x55c   : > { %v9973_v15 = vmul.f32 0.17677669, %v2684_v25 }
 0x55d   : > { %v7510_v42 = vpop.f32.mrf.mxu0 }
 0x55e   : > { %v2901_v2 = vsel %vm1978_vm2, %v9973_v15, -inf }
 0x55f   : > { %2896 = vmax.xlane.f32.xlu0 %v2895_v31  ;;  %v2687_v14 = vpop.f32.mrf.mxu0  ;;  %v2907_v31 = vsel %vm1978_vm2, %v9979_v29, -inf }
 0x560   : > { %v9977_v58 = vmul.f32 0.17677669, %v2687_v14 }
 0x561   : > { %v7511_v33 = vpop.f32.mrf.mxu0 }
 0x562   : > { %v2904_v20 = vsel %vm1978_vm2, %v9977_v58, -inf }
 0x563   : > { %2902 = vmax.xlane.f32.xlu0 %v2901_v2  ;;  %2905 = vmax.xlane.f32.xlu1 %v2904_v20  ;;  %v2772_v25 = vpop.f32.mrf.mxu0  ;;  %v9997_v2 = vmul.f32 0.17677669, %v2819_v50 }
 0x564   : > { %v9987_v8 = vmul.f32 0.17677669, %v2772_v25 }
 0x565   : > { %v7522_v42 = vpop.f32.mrf.mxu0  ;;  %v2922_v37 = vsel %vm1978_vm2, %v9997_v2, -inf }
 0x566   : > { %v2913_v20 = vsel %vm1978_vm2, %v9987_v8, -inf }
 0x567   : > { %2908 = vmax.xlane.f32.xlu0 %v2907_v31  ;;  %2911 = vmax.xlane.f32.xlu1 %v2910_v36  ;;  %v2775_v0 = vpop.f32.mrf.mxu0  ;;  %v2919_v36 = vsel %vm1978_vm2, %v9995_v28, -inf }
 0x568   : > { %v9993_v14 = vmul.f32 0.17677669, %v2775_v0 }
 0x569   : > { %v7523_v33 = vpop.f32.mrf.mxu0 }
 0x56a   : > { %v2916_v25 = vsel %vm1978_vm2, %v9993_v14, -inf }
 0x56b   : > { %2914 = vmax.xlane.f32.xlu0 %v2913_v20  ;;  %2917 = vmax.xlane.f32.xlu1 %v2916_v25  ;;  %v2860_v42 = vpop.f32.mrf.mxu0 }
 0x56c   : > { %v10003_v31 = vmul.f32 0.17677669, %v2860_v42 }
 0x56d   : > { %v7534_v46 = vpop.f32.mrf.mxu0 }
 0x56e   : > { %v2925_v33 = vsel %vm1978_vm2, %v10003_v31, -inf }
 0x56f   : > { %2920 = vmax.xlane.f32.xlu0 %v2919_v36  ;;  %2923 = vmax.xlane.f32.xlu1 %v2922_v37  ;;  %v2863_v50 = vpop.f32.mrf.mxu0 }
 0x570   : > { %v10017_v46 = vmul.f32 0.17677669, %v2863_v50 }
 0x571   : > { %v7535_v0 = vpop.f32.mrf.mxu0 }
 0x572   : > { %v2928_v20 = vsel %vm1978_vm2, %v10017_v46, -inf }
 0x573   : > { %2926 = vmax.xlane.f32.xlu0 %v2925_v33 }
 0x580   : > { %1569 = vrot.lane.b32.xlu1 %v9573_v9, %s8961_s4 }
 0x584   : > { %1573 = vrot.lane.b32.xlu1 %v9851_v48, %s8962_s18 }
 0x589   : > { %1567 = vrot.lane.b32.xlu0 %v9851_v48, %s8961_s4 }
 0x5a8   : > { %2929 = vmax.xlane.f32.xlu1 %v2928_v20  ;;  %v2885_v25 = vpop.xlane.xlu0 %2884 }
 0x5a9   : > { %v2931_v42 = vsub.f32 %v9945_v19, %v2885_v25 }
 0x5ab   : > { %v2947_v36 = vmul.f32 1.442695, %v2931_v42 }
 0x5ac   : > { %v2888_v50 = vpop.xlane.xlu1 %2887 }
 0x5ad   : > { %8354 = vpow2.f32 %v2947_v36  ;;  %v2932_v33 = vsub.f32 %v9949_v61, %v2888_v50 }
 0x5af   : > { %v2949_v5 = vmul.f32 1.442695, %v2932_v33 }
 0x5b1   : > { %8356 = vpow2.f32 %v2949_v5 }
 0x5b4   : > { %v2900_v25 = vpop.xlane.xlu1 %2899 }
 0x5b5   : > { %v2936_v40 = vsub.f32 %v9953_v38, %v2900_v25 }
 0x5b7   : > { %v2957_v61 = vmul.f32 1.442695, %v2936_v40 }
 0x5b9   : > { %1575 = vrot.lane.b32.xlu1 %v9573_v9, %s8962_s18 }
 0x5ba   : > { %v10024_v37 = vpop.eup %8354 }
 0x5bb   : > { %v2979_v0 = vsel %vm1978_vm2, %v10024_v37, 0.0 }
 0x5bc   : > { %2980 = vadd.xlane.f32.xlu0 %v2979_v0 }
 0x5be   : > { %v10029_v20 = vpop.eup %8356 }
 0x5bf   : > { %v2982_v19 = vsel %vm1978_vm2, %v10029_v20, 0.0 }
 0x5dd   : > { %2983 = vadd.xlane.f32.xlu1 %v2982_v19 }
 0x5e0   : > { %v2891_v42 = vpop.xlane.xlu0 %2890 }
 0x5e1   : > { %v2933_v36 = vsub.f32 %v9963_v11, %v2891_v42 }
 0x5e3   : > { %v2951_v10 = vmul.f32 1.442695, %v2933_v36 }
 0x5e4   : > { %v2894_v62 = vpop.xlane.xlu0 %2893 }
 0x5e5   : > { %8358 = vpow2.f32 %v2951_v10  ;;  %v2934_v0 = vsub.f32 %v9967_v7, %v2894_v62 }
 0x5e7   : > { %v2953_v50 = vmul.f32 1.442695, %v2934_v0 }
 0x5e8   : > { %v2897_v5 = vpop.xlane.xlu0 %2896 }
 0x5e9   : > { %8360 = vpow2.f32 %v2953_v50  ;;  %v2935_v33 = vsub.f32 %v9969_v17, %v2897_v5 }
 0x5ea   : > { %8362 = vpow2.f32 %v2957_v61 }
 0x5eb   : > { %v2955_v60 = vmul.f32 1.442695, %v2935_v33 }
 0x5ec   : > { %v2903_v19 = vpop.xlane.xlu0 %2902  ;;  %v2906_v49 = vpop.xlane.xlu1 %2905 }
 0x5ed   : > { %8364 = vpow2.f32 %v2955_v60  ;;  %v2937_v11 = vsub.f32 %v9973_v15, %v2903_v19  ;;  %v2938_v38 = vsub.f32 %v9977_v58, %v2906_v49 }
 0x5ef   : > { %v2959_v25 = vmul.f32 1.442695, %v2937_v11  ;;  %v2961_v42 = vmul.f32 1.442695, %v2938_v38 }
 0x5f0   : > { %v2909_v10 = vpop.xlane.xlu0 %2908  ;;  %v2912_v36 = vpop.xlane.xlu1 %2911 }
 0x5f1   : > { %8366 = vpow2.f32 %v2959_v25  ;;  %v2939_v62 = vsub.f32 %v9979_v29, %v2909_v10  ;;  %v2940_v40 = vsub.f32 %v9981_v32, %v2912_v36 }
 0x5f2   : > { %v10041_v7 = vpop.eup %8358  ;;  %8368 = vpow2.f32 %v2961_v42 }
 0x5f3   : > { %v2963_v17 = vmul.f32 1.442695, %v2939_v62  ;;  %v2965_v0 = vmul.f32 1.442695, %v2940_v40  ;;  %v2985_v60 = vsel %vm1978_vm2, %v10041_v7, 0.0 }
 0x5f4   : > { %v2915_v15 = vpop.xlane.xlu0 %2914  ;;  %v2918_v61 = vpop.xlane.xlu1 %2917  ;;  %2986 = vadd.xlane.f32.xlu0 %v2985_v60 }
 0x5f5   : > { %8370 = vpow2.f32 %v2963_v17  ;;  %v2941_v49 = vsub.f32 %v9987_v8, %v2915_v15  ;;  %v2942_v58 = vsub.f32 %v9993_v14, %v2918_v61 }
 0x5f6   : > { %v10047_v50 = vpop.eup %8360  ;;  %8372 = vpow2.f32 %v2965_v0 }
 0x5f7   : > { %v2967_v29 = vmul.f32 1.442695, %v2941_v49  ;;  %v2969_v32 = vmul.f32 1.442695, %v2942_v58  ;;  %v2988_v5 = vsel %vm1978_vm2, %v10047_v50, 0.0  ;;  %v10051_v33 = vpop.eup %8362 }
 0x5f8   : > { %v2921_v19 = vpop.xlane.xlu0 %2920  ;;  %v2924_v11 = vpop.xlane.xlu1 %2923  ;;  %2989 = vadd.xlane.f32.xlu1 %v2988_v5  ;;  %v2994_v36 = vsel %vm1978_vm2, %v10051_v33, 0.0 }
 0x5f9   : > { %8374 = vpow2.f32 %v2967_v29  ;;  %v2943_v38 = vsub.f32 %v9995_v28, %v2921_v19  ;;  %v2944_v8 = vsub.f32 %v9997_v2, %v2924_v11 }
 0x5fa   : > { %v10055_v25 = vpop.eup %8364  ;;  %8376 = vpow2.f32 %v2969_v32 }
 0x5fb   : > { %v2971_v14 = vmul.f32 1.442695, %v2943_v38  ;;  %v2973_v42 = vmul.f32 1.442695, %v2944_v8  ;;  %v2991_v10 = vsel %vm1978_vm2, %v10055_v25, 0.0 }
 0x5fc   : > { %2992 = vadd.xlane.f32.xlu0 %v2991_v10  ;;  %v2927_v62 = vpop.xlane.xlu0 %2926  ;;  %2995 = vadd.xlane.f32.xlu1 %v2994_v36  ;;  %v10100_v10 = vpop.permute.xlu1 %1569 }
 0x5fd   : > { %8378 = vpow2.f32 %v2971_v14  ;;  %v2945_v40 = vsub.f32 %v10003_v31, %v2927_v62 }
 0x5fe   : > { %v10062_v28 = vpop.eup %8366  ;;  %8380 = vpow2.f32 %v2973_v42 }
 0x5ff   : > { %v10064_v2 = vpop.eup %8368  ;;  %v2975_v17 = vmul.f32 1.442695, %v2945_v40  ;;  %v2997_v0 = vsel %vm1978_vm2, %v10062_v28, 0.0 }
 0x600   : > { %2998 = vadd.xlane.f32.xlu0 %v2997_v0  ;;  %v3000_v60 = vsel %vm1978_vm2, %v10064_v2, 0.0  ;;  %v10104_v36 = vpop.permute.xlu1 %1573 }
 0x601   : > { %8382 = vpow2.f32 %v2975_v17  ;;  %3001 = vadd.xlane.f32.xlu1 %v3000_v60 }
 0x602   : > { %v10070_v15 = vpop.eup %8370 }
 0x603   : > { %v10072_v61 = vpop.eup %8372  ;;  %v3003_v31 = vsel %vm1978_vm2, %v10070_v15, 0.0 }
 0x604   : > { %3004 = vadd.xlane.f32.xlu0 %v3003_v31  ;;  %v3006_v49 = vsel %vm1978_vm2, %v10072_v61, 0.0  ;;  %v10119_v31 = vpop.permute.xlu0 %1567 }
 0x605   : > { %3007 = vadd.xlane.f32.xlu1 %v3006_v49 }
 0x606   : > { %v10078_v58 = vpop.eup %8374 }
 0x607   : > { %v10080_v29 = vpop.eup %8376  ;;  %v3009_v32 = vsel %vm1978_vm2, %v10078_v58, 0.0 }
 0x608   : > { %3010 = vadd.xlane.f32.xlu0 %v3009_v32  ;;  %v3012_v5 = vsel %vm1978_vm2, %v10080_v29, 0.0 }
 0x609   : > { %3013 = vadd.xlane.f32.xlu1 %v3012_v5 }
 0x60a   : > { %v10086_v19 = vpop.eup %8378 }
 0x60b   : > { %v10088_v11 = vpop.eup %8380  ;;  %v3015_v38 = vsel %vm1978_vm2, %v10086_v19, 0.0 }
 0x60c   : > { %3016 = vadd.xlane.f32.xlu0 %v3015_v38  ;;  %v3018_v8 = vsel %vm1978_vm2, %v10088_v11, 0.0 }
 0x60d   : > { %3019 = vadd.xlane.f32.xlu1 %v3018_v8 }
 0x60e   : > { %v10094_v14 = vpop.eup %8382 }
 0x60f   : > { %v3021_v42 = vsel %vm1978_vm2, %v10094_v14, 0.0 }
 0x610   : > { %3022 = vadd.xlane.f32.xlu0 %v3021_v42 }
 0x626   : > { %1579 = vrot.lane.b32.xlu0 %v9851_v48, %s8963_s7 }
 0x62a   : > { %1539 = vrot.lane.b32.xlu0 %v9567_v4, %s8961_s4 }
 0x62e   : > { %1543 = vrot.lane.b32.xlu0 %v9567_v4, %s8962_s18 }
 0x631   : > { %v2930_v62 = vpop.xlane.xlu1 %2929 }
 0x632   : > { %v2946_v40 = vsub.f32 %v10017_v46, %v2930_v62  ;;  %1547 = vrot.lane.b32.xlu0 %v9567_v4, %s8963_s7 }
 0x634   : > { %v2977_v17 = vmul.f32 1.442695, %v2946_v40  ;;  %v11361_v40 = vmov 0.0  }
 0x635   : > { %v10123_v46 = vpop.permute.xlu1 %1575 }
 0x636   : > { %8384 = vpow2.f32 %v2977_v17 }
 0x643   : > { %v10111_v0 = vpop.eup %8384 }
 0x644   : > { %v3024_v60 = vsel %vm1978_vm2, %v10111_v0, 0.0 }
 0x645   : > { %3025 = vadd.xlane.f32.xlu1 %v3024_v60  ;;  %v2981_v49 = vpop.xlane.xlu0 %2980 }
 0x646   : > { %8386 = vrcp.f32 %v2981_v49 }
 0x653   : > { %v8387_v5 = vpop.eup %8386 }
 0x654   : > { %v3028_v8 = vmul.f32 %v8387_v5, %v10024_v37 }
 0x656   : > { %1581 = vrot.lane.b32.xlu1 %v9573_v9, %s8963_s7 }
 0x65a   : > { %1541 = vrot.lane.b32.xlu1 %v9577_v13, %s8961_s4 }
 0x65e   : > { %1545 = vrot.lane.b32.xlu1 %v9577_v13, %s8962_s18 }
 0x662   : > { %1549 = vrot.lane.b32.xlu1 %v9577_v13, %s8963_s7 }
 0x666   : > { %v2984_v32 = vpop.xlane.xlu1 %2983 }
 0x667   : > { %8388 = vrcp.f32 %v2984_v32 }
 0x674   : > { %v8389_v38 = vpop.eup %8388 }
 0x675   : > { %v3030_v42 = vmul.f32 %v8389_v38, %v10029_v20 }
 0x677   : > { %v3059_v62 = vpack.c.bf16 %v3030_v42, %v3028_v8 }
 0x679   : > { %7539 = vmatmul.mubr.msk.bf16.vlgmr.msra.gmra.mxu1 %vm1978_vm2, %v3059_v62 }
 0x67a   : > { %7549 = vmatpush3.bf16.msra.mxu1 %v10119_v31  ;;  %7550 = vmatprep.mubr.msk.bf16.mxu1 %vm8964_vm1, %v11361_v40 }
 0x67b   : > { %7560 = vmatprep.subr.bf16.mxu1 %v11361_v40 }
 0x67d   : > { %v2987_v17 = vpop.xlane.xlu0 %2986 }
 0x67e   : > { %8390 = vrcp.f32 %v2987_v17 }
 0x681   : > { %v2990_v60 = vpop.xlane.xlu1 %2989 }
 0x682   : > { %8392 = vrcp.f32 %v2990_v60 }
 0x685   : > { %v2993_v49 = vpop.xlane.xlu0 %2992  ;;  %v2996_v32 = vpop.xlane.xlu1 %2995 }
 0x686   : > { %8394 = vrcp.f32 %v2993_v49 }
 0x687   : > { %8396 = vrcp.f32 %v2996_v32 }
 0x689   : > { %v2999_v37 = vpop.xlane.xlu0 %2998 }
 0x68a   : > { %8398 = vrcp.f32 %v2999_v37  ;;  %v3002_v20 = vpop.xlane.xlu1 %3001 }
 0x68b   : > { %8400 = vrcp.f32 %v3002_v20  ;;  %v8391_v5 = vpop.eup %8390 }
 0x68c   : > { %v3032_v62 = vmul.f32 %v8391_v5, %v10041_v7 }
 0x68d   : > { %v3005_v38 = vpop.xlane.xlu0 %3004 }
 0x68e   : > { %8402 = vrcp.f32 %v3005_v38  ;;  %v3008_v8 = vpop.xlane.xlu1 %3007 }
 0x68f   : > { %v8393_v42 = vpop.eup %8392  ;;  %8404 = vrcp.f32 %v3008_v8 }
 0x690   : > { %v3034_v17 = vmul.f32 %v8393_v42, %v10047_v50 }
 0x691   : > { %v3011_v52 = vpop.xlane.xlu0 %3010 }
 0x692   : > { %8406 = vrcp.f32 %v3011_v52  ;;  %v3014_v60 = vpop.xlane.xlu1 %3013  ;;  %v3060_v1 = vpack.c.bf16 %v3034_v17, %v3032_v62 }
 0x693   : > { %v8395_v49 = vpop.eup %8394  ;;  %8408 = vrcp.f32 %v3014_v60 }
 0x694   : > { %v8397_v32 = vpop.eup %8396  ;;  %7545 = vmatmul.mubr.msk.bf16.vlgmr.msra.gmra.mxu0 %vm1978_vm2, %v3060_v1  ;;  %v3036_v37 = vmul.f32 %v8395_v49, %v10055_v25 }
 0x695   : > { %7555 = vmatpush3.bf16.msra.mxu0 %v10100_v10  ;;  %v3017_v20 = vpop.xlane.xlu0 %3016  ;;  %v3038_v38 = vmul.f32 %v8397_v32, %v10051_v33  ;;  %7556 = vmatprep.mubr.msk.bf16.mxu0 %vm8964_vm1, %v11361_v40 }
 0x696   : > { %8410 = vrcp.f32 %v3017_v20  ;;  %v3020_v7 = vpop.xlane.xlu1 %3019  ;;  %7566 = vmatprep.subr.bf16.mxu0 %v11361_v40 }
 0x697   : > { %v8399_v52 = vpop.eup %8398  ;;  %8412 = vrcp.f32 %v3020_v7  ;;  %v3061_v50 = vpack.c.bf16 %v3038_v38, %v3036_v37 }
 0x698   : > { %v8401_v5 = vpop.eup %8400  ;;  %v3040_v1 = vmul.f32 %v8399_v52, %v10062_v28 }
 0x699   : > { %7551 = vmatmul.mubr.msk.bf16.vlgmr.msra.gmra.mxu1 %vm1978_vm2, %v3061_v50  ;;  %v3042_v25 = vmul.f32 %v8401_v5, %v10064_v2  ;;  %v3023_v8 = vpop.xlane.xlu0 %3022 }
 0x69a   : > { %7561 = vmatpush3.bf16.msra.mxu1 %v10104_v36  ;;  %7562 = vmatprep.mubr.msk.bf16.mxu1 %vm8964_vm1, %v11361_v40  ;;  %8414 = vrcp.f32 %v3023_v8 }
 0x69b   : > { %v8403_v33 = vpop.eup %8402  ;;  %v3062_v42 = vpack.c.bf16 %v3042_v25, %v3040_v1  ;;  %7572 = vmatprep.subr.bf16.mxu1 %v11361_v40 }
 0x69c   : > { %v8405_v62 = vpop.eup %8404  ;;  %v3044_v17 = vmul.f32 %v8403_v33, %v10070_v15 }
 0x69d   : > { %7557 = vmatmul.mubr.msk.bf16.vlgmr.msra.gmra.mxu0 %vm1978_vm2, %v3062_v42  ;;  %v3046_v28 = vmul.f32 %v8405_v62, %v10072_v61  ;;  %v10158_v37 = vpop.permute.xlu0 %1579 }
 0x69e   : > { %7567 = vmatpush3.bf16.msra.mxu0 %v10123_v46  ;;  %7568 = vmatprep.mubr.msk.bf16.mxu0 %vm8964_vm1, %v11361_v40 }
 0x69f   : > { %v8407_v2 = vpop.eup %8406  ;;  %v3063_v60 = vpack.c.bf16 %v3046_v28, %v3044_v17  ;;  %7578 = vmatprep.subr.bf16.mxu0 %v11361_v40 }
 0x6a0   : > { %v8409_v49 = vpop.eup %8408  ;;  %v3048_v32 = vmul.f32 %v8407_v2, %v10078_v58 }
 0x6a1   : > { %7563 = vmatmul.mubr.msk.bf16.vlgmr.msra.gmra.mxu1 %vm1978_vm2, %v3063_v60  ;;  %v3050_v15 = vmul.f32 %v8409_v49, %v10080_v29 }
 0x6a2   : > { %7573 = vmatpush3.bf16.msra.mxu1 %v10158_v37  ;;  %7574 = vmatprep.mubr.msk.bf16.mxu1 %vm8964_vm1, %v11361_v40 }
 0x6a3   : > { %v8411_v61 = vpop.eup %8410  ;;  %v3064_v20 = vpack.c.bf16 %v3050_v15, %v3048_v32  ;;  %7584 = vmatprep.subr.bf16.mxu1 %v11361_v40 }
 0x6a4   : > { %v8413_v38 = vpop.eup %8412  ;;  %v3052_v7 = vmul.f32 %v8411_v61, %v10086_v19  ;;  %v10182_v19 = vpop.permute.xlu0 %1539 }
 0x6a5   : > { %7569 = vmatmul.mubr.msk.bf16.vlgmr.msra.gmra.mxu0 %vm1978_vm2, %v3064_v20  ;;  %v3054_v58 = vmul.f32 %v8413_v38, %v10088_v11 }
 0x6a6   : > { %7580 = vmatprep.mubr.msk.bf16.mxu0 %vm8964_vm1, %v11361_v40 }
 0x6a7   : > { %v3065_v29 = vpack.c.bf16 %v3054_v58, %v3052_v7  ;;  %v8415_v11 = vpop.eup %8414 }
 0x6a8   : > { %v3056_v50 = vmul.f32 %v8415_v11, %v10094_v14 }
 0x6a9   : > { %7575 = vmatmul.mubr.msk.bf16.vlgmr.msra.gmra.mxu1 %vm1978_vm2, %v3065_v29 }
 0x6aa   : > { %7585 = vmatpush3.bf16.xpose.msra.mxu1 %v9814_v12  ;;  %7586 = vmatprep.mubr.msk.bf16.mxu1 %vm8964_vm1, %v11361_v40  ;;  %v10190_v12 = vpop.permute.xlu0 %1543 }
 0x6ab   : > { %7596 = vmatprep.subr.bf16.mxu1 %v11361_v40 }
 0x6b1   : > { %7587 = vmatmul.mubr.msk.bf16.vlgmr.msra.gmra.mxu1 %vm1585_vm0, %v9567_v4 }
 0x6b2   : > { %7597 = vmatpush3.bf16.xpose.msra.mxu1 %v9821_v47  ;;  %7598 = vmatprep.mubr.msk.bf16.mxu1 %vm8964_vm1, %v11361_v40  ;;  %v10198_v47 = vpop.permute.xlu0 %1547 }
 0x6b3   : > { %7608 = vmatprep.subr.bf16.mxu1 %v11361_v40 }
 0x6b9   : > { %7599 = vmatmul.mubr.msk.bf16.vlgmr.msra.gmra.mxu1 %vm1585_vm0, %v10182_v19 }
 0x6ba   : > { %7609 = vmatpush3.bf16.xpose.msra.mxu1 %v9830_v56  ;;  %7610 = vmatprep.mubr.msk.bf16.mxu1 %vm8964_vm1, %v11361_v40 }
 0x6bb   : > { %7620 = vmatprep.subr.bf16.mxu1 %v11361_v40 }
 0x6c1   : > { %7611 = vmatmul.mubr.msk.bf16.vlgmr.msra.gmra.mxu1 %vm1585_vm0, %v10190_v12 }
 0x6c2   : > { %7621 = vmatpush3.bf16.xpose.msra.mxu1 %v9839_v59  ;;  %7622 = vmatprep.mubr.msk.bf16.mxu1 %vm8964_vm1, %v11361_v40 }
 0x6c3   : > { %7632 = vmatprep.subr.bf16.mxu1 %v11361_v40 }
 0x6c9   : > { %7623 = vmatmul.mubr.msk.bf16.vlgmr.msra.gmra.mxu1 %vm1585_vm0, %v10198_v47 }
 0x6ca   : > { %7633 = vmatpush3.bf16.msra.mxu1 %v9851_v48  ;;  %7634 = vmatprep.mubr.msk.bf16.mxu1 %vm8964_vm1, %v11361_v40 }
 0x6cb   : > { %7644 = vmatprep.subr.bf16.mxu1 %v11361_v40 }
 0x6ce   : > { %v3026_v56 = vpop.xlane.xlu1 %3025 }
 0x6cf   : > { %8416 = vrcp.f32 %v3026_v56 }
 0x6d2   : > { %v10206_v59 = vpop.permute.xlu1 %1581 }
 0x6d3   : > { %7579 = vmatpush3.bf16.msra.mxu0 %v10206_v59 }
 0x6d4   : > { %7590 = vmatprep.subr.bf16.mxu0 %v11361_v40 }
 0x6d6   : > { %v10223_v14 = vpop.permute.xlu1 %1541 }
 0x6dc   : > { %v8417_v52 = vpop.eup %8416 }
 0x6dd   : > { %v3058_v48 = vmul.f32 %v8417_v52, %v10111_v0 }
 0x6df   : > { %v3066_v5 = vpack.c.bf16 %v3058_v48, %v3056_v50 }
 0x6e1   : > { %7581 = vmatmul.mubr.msk.bf16.vlgmr.msra.gmra.mxu0 %vm1978_vm2, %v3066_v5 }
 0x6e2   : > { %7591 = vmatpush3.bf16.xpose.msra.mxu0 %v9868_v22  ;;  %7592 = vmatprep.mubr.msk.bf16.mxu0 %vm8964_vm1, %v11361_v40  ;;  %v10231_v22 = vpop.permute.xlu1 %1545 }
 0x6e3   : > { %7602 = vmatprep.subr.bf16.mxu0 %v11361_v40 }
 0x6e9   : > { %7593 = vmatmul.mubr.msk.bf16.vlgmr.msra.gmra.mxu0 %vm1585_vm0, %v9577_v13 }
 0x6ea   : > { %7603 = vmatpush3.bf16.xpose.msra.mxu0 %v9875_v44  ;;  %7604 = vmatprep.mubr.msk.bf16.mxu0 %vm8964_vm1, %v11361_v40  ;;  %v10239_v44 = vpop.permute.xlu1 %1549 }
 0x6eb   : > { %7614 = vmatprep.subr.bf16.mxu0 %v11361_v40 }
 0x6f1   : > { %7605 = vmatmul.mubr.msk.bf16.vlgmr.msra.gmra.mxu0 %vm1585_vm0, %v10223_v14 }
 0x6f2   : > { %7615 = vmatpush3.bf16.xpose.msra.mxu0 %v9884_v51  ;;  %7616 = vmatprep.mubr.msk.bf16.mxu0 %vm8964_vm1, %v11361_v40 }
 0x6f3   : > { %7626 = vmatprep.subr.bf16.mxu0 %v11361_v40 }
 0x6f9   : > { %7617 = vmatmul.mubr.msk.bf16.vlgmr.msra.gmra.mxu0 %vm1585_vm0, %v10231_v22 }
 0x6fa   : > { %7627 = vmatpush3.bf16.xpose.msra.mxu0 %v9893_v6  ;;  %7628 = vmatprep.mubr.msk.bf16.mxu0 %vm8964_vm1, %v11361_v40 }
 0x6fb   : > { %7638 = vmatprep.subr.bf16.mxu0 %v11361_v40 }
 0x701   : > { %7629 = vmatmul.mubr.msk.bf16.vlgmr.msra.gmra.mxu0 %vm1585_vm0, %v10239_v44 }
 0x702   : > { %7639 = vmatpush3.bf16.msra.mxu0 %v9573_v9  ;;  %7640 = vmatprep.mubr.msk.bf16.mxu0 %vm8964_vm1, %v11361_v40 }
 0x703   : > { %7650 = vmatprep.subr.bf16.mxu0 %v11361_v40 }
 0x739   : > { %v10247_v51 = vpop.f32.mrf.mxu1 }
 0x73a   : > { %11362 = vst [vmem:[#allocation52_spill] sm:$0xff] %v10247_v51 }
 0x73b   : > { %v7540_v6 = vpop.f32.mrf.mxu1 }
 0x73d   : > { %v10249_v0 = vpop.f32.mrf.mxu1 }
 0x73e   : > { %11363 = vst [vmem:[#allocation53_spill] sm:$0xff] %v10249_v0 }
 0x73f   : > { %v7541_v1 = vpop.f32.mrf.mxu1 }
 0x754   : > { %v10251_v25 = vpop.f32.mrf.mxu0 }
 0x755   : > { %11364 = vst [vmem:[#allocation54_spill] sm:$0xff] %v10251_v25 }
 0x756   : > { %v7546_v33 = vpop.f32.mrf.mxu0 }
 0x758   : > { %v10253_v8 = vpop.f32.mrf.mxu0 }
 0x759   : > { %11365 = vst [vmem:[#allocation55_spill] sm:$0xff] %v10253_v8  ;;  %v10255_v42 = vpop.f32.mrf.mxu1 }
 0x75a   : > { %v7547_v62 = vpop.f32.mrf.mxu0 }
 0x75b   : > { %v7552_v9 = vpop.f32.mrf.mxu1 }
 0x75d   : > { %v10257_v17 = vpop.f32.mrf.mxu1  ;;  %v10259_v28 = vpop.f32.mrf.mxu0 }
 0x75f   : > { %v7553_v60 = vpop.f32.mrf.mxu1  ;;  %v7558_v49 = vpop.f32.mrf.mxu0 }
 0x761   : > { %v10263_v32 = vpop.f32.mrf.mxu0  ;;  %v10265_v15 = vpop.f32.mrf.mxu1 }
 0x762   : > { %11366 = vst [vmem:[#allocation56_spill] sm:$0xff] %v10265_v15 }
 0x763   : > { %v7559_v20 = vpop.f32.mrf.mxu0  ;;  %v7564_v38 = vpop.f32.mrf.mxu1 }
 0x765   : > { %v10269_v7 = vpop.f32.mrf.mxu1  ;;  %v10271_v58 = vpop.f32.mrf.mxu0 }
 0x766   : > { %11367 = vst [vmem:[#allocation57_spill] sm:$0xff] %v10269_v7  ;;  %11368 = vst [vmem:[#allocation58_spill] sm:$0xff] %v10271_v58 }
 0x767   : > { %v7565_v56 = vpop.f32.mrf.mxu1  ;;  %v7570_v11 = vpop.f32.mrf.mxu0 }
 0x769   : > { %v10275_v52 = vpop.f32.mrf.mxu0  ;;  %v10277_v50 = vpop.f32.mrf.mxu1 }
 0x76a   : > { %11369 = vst [vmem:[#allocation59_spill] sm:$0xff] %v10275_v52  ;;  %11370 = vst [vmem:[#allocation60_spill] sm:$0xff] %v10277_v50 }
 0x76b   : > { %v7571_v5 = vpop.f32.mrf.mxu0  ;;  %v7576_v6 = vpop.f32.mrf.mxu1 }
 0x76d   : > { %v10281_v1 = vpop.f32.mrf.mxu1 }
 0x76e   : > { %11371 = vst [vmem:[#allocation61_spill] sm:$0xff] %v10281_v1 }
 0x76f   : > { %v7577_v62 = vpop.f32.mrf.mxu1 }
 0x771   : > { %v3456_v9 = vpop.f32.mrf.mxu1 }
 0x772   : > { %v10285_v60 = vmul.f32 0.17677669, %v3456_v9 }
 0x773   : > { %v7588_v49 = vpop.f32.mrf.mxu1 }
 0x774   : > { %v3787_v20 = vsel %vm1978_vm2, %v10285_v60, -inf }
 0x775   : > { %3788 = vmax.xlane.f32.xlu0 %v3787_v20  ;;  %v3459_v38 = vpop.f32.mrf.mxu1 }
 0x776   : > { %v10289_v56 = vmul.f32 0.17677669, %v3459_v38 }
 0x777   : > { %v7589_v11 = vpop.f32.mrf.mxu1 }
 0x778   : > { %v3790_v5 = vsel %vm1978_vm2, %v10289_v56, -inf }
 0x779   : > { %3791 = vmax.xlane.f32.xlu1 %v3790_v5  ;;  %v3544_v6 = vpop.f32.mrf.mxu1 }
 0x77a   : > { %v10309_v1 = vmul.f32 0.17677669, %v3544_v6 }
 0x77b   : > { %v7600_v48 = vpop.f32.mrf.mxu1 }
 0x77d   : > { %v3547_v33 = vpop.f32.mrf.mxu1 }
 0x77e   : > { %v10293_v62 = vmul.f32 0.17677669, %v3547_v33 }
 0x77f   : > { %v7601_v9 = vpop.f32.mrf.mxu1 }
 0x780   : > { %v3802_v49 = vsel %vm1978_vm2, %v10293_v62, -inf }
 0x781   : > { %3803 = vmax.xlane.f32.xlu1 %v3802_v49  ;;  %v3632_v29 = vpop.f32.mrf.mxu1 }
 0x783   : > { %v7612_v20 = vpop.f32.mrf.mxu1 }
 0x785   : > { %v3635_v61 = vpop.f32.mrf.mxu1 }
 0x786   : > { %v10321_v6 = vmul.f32 0.17677669, %v3635_v61 }
 0x787   : > { %v7613_v38 = vpop.f32.mrf.mxu1 }
 0x789   : > { %v3720_v2 = vpop.f32.mrf.mxu1 }
 0x78a   : > { %v10335_v39 = vmul.f32 0.17677669, %v3720_v2 }
 0x78b   : > { %v7624_v11 = vpop.f32.mrf.mxu1 }
 0x78d   : > { %v3723_v25 = vpop.f32.mrf.mxu1 }
 0x78f   : > { %v7625_v8 = vpop.f32.mrf.mxu1 }
 0x7a1   : > { %v10297_v51 = vpop.f32.mrf.mxu0 }
 0x7a2   : > { %11372 = vst [vmem:[#allocation62_spill] sm:$0xff] %v10297_v51 }
 0x7a3   : > { %v7582_v5 = vpop.f32.mrf.mxu0 }
 0x7a5   : > { %v10299_v48 = vpop.f32.mrf.mxu0 }
 0x7a6   : > { %11373 = vst [vmem:[#allocation63_spill] sm:$0xff] %v10299_v48  ;;  %v10319_v48 = vmul.f32 0.17677669, %v3632_v29  ;;  %v3814_v29 = vsel %vm1978_vm2, %v10321_v6, -inf }
 0x7a7   : > { %v7583_v9 = vpop.f32.mrf.mxu0 }
 0x7a9   : > { %v3500_v0 = vpop.f32.mrf.mxu0 }
 0x7aa   : > { %v10303_v50 = vmul.f32 0.17677669, %v3500_v0  ;;  %v3799_v0 = vsel %vm1978_vm2, %v10309_v1, -inf }
 0x7ab   : > { %v7594_v49 = vpop.f32.mrf.mxu0 }
 0x7ac   : > { %v3793_v20 = vsel %vm1978_vm2, %v10303_v50, -inf }
 0x7ad   : > { %3794 = vmax.xlane.f32.xlu0 %v3793_v20  ;;  %v3503_v38 = vpop.f32.mrf.mxu0 }
 0x7ae   : > { %v10307_v11 = vmul.f32 0.17677669, %v3503_v38 }
 0x7af   : > { %v7595_v8 = vpop.f32.mrf.mxu0 }
 0x7b0   : > { %v3796_v5 = vsel %vm1978_vm2, %v10307_v11, -inf }
 0x7b1   : > { %3797 = vmax.xlane.f32.xlu0 %v3796_v5  ;;  %v3588_v33 = vpop.f32.mrf.mxu0 }
 0x7b2   : > { %v10313_v51 = vmul.f32 0.17677669, %v3588_v33 }
 0x7b3   : > { %v7606_v9 = vpop.f32.mrf.mxu0 }
 0x7b4   : > { %v3805_v8 = vsel %vm1978_vm2, %v10313_v51, -inf }
 0x7b5   : > { %3800 = vmax.xlane.f32.xlu0 %v3799_v0  ;;  %v3591_v49 = vpop.f32.mrf.mxu0  ;;  %v3811_v0 = vsel %vm1978_vm2, %v10319_v48, -inf }
 0x7b6   : > { %v10317_v20 = vmul.f32 0.17677669, %v3591_v49 }
 0x7b7   : > { %v7607_v38 = vpop.f32.mrf.mxu0 }
 0x7b8   : > { %v3808_v5 = vsel %vm1978_vm2, %v10317_v20, -inf }
 0x7b9   : > { %3806 = vmax.xlane.f32.xlu0 %v3805_v8  ;;  %3809 = vmax.xlane.f32.xlu1 %v3808_v5  ;;  %v3676_v33 = vpop.f32.mrf.mxu0  ;;  %v10337_v8 = vmul.f32 0.17677669, %v3723_v25 }
 0x7ba   : > { %v10327_v16 = vmul.f32 0.17677669, %v3676_v33 }
 0x7bb   : > { %v7618_v9 = vpop.f32.mrf.mxu0  ;;  %v3826_v2 = vsel %vm1978_vm2, %v10337_v8, -inf }
 0x7bc   : > { %v3817_v5 = vsel %vm1978_vm2, %v10327_v16, -inf }
 0x7bd   : > { %3812 = vmax.xlane.f32.xlu0 %v3811_v0  ;;  %3815 = vmax.xlane.f32.xlu1 %v3814_v29  ;;  %v3679_v61 = vpop.f32.mrf.mxu0  ;;  %v3823_v29 = vsel %vm1978_vm2, %v10335_v39, -inf }
 0x7be   : > { %v10333_v49 = vmul.f32 0.17677669, %v3679_v61 }
 0x7bf   : > { %v7619_v38 = vpop.f32.mrf.mxu0 }
 0x7c0   : > { %v3820_v33 = vsel %vm1978_vm2, %v10333_v49, -inf }
 0x7c1   : > { %3818 = vmax.xlane.f32.xlu0 %v3817_v5  ;;  %3821 = vmax.xlane.f32.xlu1 %v3820_v33  ;;  %v3764_v9 = vpop.f32.mrf.mxu0 }
 0x7c2   : > { %v10343_v0 = vmul.f32 0.17677669, %v3764_v9 }
 0x7c3   : > { %v7630_v58 = vpop.f32.mrf.mxu0 }
 0x7c4   : > { %v3829_v5 = vsel %vm1978_vm2, %v10343_v0, -inf }
 0x7c5   : > { %3824 = vmax.xlane.f32.xlu0 %v3823_v29  ;;  %3827 = vmax.xlane.f32.xlu1 %v3826_v2  ;;  %v3767_v25 = vpop.f32.mrf.mxu0 }
 0x7c6   : > { %v10349_v61 = vmul.f32 0.17677669, %v3767_v25 }
 0x7c7   : > { %v7631_v38 = vpop.f32.mrf.mxu0 }
 0x7c8   : > { %v3832_v58 = vsel %vm1978_vm2, %v10349_v61, -inf }
 0x7c9   : > { %3830 = vmax.xlane.f32.xlu0 %v3829_v5  ;;  %3833 = vmax.xlane.f32.xlu1 %v3832_v58 }
 0x7fe   : > { %v3789_v33 = vpop.xlane.xlu0 %3788 }
 0x7ff   : > { %v3835_v9 = vsub.f32 %v10285_v60, %v3789_v33 }
 0x801   : > { %v3851_v52 = vmul.f32 1.442695, %v3835_v9 }
 0x802   : > { %v3792_v15 = vpop.xlane.xlu1 %3791 }
 0x803   : > { %8418 = vpow2.f32 %v3851_v52  ;;  %v3836_v29 = vsub.f32 %v10289_v56, %v3792_v15 }
 0x805   : > { %v3853_v2 = vmul.f32 1.442695, %v3836_v29 }
 0x807   : > { %8420 = vpow2.f32 %v3853_v2 }
 0x80a   : > { %v3804_v60 = vpop.xlane.xlu1 %3803 }
 0x80b   : > { %v3840_v15 = vsub.f32 %v10293_v62, %v3804_v60 }
 0x80d   : > { %v3861_v29 = vmul.f32 1.442695, %v3840_v15 }
 0x810   : > { %v10357_v25 = vpop.eup %8418 }
 0x811   : > { %v3883_v38 = vsel %vm1978_vm2, %v10357_v25, 0.0 }
 0x812   : > { %3884 = vadd.xlane.f32.xlu0 %v3883_v38 }
 0x814   : > { %v10361_v7 = vpop.eup %8420 }
 0x815   : > { %v3886_v5 = vsel %vm1978_vm2, %v10361_v7, 0.0 }
 0x816   : > { %3887 = vadd.xlane.f32.xlu1 %v3886_v5 }
 0x836   : > { %v3795_v58 = vpop.xlane.xlu0 %3794 }
 0x837   : > { %v3837_v52 = vsub.f32 %v10303_v50, %v3795_v58 }
 0x839   : > { %v3855_v56 = vmul.f32 1.442695, %v3837_v52 }
 0x83a   : > { %v3798_v33 = vpop.xlane.xlu0 %3797 }
 0x83b   : > { %8422 = vpow2.f32 %v3855_v56  ;;  %v3838_v9 = vsub.f32 %v10307_v11, %v3798_v33 }
 0x83d   : > { %v3857_v2 = vmul.f32 1.442695, %v3838_v9 }
 0x83e   : > { %v3801_v38 = vpop.xlane.xlu0 %3800 }
 0x83f   : > { %8424 = vpow2.f32 %v3857_v2  ;;  %v3839_v24 = vsub.f32 %v10309_v1, %v3801_v38 }
 0x840   : > { %8426 = vpow2.f32 %v3861_v29 }
 0x841   : > { %v3859_v3 = vmul.f32 1.442695, %v3839_v24 }
 0x842   : > { %v3807_v5 = vpop.xlane.xlu0 %3806  ;;  %v3810_v63 = vpop.xlane.xlu1 %3809 }
 0x843   : > { %8428 = vpow2.f32 %v3859_v3  ;;  %v3841_v50 = vsub.f32 %v10313_v51, %v3807_v5  ;;  %v3842_v62 = vsub.f32 %v10317_v20, %v3810_v63 }
 0x845   : > { %v3863_v60 = vmul.f32 1.442695, %v3841_v50  ;;  %v3865_v58 = vmul.f32 1.442695, %v3842_v62 }
 0x846   : > { %v3813_v52 = vpop.xlane.xlu0 %3812  ;;  %v3816_v56 = vpop.xlane.xlu1 %3815 }
 0x847   : > { %8430 = vpow2.f32 %v3863_v60  ;;  %v3843_v11 = vsub.f32 %v10319_v48, %v3813_v52  ;;  %v3844_v15 = vsub.f32 %v10321_v6, %v3816_v56 }
 0x848   : > { %v10373_v33 = vpop.eup %8422  ;;  %8432 = vpow2.f32 %v3865_v58 }
 0x849   : > { %v3867_v24 = vmul.f32 1.442695, %v3843_v11  ;;  %v3869_v1 = vmul.f32 1.442695, %v3844_v15  ;;  %v3889_v3 = vsel %vm1978_vm2, %v10373_v33, 0.0 }
 0x84a   : > { %v3819_v51 = vpop.xlane.xlu0 %3818  ;;  %v3822_v9 = vpop.xlane.xlu1 %3821  ;;  %3890 = vadd.xlane.f32.xlu0 %v3889_v3 }
 0x84b   : > { %8434 = vpow2.f32 %v3867_v24  ;;  %v3845_v63 = vsub.f32 %v10327_v16, %v3819_v51  ;;  %v3846_v20 = vsub.f32 %v10333_v49, %v3822_v9 }
 0x84c   : > { %v10379_v29 = vpop.eup %8424  ;;  %8436 = vpow2.f32 %v3869_v1 }
 0x84d   : > { %v3871_v48 = vmul.f32 1.442695, %v3845_v63  ;;  %v3873_v6 = vmul.f32 1.442695, %v3846_v20  ;;  %v3892_v2 = vsel %vm1978_vm2, %v10379_v29, 0.0  ;;  %v10383_v38 = vpop.eup %8426 }
 0x84e   : > { %v3825_v5 = vpop.xlane.xlu0 %3824  ;;  %v3828_v50 = vpop.xlane.xlu1 %3827  ;;  %3893 = vadd.xlane.f32.xlu1 %v3892_v2  ;;  %v3898_v56 = vsel %vm1978_vm2, %v10383_v38, 0.0 }
 0x84f   : > { %8438 = vpow2.f32 %v3871_v48  ;;  %v3847_v62 = vsub.f32 %v10335_v39, %v3825_v5  ;;  %v3848_v16 = vsub.f32 %v10337_v8, %v3828_v50 }
 0x850   : > { %v10387_v60 = vpop.eup %8428  ;;  %8440 = vpow2.f32 %v3873_v6 }
 0x851   : > { %v3875_v49 = vmul.f32 1.442695, %v3847_v62  ;;  %v3877_v58 = vmul.f32 1.442695, %v3848_v16  ;;  %v3895_v52 = vsel %vm1978_vm2, %v10387_v60, 0.0 }
 0x852   : > { %3896 = vadd.xlane.f32.xlu0 %v3895_v52  ;;  %v3831_v11 = vpop.xlane.xlu0 %3830  ;;  %3899 = vadd.xlane.f32.xlu1 %v3898_v56  ;;  %v3834_v15 = vpop.xlane.xlu1 %3833 }
 0x853   : > { %8442 = vpow2.f32 %v3875_v49  ;;  %v3849_v39 = vsub.f32 %v10343_v0, %v3831_v11  ;;  %v3850_v8 = vsub.f32 %v10349_v61, %v3834_v15 }
 0x854   : > { %v10395_v24 = vpop.eup %8430  ;;  %8444 = vpow2.f32 %v3877_v58 }
 0x855   : > { %v10397_v1 = vpop.eup %8432  ;;  %v3879_v3 = vmul.f32 1.442695, %v3849_v39  ;;  %v3881_v51 = vmul.f32 1.442695, %v3850_v8  ;;  %v3901_v9 = vsel %vm1978_vm2, %v10395_v24, 0.0 }
 0x856   : > { %3902 = vadd.xlane.f32.xlu0 %v3901_v9  ;;  %v3904_v63 = vsel %vm1978_vm2, %v10397_v1, 0.0 }
 0x857   : > { %8446 = vpow2.f32 %v3879_v3  ;;  %3905 = vadd.xlane.f32.xlu1 %v3904_v63 }
 0x858   : > { %v10403_v20 = vpop.eup %8434  ;;  %8448 = vpow2.f32 %v3881_v51 }
 0x859   : > { %v10405_v0 = vpop.eup %8436  ;;  %v3907_v61 = vsel %vm1978_vm2, %v10403_v20, 0.0 }
 0x85a   : > { %3908 = vadd.xlane.f32.xlu0 %v3907_v61  ;;  %v3910_v48 = vsel %vm1978_vm2, %v10405_v0, 0.0 }
 0x85b   : > { %3911 = vadd.xlane.f32.xlu1 %v3910_v48 }
 0x85c   : > { %v10411_v6 = vpop.eup %8438 }
 0x85d   : > { %v10413_v2 = vpop.eup %8440  ;;  %v3913_v5 = vsel %vm1978_vm2, %v10411_v6, 0.0 }
 0x85e   : > { %3914 = vadd.xlane.f32.xlu0 %v3913_v5  ;;  %v3916_v50 = vsel %vm1978_vm2, %v10413_v2, 0.0 }
 0x85f   : > { %3917 = vadd.xlane.f32.xlu1 %v3916_v50 }
 0x860   : > { %v10419_v62 = vpop.eup %8442 }
 0x861   : > { %v10421_v16 = vpop.eup %8444  ;;  %v3919_v49 = vsel %vm1978_vm2, %v10419_v62, 0.0 }
 0x862   : > { %3920 = vadd.xlane.f32.xlu0 %v3919_v49  ;;  %v3922_v58 = vsel %vm1978_vm2, %v10421_v16, 0.0 }
 0x863   : > { %3923 = vadd.xlane.f32.xlu1 %v3922_v58 }
 0x864   : > { %v10427_v52 = vpop.eup %8446 }
 0x865   : > { %v10429_v56 = vpop.eup %8448  ;;  %v3925_v11 = vsel %vm1978_vm2, %v10427_v52, 0.0 }
 0x866   : > { %3926 = vadd.xlane.f32.xlu0 %v3925_v11  ;;  %v3928_v15 = vsel %vm1978_vm2, %v10429_v56, 0.0 }
 0x867   : > { %3929 = vadd.xlane.f32.xlu1 %v3928_v15 }
 0x89b   : > { %v3885_v39 = vpop.xlane.xlu0 %3884 }
 0x89c   : > { %8450 = vrcp.f32 %v3885_v39 }
 0x89f   : > { %v3888_v8 = vpop.xlane.xlu1 %3887 }
 0x8a0   : > { %8452 = vrcp.f32 %v3888_v8 }
 0x8a9   : > { %v8451_v3 = vpop.eup %8450 }
 0x8aa   : > { %v3932_v9 = vmul.f32 %v8451_v3, %v10357_v25 }
 0x8ad   : > { %v8453_v51 = vpop.eup %8452 }
 0x8ae   : > { %v3934_v63 = vmul.f32 %v8453_v51, %v10361_v7 }
 0x8b0   : > { %v3963_v61 = vpack.c.bf16 %v3934_v63, %v3932_v9 }
 0x8b2   : > { %7635 = vmatmul.mubr.msk.bf16.vlgmr.msra.gmra.mxu1 %vm1978_vm2, %v3963_v61 }
 0x8b3   : > { %7645 = vmatpush3.bf16.msra.mxu1 %v10119_v31  ;;  %7646 = vmatprep.mubr.msk.bf16.mxu1 %vm8964_vm1, %v11361_v40 }
 0x8b4   : > { %7656 = vmatprep.subr.bf16.mxu1 %v11361_v40 }
 0x8d3   : > { %v3891_v48 = vpop.xlane.xlu0 %3890 }
 0x8d4   : > { %8454 = vrcp.f32 %v3891_v48 }
 0x8d7   : > { %v3894_v5 = vpop.xlane.xlu1 %3893 }
 0x8d8   : > { %8456 = vrcp.f32 %v3894_v5 }
 0x8db   : > { %v3897_v50 = vpop.xlane.xlu0 %3896  ;;  %v3900_v49 = vpop.xlane.xlu1 %3899 }
 0x8dc   : > { %8458 = vrcp.f32 %v3897_v50 }
 0x8dd   : > { %8460 = vrcp.f32 %v3900_v49 }
 0x8df   : > { %v3903_v25 = vpop.xlane.xlu0 %3902 }
 0x8e0   : > { %8462 = vrcp.f32 %v3903_v25  ;;  %v3906_v7 = vpop.xlane.xlu1 %3905 }
 0x8e1   : > { %8464 = vrcp.f32 %v3906_v7  ;;  %v8455_v58 = vpop.eup %8454 }
 0x8e2   : > { %v3936_v39 = vmul.f32 %v8455_v58, %v10373_v33 }
 0x8e3   : > { %v3909_v11 = vpop.xlane.xlu0 %3908 }
 0x8e4   : > { %8466 = vrcp.f32 %v3909_v11  ;;  %v3912_v31 = vpop.xlane.xlu1 %3911 }
 0x8e5   : > { %v8457_v15 = vpop.eup %8456  ;;  %8468 = vrcp.f32 %v3912_v31 }
 0x8e6   : > { %v3938_v8 = vmul.f32 %v8457_v15, %v10379_v29 }
 0x8e7   : > { %v3915_v3 = vpop.xlane.xlu0 %3914 }
 0x8e8   : > { %8470 = vrcp.f32 %v3915_v3  ;;  %v3918_v51 = vpop.xlane.xlu1 %3917  ;;  %v3964_v9 = vpack.c.bf16 %v3938_v8, %v3936_v39 }
 0x8e9   : > { %v8459_v63 = vpop.eup %8458  ;;  %8472 = vrcp.f32 %v3918_v51 }
 0x8ea   : > { %v8461_v61 = vpop.eup %8460  ;;  %7641 = vmatmul.mubr.msk.bf16.vlgmr.msra.gmra.mxu0 %vm1978_vm2, %v3964_v9  ;;  %v3940_v48 = vmul.f32 %v8459_v63, %v10387_v60 }
 0x8eb   : > { %7651 = vmatpush3.bf16.msra.mxu0 %v10100_v10  ;;  %v3921_v5 = vpop.xlane.xlu0 %3920  ;;  %v3942_v50 = vmul.f32 %v8461_v61, %v10383_v38  ;;  %7652 = vmatprep.mubr.msk.bf16.mxu0 %vm8964_vm1, %v11361_v40 }
 0x8ec   : > { %8474 = vrcp.f32 %v3921_v5  ;;  %v3924_v33 = vpop.xlane.xlu1 %3923  ;;  %7662 = vmatprep.subr.bf16.mxu0 %v11361_v40 }
 0x8ed   : > { %v8463_v29 = vpop.eup %8462  ;;  %8476 = vrcp.f32 %v3924_v33  ;;  %v3965_v49 = vpack.c.bf16 %v3942_v50, %v3940_v48 }
 0x8ee   : > { %v8465_v25 = vpop.eup %8464  ;;  %v3944_v7 = vmul.f32 %v8463_v29, %v10395_v24 }
 0x8ef   : > { %7647 = vmatmul.mubr.msk.bf16.vlgmr.msra.gmra.mxu1 %vm1978_vm2, %v3965_v49  ;;  %v3927_v60 = vpop.xlane.xlu0 %3926  ;;  %v3946_v10 = vmul.f32 %v8465_v25, %v10397_v1 }
 0x8f0   : > { %7657 = vmatpush3.bf16.msra.mxu1 %v10104_v36  ;;  %8478 = vrcp.f32 %v3927_v60  ;;  %v3930_v38 = vpop.xlane.xlu1 %3929  ;;  %7658 = vmatprep.mubr.msk.bf16.mxu1 %vm8964_vm1, %v11361_v40 }
 0x8f1   : > { %v8467_v58 = vpop.eup %8466  ;;  %8480 = vrcp.f32 %v3930_v38  ;;  %v3966_v11 = vpack.c.bf16 %v3946_v10, %v3944_v7  ;;  %7668 = vmatprep.subr.bf16.mxu1 %v11361_v40 }
 0x8f2   : > { %v8469_v31 = vpop.eup %8468  ;;  %v3948_v24 = vmul.f32 %v8467_v58, %v10403_v20 }
 0x8f3   : > { %7653 = vmatmul.mubr.msk.bf16.vlgmr.msra.gmra.mxu0 %vm1978_vm2, %v3966_v11  ;;  %v3950_v15 = vmul.f32 %v8469_v31, %v10405_v0 }
 0x8f4   : > { %7663 = vmatpush3.bf16.msra.mxu0 %v10123_v46  ;;  %7664 = vmatprep.mubr.msk.bf16.mxu0 %vm8964_vm1, %v11361_v40 }
 0x8f5   : > { %v8471_v36 = vpop.eup %8470  ;;  %v3967_v1 = vpack.c.bf16 %v3950_v15, %v3948_v24  ;;  %7674 = vmatprep.subr.bf16.mxu0 %v11361_v40 }
 0x8f6   : > { %v8473_v39 = vpop.eup %8472  ;;  %v3952_v8 = vmul.f32 %v8471_v36, %v10411_v6 }
 0x8f7   : > { %7659 = vmatmul.mubr.msk.bf16.vlgmr.msra.gmra.mxu1 %vm1978_vm2, %v3967_v1  ;;  %v3954_v20 = vmul.f32 %v8473_v39, %v10413_v2 }
 0x8f8   : > { %7669 = vmatpush3.bf16.msra.mxu1 %v10158_v37  ;;  %7670 = vmatprep.mubr.msk.bf16.mxu1 %vm8964_vm1, %v11361_v40 }
 0x8f9   : > { %v8475_v46 = vpop.eup %8474  ;;  %v3968_v0 = vpack.c.bf16 %v3954_v20, %v3952_v8  ;;  %7680 = vmatprep.subr.bf16.mxu1 %v11361_v40 }
 0x8fa   : > { %v8477_v3 = vpop.eup %8476  ;;  %v3956_v51 = vmul.f32 %v8475_v46, %v10419_v62 }
 0x8fb   : > { %7665 = vmatmul.mubr.msk.bf16.vlgmr.msra.gmra.mxu0 %vm1978_vm2, %v3968_v0  ;;  %v3958_v6 = vmul.f32 %v8477_v3, %v10421_v16 }
 0x8fc   : > { %7675 = vmatpush3.bf16.msra.mxu0 %v10206_v59  ;;  %7676 = vmatprep.mubr.msk.bf16.mxu0 %vm8964_vm1, %v11361_v40 }
 0x8fd   : > { %v8479_v37 = vpop.eup %8478  ;;  %v3969_v2 = vpack.c.bf16 %v3958_v6, %v3956_v51  ;;  %7686 = vmatprep.subr.bf16.mxu0 %v11361_v40 }
 0x8fe   : > { %v8481_v9 = vpop.eup %8480  ;;  %v3960_v63 = vmul.f32 %v8479_v37, %v10427_v52 }
 0x8ff   : > { %v3962_v61 = vmul.f32 %v8481_v9, %v10429_v56  ;;  %7671 = vmatmul.mubr.msk.bf16.vlgmr.msra.gmra.mxu1 %vm1978_vm2, %v3969_v2 }
 0x900   : > { %7681 = vmatpush3.bf16.xpose.msra.mxu1 %v9452_v18  ;;  %7682 = vmatprep.mubr.msk.bf16.mxu1 %vm8964_vm1, %v11361_v40 }
 0x901   : > { %v3970_v59 = vpack.c.bf16 %v3962_v61, %v3960_v63  ;;  %7692 = vmatprep.subr.bf16.mxu1 %v11361_v40 }
 0x903   : > { %7677 = vmatmul.mubr.msk.bf16.vlgmr.msra.gmra.mxu0 %vm1978_vm2, %v3970_v59 }
 0x904   : > { %7687 = vmatpush3.bf16.xpose.msra.mxu0 %v9465_v21  ;;  %7688 = vmatprep.mubr.msk.bf16.mxu0 %vm8964_vm1, %v11361_v40 }
 0x905   : > { %7698 = vmatprep.subr.bf16.mxu0 %v11361_v40 }
 0x907   : > { %7683 = vmatmul.mubr.msk.bf16.vlgmr.msra.gmra.mxu1 %vm1585_vm0, %v9567_v4 }
 0x908   : > { %7693 = vmatpush3.bf16.xpose.msra.mxu1 %v9476_v23  ;;  %7694 = vmatprep.mubr.msk.bf16.mxu1 %vm8964_vm1, %v11361_v40 }
 0x909   : > { %7704 = vmatprep.subr.bf16.mxu1 %v11361_v40 }
 0x90b   : > { %7689 = vmatmul.mubr.msk.bf16.vlgmr.msra.gmra.mxu0 %vm1585_vm0, %v9577_v13 }
 0x90c   : > { %7699 = vmatpush3.bf16.xpose.msra.mxu0 %v9483_v26  ;;  %7700 = vmatprep.mubr.msk.bf16.mxu0 %vm8964_vm1, %v11361_v40 }
 0x90d   : > { %7710 = vmatprep.subr.bf16.mxu0 %v11361_v40 }
 0x90f   : > { %7695 = vmatmul.mubr.msk.bf16.vlgmr.msra.gmra.mxu1 %vm1585_vm0, %v10182_v19 }
 0x910   : > { %7705 = vmatpush3.bf16.xpose.msra.mxu1 %v9494_v30  ;;  %7706 = vmatprep.mubr.msk.bf16.mxu1 %vm8964_vm1, %v11361_v40 }
 0x911   : > { %7716 = vmatprep.subr.bf16.mxu1 %v11361_v40 }
 0x913   : > { %7701 = vmatmul.mubr.msk.bf16.vlgmr.msra.gmra.mxu0 %vm1585_vm0, %v10223_v14 }
 0x914   : > { %7711 = vmatpush3.bf16.xpose.msra.mxu0 %v9501_v34  ;;  %7712 = vmatprep.mubr.msk.bf16.mxu0 %vm8964_vm1, %v11361_v40 }
 0x915   : > { %7722 = vmatprep.subr.bf16.mxu0 %v11361_v40 }
 0x917   : > { %7707 = vmatmul.mubr.msk.bf16.vlgmr.msra.gmra.mxu1 %vm1585_vm0, %v10190_v12 }
 0x918   : > { %7717 = vmatpush3.bf16.xpose.msra.mxu1 %v9511_v41  ;;  %7718 = vmatprep.mubr.msk.bf16.mxu1 %vm8964_vm1, %v11361_v40 }
 0x919   : > { %7728 = vmatprep.subr.bf16.mxu1 %v11361_v40 }
 0x91b   : > { %7713 = vmatmul.mubr.msk.bf16.vlgmr.msra.gmra.mxu0 %vm1585_vm0, %v10231_v22 }
 0x91c   : > { %7723 = vmatpush3.bf16.xpose.msra.mxu0 %v9523_v45  ;;  %7724 = vmatprep.mubr.msk.bf16.mxu0 %vm8964_vm1, %v11361_v40 }
 0x91d   : > { %7734 = vmatprep.subr.bf16.mxu0 %v11361_v40 }
 0x91f   : > { %7719 = vmatmul.mubr.msk.bf16.vlgmr.msra.gmra.mxu1 %vm1585_vm0, %v10198_v47 }
 0x920   : > { %7729 = vmatpush3.bf16.msra.mxu1 %v9539_v54  ;;  %7730 = vmatprep.mubr.msk.bf16.mxu1 %vm8964_vm1, %v11361_v40 }
 0x921   : > { %7740 = vmatprep.subr.bf16.mxu1 %v11361_v40 }
 0x923   : > { %7725 = vmatmul.mubr.msk.bf16.vlgmr.msra.gmra.mxu0 %vm1585_vm0, %v10239_v44 }
 0x924   : > { %7735 = vmatpush3.bf16.msra.mxu0 %v9535_v53  ;;  %7736 = vmatprep.mubr.msk.bf16.mxu0 %vm8964_vm1, %v11361_v40 }
 0x925   : > { %7746 = vmatprep.subr.bf16.mxu0 %v11361_v40 }
 0x972   : > { %v10539_v18 = vpop.f32.mrf.mxu1 }
 0x974   : > { %v7636_v21 = vpop.f32.mrf.mxu1 }
 0x976   : > { %v10541_v23 = vpop.f32.mrf.mxu1 }
 0x978   : > { %v7637_v26 = vpop.f32.mrf.mxu1 }
 0x9aa   : > { %v10543_v30 = vpop.f32.mrf.mxu0 }
 0x9ac   : > { %v7642_v34 = vpop.f32.mrf.mxu0 }
 0x9ae   : > { %v10545_v41 = vpop.f32.mrf.mxu0 }
 0x9af   : > { %v10547_v45 = vpop.f32.mrf.mxu1 }
 0x9b0   : > { %v7643_v54 = vpop.f32.mrf.mxu0 }
 0x9b1   : > { %v7648_v53 = vpop.f32.mrf.mxu1 }
 0x9b3   : > { %v10549_v4 = vpop.f32.mrf.mxu1  ;;  %v10551_v13 = vpop.f32.mrf.mxu0 }
 0x9b4   : > { %v8108_v19 = vpack.i.bf16 %v10549_v4, %v10547_v45 }
 0x9b5   : > { %v7649_v12 = vpop.f32.mrf.mxu1  ;;  %v7654_v47 = vpop.f32.mrf.mxu0 }
 0x9b7   : > { %v10555_v14 = vpop.f32.mrf.mxu0  ;;  %v10557_v22 = vpop.f32.mrf.mxu1 }
 0x9b8   : > { %v8113_v44 = vpack.i.bf16 %v10555_v14, %v10551_v13 }
 0x9b9   : > { %v7655_v62 = vpop.f32.mrf.mxu0  ;;  %v7660_v16 = vpop.f32.mrf.mxu1 }
 0x9bb   : > { %v10561_v52 = vpop.f32.mrf.mxu1  ;;  %v10563_v56 = vpop.f32.mrf.mxu0 }
 0x9bc   : > { %v8118_v48 = vpack.i.bf16 %v10561_v52, %v10557_v22 }
 0x9bd   : > { %v7661_v5 = vpop.f32.mrf.mxu1  ;;  %v7666_v50 = vpop.f32.mrf.mxu0 }
 0x9bf   : > { %v10567_v33 = vpop.f32.mrf.mxu0  ;;  %v10569_v29 = vpop.f32.mrf.mxu1 }
 0x9c0   : > { %v8123_v49 = vpack.i.bf16 %v10567_v33, %v10563_v56 }
 0x9c1   : > { %v7667_v25 = vpop.f32.mrf.mxu0  ;;  %v7672_v7 = vpop.f32.mrf.mxu1 }
 0x9c3   : > { %v10573_v60 = vpop.f32.mrf.mxu1  ;;  %v10575_v10 = vpop.f32.mrf.mxu0 }
 0x9c4   : > { %v8128_v38 = vpack.i.bf16 %v10573_v60, %v10569_v29 }
 0x9c5   : > { %v7673_v58 = vpop.f32.mrf.mxu1  ;;  %v7678_v11 = vpop.f32.mrf.mxu0 }
 0x9c7   : > { %v10579_v31 = vpop.f32.mrf.mxu0  ;;  %v4357_v24 = vpop.f32.mrf.mxu1 }
 0x9c8   : > { %v8133_v15 = vpack.i.bf16 %v10579_v31, %v10575_v10  ;;  %v10583_v36 = vmul.f32 0.17677669, %v4357_v24 }
 0x9c9   : > { %v7679_v1 = vpop.f32.mrf.mxu0  ;;  %v7684_v39 = vpop.f32.mrf.mxu1 }
 0x9ca   : > { %v4667_v8 = vsel %vm1978_vm2, %v10583_v36, -inf }
 0x9cb   : > { %4668 = vmax.xlane.f32.xlu0 %v4667_v8  ;;  %v4360_v20 = vpop.f32.mrf.mxu1  ;;  %v4398_v46 = vpop.f32.mrf.mxu0 }
 0x9cc   : > { %v10587_v0 = vmul.f32 0.17677669, %v4360_v20  ;;  %v10589_v3 = vmul.f32 0.17677669, %v4398_v46 }
 0x9cd   : > { %v7685_v51 = vpop.f32.mrf.mxu1  ;;  %v7690_v6 = vpop.f32.mrf.mxu0 }
 0x9ce   : > { %v4670_v37 = vsel %vm1978_vm2, %v10587_v0, -inf  ;;  %v4673_v2 = vsel %vm1978_vm2, %v10589_v3, -inf }
 0x9cf   : > { %4671 = vmax.xlane.f32.xlu1 %v4670_v37  ;;  %v4439_v9 = vpop.f32.mrf.mxu1  ;;  %4674 = vmax.xlane.f32.xlu0 %v4673_v2  ;;  %v4401_v63 = vpop.f32.mrf.mxu0 }
 0x9d0   : > { %v10595_v61 = vmul.f32 0.17677669, %v4439_v9  ;;  %v10597_v59 = vmul.f32 0.17677669, %v4401_v63 }
 0x9d1   : > { %v7691_v21 = vpop.f32.mrf.mxu0  ;;  %v7696_v26 = vpop.f32.mrf.mxu1 }
 0x9d2   : > { %v4679_v34 = vsel %vm1978_vm2, %v10595_v61, -inf  ;;  %v4676_v54 = vsel %vm1978_vm2, %v10597_v59, -inf }
 0x9d3   : > { %v4442_v53 = vpop.f32.mrf.mxu1  ;;  %4680 = vmax.xlane.f32.xlu0 %v4679_v34  ;;  %4677 = vmax.xlane.f32.xlu1 %v4676_v54  ;;  %v4480_v12 = vpop.f32.mrf.mxu0 }
 0x9d4   : > { %v10603_v47 = vmul.f32 0.17677669, %v4442_v53  ;;  %v10605_v62 = vmul.f32 0.17677669, %v4480_v12 }
 0x9d5   : > { %v7697_v16 = vpop.f32.mrf.mxu1  ;;  %v7702_v5 = vpop.f32.mrf.mxu0 }
 0x9d6   : > { %v4682_v50 = vsel %vm1978_vm2, %v10603_v47, -inf  ;;  %v4685_v25 = vsel %vm1978_vm2, %v10605_v62, -inf }
 0x9d7   : > { %v4521_v7 = vpop.f32.mrf.mxu1  ;;  %4683 = vmax.xlane.f32.xlu1 %v4682_v50  ;;  %4686 = vmax.xlane.f32.xlu0 %v4685_v25  ;;  %v4483_v58 = vpop.f32.mrf.mxu0 }
 0x9d8   : > { %v10611_v11 = vmul.f32 0.17677669, %v4521_v7  ;;  %v10613_v24 = vmul.f32 0.17677669, %v4483_v58 }
 0x9d9   : > { %v7703_v1 = vpop.f32.mrf.mxu0  ;;  %v7708_v39 = vpop.f32.mrf.mxu1 }
 0x9da   : > { %v4691_v8 = vsel %vm1978_vm2, %v10611_v11, -inf  ;;  %v4688_v20 = vsel %vm1978_vm2, %v10613_v24, -inf }
 0x9db   : > { %v4524_v46 = vpop.f32.mrf.mxu1  ;;  %4692 = vmax.xlane.f32.xlu0 %v4691_v8  ;;  %4689 = vmax.xlane.f32.xlu1 %v4688_v20  ;;  %v4562_v51 = vpop.f32.mrf.mxu0 }
 0x9dc   : > { %v10619_v6 = vmul.f32 0.17677669, %v4524_v46  ;;  %v10621_v37 = vmul.f32 0.17677669, %v4562_v51 }
 0x9dd   : > { %v7709_v2 = vpop.f32.mrf.mxu1  ;;  %v7714_v9 = vpop.f32.mrf.mxu0 }
 0x9de   : > { %v4694_v63 = vsel %vm1978_vm2, %v10619_v6, -inf  ;;  %v4697_v21 = vsel %vm1978_vm2, %v10621_v37, -inf }
 0x9df   : > { %v4603_v26 = vpop.f32.mrf.mxu1  ;;  %4695 = vmax.xlane.f32.xlu1 %v4694_v63  ;;  %4698 = vmax.xlane.f32.xlu0 %v4697_v21  ;;  %v4565_v34 = vpop.f32.mrf.mxu0 }
 0x9e0   : > { %v10627_v54 = vmul.f32 0.17677669, %v4603_v26  ;;  %v10629_v53 = vmul.f32 0.17677669, %v4565_v34 }
 0x9e1   : > { %v7715_v12 = vpop.f32.mrf.mxu0  ;;  %v7720_v16 = vpop.f32.mrf.mxu1 }
 0x9e2   : > { %v4703_v5 = vsel %vm1978_vm2, %v10627_v54, -inf  ;;  %v4700_v50 = vsel %vm1978_vm2, %v10629_v53, -inf }
 0x9e3   : > { %v4606_v25 = vpop.f32.mrf.mxu1  ;;  %4704 = vmax.xlane.f32.xlu0 %v4703_v5  ;;  %4701 = vmax.xlane.f32.xlu1 %v4700_v50  ;;  %v4644_v7 = vpop.f32.mrf.mxu0 }
 0x9e4   : > { %v10635_v58 = vmul.f32 0.17677669, %v4606_v25  ;;  %v10637_v1 = vmul.f32 0.17677669, %v4644_v7 }
 0x9e5   : > { %v7721_v39 = vpop.f32.mrf.mxu1  ;;  %v7726_v8 = vpop.f32.mrf.mxu0 }
 0x9e6   : > { %v4706_v20 = vsel %vm1978_vm2, %v10635_v58, -inf  ;;  %v4709_v46 = vsel %vm1978_vm2, %v10637_v1, -inf }
 0x9e7   : > { %4707 = vmax.xlane.f32.xlu1 %v4706_v20  ;;  %4710 = vmax.xlane.f32.xlu0 %v4709_v46  ;;  %v4647_v51 = vpop.f32.mrf.mxu0 }
 0x9e8   : > { %v10643_v2 = vmul.f32 0.17677669, %v4647_v51 }
 0x9e9   : > { %v7727_v9 = vpop.f32.mrf.mxu0 }
 0x9ea   : > { %v4712_v63 = vsel %vm1978_vm2, %v10643_v2, -inf }
 0x9eb   : > { %4713 = vmax.xlane.f32.xlu1 %v4712_v63 }
 0xa54   : > { %v4669_v21 = vpop.xlane.xlu0 %4668 }
 0xa55   : > { %v4715_v26 = vsub.f32 %v10583_v36, %v4669_v21 }
 0xa57   : > { %v4731_v34 = vmul.f32 1.442695, %v4715_v26 }
 0xa58   : > { %v4672_v12 = vpop.xlane.xlu1 %4671  ;;  %v4675_v16 = vpop.xlane.xlu0 %4674 }
 0xa59   : > { %8482 = vpow2.f32 %v4731_v34  ;;  %v4716_v5 = vsub.f32 %v10587_v0, %v4672_v12  ;;  %v4717_v50 = vsub.f32 %v10589_v3, %v4675_v16 }
 0xa5b   : > { %v4733_v25 = vmul.f32 1.442695, %v4716_v5  ;;  %v4735_v7 = vmul.f32 1.442695, %v4717_v50 }
 0xa5c   : > { %v4681_v39 = vpop.xlane.xlu0 %4680  ;;  %v4678_v8 = vpop.xlane.xlu1 %4677 }
 0xa5d   : > { %8484 = vpow2.f32 %v4733_v25  ;;  %v4719_v20 = vsub.f32 %v10595_v61, %v4681_v39  ;;  %v4718_v46 = vsub.f32 %v10597_v59, %v4678_v8 }
 0xa5e   : > { %8486 = vpow2.f32 %v4735_v7 }
 0xa5f   : > { %v4739_v51 = vmul.f32 1.442695, %v4719_v20  ;;  %v4737_v36 = vmul.f32 1.442695, %v4718_v46 }
 0xa60   : > { %v4684_v9 = vpop.xlane.xlu1 %4683  ;;  %v4687_v63 = vpop.xlane.xlu0 %4686 }
 0xa61   : > { %8488 = vpow2.f32 %v4739_v51  ;;  %v4720_v21 = vsub.f32 %v10603_v47, %v4684_v9  ;;  %v4721_v0 = vsub.f32 %v10605_v62, %v4687_v63 }
 0xa62   : > { %8490 = vpow2.f32 %v4737_v36 }
 0xa63   : > { %v4741_v3 = vmul.f32 1.442695, %v4720_v21  ;;  %v4743_v26 = vmul.f32 1.442695, %v4721_v0 }
 0xa64   : > { %v4693_v34 = vpop.xlane.xlu0 %4692  ;;  %v4690_v12 = vpop.xlane.xlu1 %4689 }
 0xa65   : > { %8492 = vpow2.f32 %v4741_v3  ;;  %v4723_v61 = vsub.f32 %v10611_v11, %v4693_v34  ;;  %v4722_v59 = vsub.f32 %v10613_v24, %v4690_v12 }
 0xa66   : > { %v10656_v16 = vpop.eup %8482  ;;  %8494 = vpow2.f32 %v4743_v26 }
 0xa67   : > { %v4747_v5 = vmul.f32 1.442695, %v4723_v61  ;;  %v4745_v50 = vmul.f32 1.442695, %v4722_v59  ;;  %v4763_v47 = vsel %vm1978_vm2, %v10656_v16, 0.0 }
 0xa68   : > { %v4696_v25 = vpop.xlane.xlu1 %4695  ;;  %v4699_v62 = vpop.xlane.xlu0 %4698  ;;  %4764 = vadd.xlane.f32.xlu0 %v4763_v47 }
 0xa69   : > { %8496 = vpow2.f32 %v4747_v5  ;;  %v4724_v7 = vsub.f32 %v10619_v6, %v4696_v25  ;;  %v4725_v39 = vsub.f32 %v10621_v37, %v4699_v62 }
 0xa6a   : > { %v10662_v8 = vpop.eup %8484  ;;  %8498 = vpow2.f32 %v4745_v50 }
 0xa6b   : > { %v10664_v11 = vpop.eup %8486  ;;  %v4749_v24 = vmul.f32 1.442695, %v4724_v7  ;;  %v4751_v20 = vmul.f32 1.442695, %v4725_v39  ;;  %v4766_v46 = vsel %vm1978_vm2, %v10662_v8, 0.0 }
 0xa6c   : > { %v4705_v51 = vpop.xlane.xlu0 %4704  ;;  %v4702_v36 = vpop.xlane.xlu1 %4701  ;;  %v4769_v9 = vsel %vm1978_vm2, %v10664_v11, 0.0  ;;  %4767 = vadd.xlane.f32.xlu1 %v4766_v46 }
 0xa6d   : > { %8500 = vpow2.f32 %v4749_v24  ;;  %v4727_v6 = vsub.f32 %v10627_v54, %v4705_v51  ;;  %v4726_v37 = vsub.f32 %v10629_v53, %v4702_v36  ;;  %4770 = vadd.xlane.f32.xlu0 %v4769_v9 }
 0xa6e   : > { %v10672_v63 = vpop.eup %8488  ;;  %8502 = vpow2.f32 %v4751_v20 }
 0xa6f   : > { %v10674_v21 = vpop.eup %8490  ;;  %v4755_v0 = vmul.f32 1.442695, %v4727_v6  ;;  %v4753_v3 = vmul.f32 1.442695, %v4726_v37  ;;  %v4775_v26 = vsel %vm1978_vm2, %v10672_v63, 0.0 }
 0xa70   : > { %v4708_v34 = vpop.xlane.xlu1 %4707  ;;  %v4711_v12 = vpop.xlane.xlu0 %4710  ;;  %v4772_v61 = vsel %vm1978_vm2, %v10674_v21, 0.0 }
 0xa71   : > { %8504 = vpow2.f32 %v4755_v0  ;;  %v4728_v54 = vsub.f32 %v10635_v58, %v4708_v34  ;;  %4776 = vadd.xlane.f32.xlu0 %v4775_v26  ;;  %v4729_v53 = vsub.f32 %v10637_v1, %v4711_v12  ;;  %4773 = vadd.xlane.f32.xlu1 %v4772_v61 }
 0xa72   : > { %v10682_v59 = vpop.eup %8492  ;;  %8506 = vpow2.f32 %v4753_v3 }
 0xa73   : > { %v10684_v5 = vpop.eup %8494  ;;  %v4757_v50 = vmul.f32 1.442695, %v4728_v54  ;;  %v4759_v47 = vmul.f32 1.442695, %v4729_v53  ;;  %v4778_v25 = vsel %vm1978_vm2, %v10682_v59, 0.0 }
 0xa74   : > { %v4781_v62 = vsel %vm1978_vm2, %v10684_v5, 0.0  ;;  %v4714_v7 = vpop.xlane.xlu1 %4713 }
 0xa75   : > { %8508 = vpow2.f32 %v4757_v50  ;;  %4782 = vadd.xlane.f32.xlu0 %v4781_v62  ;;  %4779 = vadd.xlane.f32.xlu1 %v4778_v25  ;;  %v4730_v58 = vsub.f32 %v10643_v2, %v4714_v7  ;;  %v11374_v50 = vpack.i.bf16 %v10257_v17, %v10255_v42  ;;  %v11376_v25 = vpack.i.bf16 %v9923_v35, %v9921_v57  ;;  %v11378_v7 = vld [vmem:[#allocation45_spill] sm:$0xff]  ;;  %v11380_v17 = vld [vmem:[#allocation47_spill] sm:$0xff] }
 0xa76   : > { %v10691_v1 = vpop.eup %8496  ;;  %8510 = vpow2.f32 %v4759_v47  ;;  %v11375_v47 = vpack.i.bf16 %v9917_v43, %v9915_v55  ;;  %v11377_v62 = vpack.i.bf16 %v10263_v32, %v10259_v28  ;;  %v11379_v42 = vpack.i.bf16 %v9929_v27, %v11378_v7  ;;  %v11383_v43 = vld [vmem:[#allocation57_spill] sm:$0xff]  ;;  %v11386_v35 = vld [vmem:[#allocation59_spill] sm:$0xff] }
 0xa77   : > { %v10693_v39 = vpop.eup %8498  ;;  %v4761_v24 = vmul.f32 1.442695, %v4730_v58  ;;  %v4787_v20 = vsel %vm1978_vm2, %v10691_v1, 0.0  ;;  %v11381_v58 = vld [vmem:[#allocation46_spill] sm:$0xff]  ;;  %v11389_v32 = vld [vmem:[#allocation49_spill] sm:$0xff] }
 0xa78   : > { %v4784_v46 = vsel %vm1978_vm2, %v10693_v39, 0.0  ;;  %v11382_v55 = vpack.i.bf16 %v11380_v17, %v11381_v58 }
 0xa79   : > { %8512 = vpow2.f32 %v4761_v24  ;;  %4788 = vadd.xlane.f32.xlu0 %v4787_v20  ;;  %4785 = vadd.xlane.f32.xlu1 %v4784_v46  ;;  %v11384_v24 = vld [vmem:[#allocation56_spill] sm:$0xff]  ;;  %v11387_v20 = vld [vmem:[#allocation58_spill] sm:$0xff] }
 0xa7a   : > { %v10699_v51 = vpop.eup %8500  ;;  %v11385_v57 = vpack.i.bf16 %v11383_v43, %v11384_v24  ;;  %v11388_v28 = vpack.i.bf16 %v11386_v35, %v11387_v20  ;;  %v11390_v46 = vld [vmem:[#allocation48_spill] sm:$0xff] }
 0xa7b   : > { %v10701_v36 = vpop.eup %8502  ;;  %v4790_v2 = vsel %vm1978_vm2, %v10699_v51, 0.0  ;;  %v11391_v27 = vpack.i.bf16 %v11389_v32, %v11390_v46 }
 0xa7c   : > { %v4793_v9 = vsel %vm1978_vm2, %v10701_v36, 0.0 }
 0xa7d   : > { %4794 = vadd.xlane.f32.xlu0 %v4793_v9  ;;  %4791 = vadd.xlane.f32.xlu1 %v4790_v2  ;;  %v11392_v2 = vld [vmem:[#allocation51_spill] sm:$0xff]  ;;  %v11393_v9 = vld [vmem:[#allocation50_spill] sm:$0xff] }
 0xa7e   : > { %v10707_v6 = vpop.eup %8504 }
 0xa7f   : > { %v10709_v37 = vpop.eup %8506  ;;  %v4799_v0 = vsel %vm1978_vm2, %v10707_v6, 0.0 }
 0xa80   : > { %v4796_v3 = vsel %vm1978_vm2, %v10709_v37, 0.0 }
 0xa81   : > { %4800 = vadd.xlane.f32.xlu0 %v4799_v0  ;;  %4797 = vadd.xlane.f32.xlu1 %v4796_v3  ;;  %v11394_v0 = vpack.i.bf16 %v11392_v2, %v11393_v9  ;;  %v11395_v3 = vld [vmem:[#allocation61_spill] sm:$0xff] }
 0xa82   : > { %v10715_v26 = vpop.eup %8508 }
 0xa83   : > { %v10717_v34 = vpop.eup %8510  ;;  %v4802_v12 = vsel %vm1978_vm2, %v10715_v26, 0.0 }
 0xa84   : > { %v4805_v61 = vsel %vm1978_vm2, %v10717_v34, 0.0 }
 0xa85   : > { %4806 = vadd.xlane.f32.xlu0 %v4805_v61  ;;  %4803 = vadd.xlane.f32.xlu1 %v4802_v12  ;;  %v11396_v12 = vld [vmem:[#allocation60_spill] sm:$0xff] }
 0xa86   : > { %v10723_v54 = vpop.eup %8512  ;;  %v11397_v61 = vpack.i.bf16 %v11395_v3, %v11396_v12 }
 0xa87   : > { %v4808_v53 = vsel %vm1978_vm2, %v10723_v54, 0.0 }
 0xa89   : > { %4809 = vadd.xlane.f32.xlu1 %v4808_v53  ;;  %v11398_v53 = vld [vmem:[#allocation63_spill] sm:$0xff] }
 0xa9a   : > { %8024 = vrot.lane.b32.xlu1 %v11374_v50, %s8963_s7  ;;  %v11399_v50 = vld [vmem:[#allocation62_spill] sm:$0xff] }
 0xa9b   : > { %8019 = vrot.lane.b32.xlu0 %v11375_v47, %s8963_s7  ;;  %v11400_v47 = vpack.i.bf16 %v11398_v53, %v11399_v50 }
 0xa9e   : > { %8029 = vrot.lane.b32.xlu1 %v11376_v25, %s8963_s7 }
 0xa9f   : > { %8039 = vrot.lane.b32.xlu0 %v11377_v62, %s8963_s7 }
 0xaa2   : > { %8034 = vrot.lane.b32.xlu1 %v11379_v42, %s8962_s18 }
 0xaa3   : > { %8049 = vrot.lane.b32.xlu0 %v11382_v55, %s8962_s18 }
 0xaa6   : > { %8044 = vrot.lane.b32.xlu1 %v11385_v57, %s8962_s18 }
 0xaa7   : > { %8059 = vrot.lane.b32.xlu0 %v11388_v28, %s8962_s18 }
 0xaaa   : > { %8054 = vrot.lane.b32.xlu1 %v11391_v27, %s8961_s4 }
 0xaab   : > { %8069 = vrot.lane.b32.xlu0 %v11394_v0, %s8961_s4  ;;  %v11401_v0 = vld [vmem:[#allocation37_spill] sm:$0xff] }
 0xaae   : > { %8064 = vrot.lane.b32.xlu1 %v11397_v61, %s8961_s4 }
 0xab2   : > { %8074 = vrot.lane.b32.xlu1 %v11400_v47, %s8961_s4 }
 0xaf1   : > { %v4765_v25 = vpop.xlane.xlu0 %4764 }
 0xaf2   : > { %8514 = vrcp.f32 %v4765_v25 }
 0xaf5   : > { %v4768_v62 = vpop.xlane.xlu1 %4767 }
 0xaf6   : > { %v4771_v7 = vpop.xlane.xlu0 %4770  ;;  %8516 = vrcp.f32 %v4768_v62 }
 0xaf7   : > { %8518 = vrcp.f32 %v4771_v7 }
 0xafa   : > { %v4777_v42 = vpop.xlane.xlu0 %4776  ;;  %v4774_v17 = vpop.xlane.xlu1 %4773 }
 0xafb   : > { %8520 = vrcp.f32 %v4774_v17 }
 0xafc   : > { %8522 = vrcp.f32 %v4777_v42 }
 0xafe   : > { %v4783_v58 = vpop.xlane.xlu0 %4782  ;;  %v4780_v55 = vpop.xlane.xlu1 %4779 }
 0xaff   : > { %8524 = vrcp.f32 %v4780_v55  ;;  %v8515_v43 = vpop.eup %8514 }
 0xb00   : > { %8526 = vrcp.f32 %v4783_v58  ;;  %v4812_v20 = vmul.f32 %v8515_v43, %v10656_v16  ;;  %v11403_v43 = vld [vmem:[#allocation36_spill] sm:$0xff] }
 0xb02   : > { %v4789_v24 = vpop.xlane.xlu0 %4788  ;;  %v4786_v57 = vpop.xlane.xlu1 %4785 }
 0xb03   : > { %v8517_v35 = vpop.eup %8516  ;;  %8528 = vrcp.f32 %v4786_v57 }
 0xb04   : > { %v4814_v28 = vmul.f32 %v8517_v35, %v10662_v8  ;;  %8530 = vrcp.f32 %v4789_v24  ;;  %v8519_v2 = vpop.eup %8518 }
 0xb05   : > { %v4816_v3 = vmul.f32 %v8519_v2, %v10664_v11 }
 0xb06   : > { %v4843_v32 = vpack.c.bf16 %v4814_v28, %v4812_v20  ;;  %v4795_v46 = vpop.xlane.xlu0 %4794  ;;  %v4792_v27 = vpop.xlane.xlu1 %4791  ;;  %v11404_v28 = vld [vmem:[#allocation38_spill] sm:$0xff] }
 0xb07   : > { %8532 = vrcp.f32 %v4792_v27 }
 0xb08   : > { %7731 = vmatmul.mubr.msk.bf16.vlgmr.msra.gmra.mxu1 %vm1978_vm2, %v4843_v32  ;;  %v8521_v9 = vpop.eup %8520  ;;  %8534 = vrcp.f32 %v4795_v46  ;;  %v8202_v46 = vld [vmem:[#allocation10 + $0x78] sm:$0xff]  }
 0xb09   : > { %7741 = vmatpush3.bf16.msra.mxu1 %v11401_v0  ;;  %7742 = vmatprep.mubr.msk.bf16.mxu1 %vm8964_vm1, %v11361_v40  ;;  %v4818_v16 = vmul.f32 %v8521_v9, %v10674_v21  ;;  %v8523_v61 = vpop.eup %8522  ;;  %v11402_v21 = vld [vmem:[#allocation35_spill] sm:$0xff] }
 0xb0a   : > { %v4801_v8 = vpop.xlane.xlu0 %4800  ;;  %v4798_v12 = vpop.xlane.xlu1 %4797  ;;  %7752 = vmatprep.subr.bf16.mxu1 %v11361_v40  ;;  %v4820_v47 = vmul.f32 %v8523_v61, %v10672_v63  ;;  %v11405_v0 = vld [vmem:[#allocation39_spill] sm:$0xff] }
 0xb0b   : > { %v4844_v53 = vpack.c.bf16 %v4818_v16, %v4816_v3  ;;  %8536 = vrcp.f32 %v4798_v12  ;;  %v8204_v16 = vld [vmem:[#allocation10 + $0x38] sm:$0xff]  }
 0xb0c   : > { %v8525_v50 = vpop.eup %8524  ;;  %8538 = vrcp.f32 %v4801_v8 }
 0xb0d   : > { %v4822_v25 = vmul.f32 %v8525_v50, %v10682_v59  ;;  %7737 = vmatmul.mubr.msk.bf16.vlgmr.msra.gmra.mxu0 %vm1978_vm2, %v4844_v53  ;;  %v8527_v7 = vpop.eup %8526  ;;  %v11406_v50 = vld [vmem:[#allocation40_spill] sm:$0xff] }
 0xb0e   : > { %v4807_v62 = vpop.xlane.xlu0 %4806  ;;  %v4804_v11 = vpop.xlane.xlu1 %4803  ;;  %7747 = vmatpush3.bf16.msra.mxu0 %v11402_v21  ;;  %7748 = vmatprep.mubr.msk.bf16.mxu0 %vm8964_vm1, %v11361_v40  ;;  %v4824_v63 = vmul.f32 %v8527_v7, %v10684_v5 }
 0xb0f   : > { %v4845_v42 = vpack.c.bf16 %v4822_v25, %v4820_v47  ;;  %8540 = vrcp.f32 %v4804_v11  ;;  %7758 = vmatprep.subr.bf16.mxu0 %v11361_v40 }
 0xb10   : > { %v8529_v17 = vpop.eup %8528  ;;  %8542 = vrcp.f32 %v4807_v62  ;;  %v8203_v62 = vld [vmem:[#allocation10 + $0x70] sm:$0xff]  }
 0xb11   : > { %v4826_v59 = vmul.f32 %v8529_v17, %v10693_v39  ;;  %7743 = vmatmul.mubr.msk.bf16.vlgmr.msra.gmra.mxu1 %vm1978_vm2, %v4845_v42  ;;  %v8531_v55 = vpop.eup %8530 }
 0xb12   : > { %v4810_v58 = vpop.xlane.xlu1 %4809  ;;  %7753 = vmatpush3.bf16.msra.mxu1 %v11403_v43  ;;  %7754 = vmatprep.mubr.msk.bf16.mxu1 %vm8964_vm1, %v11361_v40  ;;  %v4828_v35 = vmul.f32 %v8531_v55, %v10691_v1  ;;  %v8020_v53 = vpop.permute.xlu0 %8019  ;;  %v11408_v43 = vld [vmem:[#allocation41_spill] sm:$0xff] }
 0xb13   : > { %8544 = vrcp.f32 %v4810_v58  ;;  %v4846_v24 = vpack.c.bf16 %v4826_v59, %v4824_v63  ;;  %7764 = vmatprep.subr.bf16.mxu1 %v11361_v40  ;;  %v8021_v21 = vunpack.i.l.bf16 %v8020_v53  ;;  %v8205_v59 = vld [vmem:[#allocation10 + $0x68] sm:$0xff]  }
 0xb14   : > { %v8533_v57 = vpop.eup %8532  ;;  %v11407_v58 = vld [vmem:[#allocation42_spill] sm:$0xff] }
 0xb15   : > { %v4830_v5 = vmul.f32 %v8533_v57, %v10699_v51  ;;  %7749 = vmatmul.mubr.msk.bf16.vlgmr.msra.gmra.mxu0 %vm1978_vm2, %v4846_v24  ;;  %v8535_v20 = vpop.eup %8534 }
 0xb16   : > { %v10801_v39 = vpop.permute.xlu1 %8024  ;;  %7759 = vmatpush3.bf16.msra.mxu0 %v11404_v28  ;;  %7760 = vmatprep.mubr.msk.bf16.mxu0 %vm8964_vm1, %v11361_v40  ;;  %v4832_v2 = vmul.f32 %v8535_v20, %v10701_v36  ;;  %v10831_v20 = vpop.permute.xlu0 %8039 }
 0xb17   : > { %v4847_v32 = vpack.c.bf16 %v4830_v5, %v4828_v35  ;;  %7770 = vmatprep.subr.bf16.mxu0 %v11361_v40  ;;  %v8027_v24 = vunpack.i.h.bf16 %v10801_v39  ;;  %v8026_v57 = vunpack.i.l.bf16 %v10801_v39 }
 0xb18   : > { %v8537_v27 = vpop.eup %8536 }
 0xb19   : > { %v4834_v1 = vmul.f32 %v8537_v27, %v10709_v37  ;;  %7755 = vmatmul.mubr.msk.bf16.vlgmr.msra.gmra.mxu1 %vm1978_vm2, %v4847_v32  ;;  %v8539_v9 = vpop.eup %8538 }
 0xb1a   : > { %v10810_v51 = vpop.permute.xlu1 %8029  ;;  %7765 = vmatpush3.bf16.msra.mxu1 %v11405_v0  ;;  %7766 = vmatprep.mubr.msk.bf16.mxu1 %vm8964_vm1, %v11361_v40  ;;  %v4836_v61 = vmul.f32 %v8539_v9, %v10707_v6  ;;  %v8022_v6 = vunpack.i.h.bf16 %v8020_v53 }
 0xb1b   : > { %v4848_v3 = vpack.c.bf16 %v4834_v1, %v4832_v2  ;;  %7776 = vmatprep.subr.bf16.mxu1 %v8202_v46  ;;  %v8207_v2 = vld [vmem:[#allocation10 + $0x60] sm:$0xff]   ;;  %v8208_v1 = vld [vmem:[#allocation10 + $0x28] sm:$0xff]  }
 0xb1c   : > { %v8541_v8 = vpop.eup %8540  ;;  %v5316_v55 = vsel %vm1585_vm0, %v11407_v58, %v8022_v6  ;;  %v8041_v58 = vunpack.i.l.bf16 %v10831_v20 }
 0xb1d   : > { %v8543_v12 = vpop.eup %8542  ;;  %v4838_v36 = vmul.f32 %v8541_v8, %v10715_v26  ;;  %7761 = vmatmul.mubr.msk.bf16.vlgmr.msra.gmra.mxu0 %vm1978_vm2, %v4848_v3 }
 0xb1e   : > { %v8035_v37 = vpop.permute.xlu1 %8034  ;;  %7771 = vmatpush3.bf16.msra.mxu0 %v11406_v50  ;;  %7772 = vmatprep.mubr.msk.bf16.mxu0 %vm8964_vm1, %v11361_v40  ;;  %v4840_v11 = vmul.f32 %v8543_v12, %v10717_v34  ;;  %v8206_v40 = vld [vmem:[#allocation10 + $0x30] sm:$0xff]   ;;  %v5315_v34 = vsel %vm1585_vm0, %v11408_v43, %v8021_v21  ;;  %v11410_v12 = vld [vmem:[#allocation52_spill] sm:$0xff]  ;;  %v8031_v43 = vunpack.i.l.bf16 %v10810_v51 }
 0xb1f   : > { %v4849_v25 = vpack.c.bf16 %v4838_v36, %v4836_v61  ;;  %7796 = vmatprep.subr.bf16.mxu0 %v8204_v16  ;;  %v8037_v17 = vunpack.i.h.bf16 %v8035_v37  ;;  %v8036_v63 = vunpack.i.l.bf16 %v8035_v37  ;;  %v5379_v61 = vsel %vm1585_vm0, %v11410_v12, %v8026_v57  ;;  %v8211_v21 = vld [vmem:[#allocation10 + $0x50] sm:$0xff]   ;;  %v8216_v57 = vld [vmem:[#allocation10 + $0x8] sm:$0xff]  }
 0xb20   : > { %v8545_v47 = vpop.eup %8544 }
 0xb21   : > { %v4842_v7 = vmul.f32 %v8545_v47, %v10723_v54  ;;  %7767 = vmatmul.mubr.msk.bf16.vlgmr.msra.gmra.mxu1 %vm1978_vm2, %v4849_v25  ;;  %v5321_v28 = vsel %vm5319_vm3, %v5316_v55, %v8037_v17  ;;  %v5320_v32 = vsel %vm5319_vm3, %v5315_v34, %v8036_v63  ;;  %v8209_v47 = vld [vmem:[#allocation10 + $0x58] sm:$0xff]   ;;  %v8213_v17 = vld [vmem:[#allocation10 + $0x48] sm:$0xff]   ;;  %v8214_v63 = vld [vmem:[#allocation10 + $0x10] sm:$0xff]   ;;  %v8032_v55 = vunpack.i.h.bf16 %v10810_v51 }
 0xb22   : > { %v8045_v26 = vpop.permute.xlu1 %8044  ;;  %7777 = vmatpush3.bf16.msra.mxu1 %v8202_v46 }
 0xb23   : > { %v4850_v42 = vpack.c.bf16 %v4842_v7, %v4840_v11  ;;  %7778 = vmatprep.subr.bf16.mxu1 %v8203_v62  ;;  %v8047_v46 = vunpack.i.h.bf16 %v8045_v26  ;;  %v8046_v27 = vunpack.i.l.bf16 %v8045_v26  ;;  %v8210_v11 = vld [vmem:[#allocation10 + $0x20] sm:$0xff]   ;;  %v8050_v7 = vpop.permute.xlu0 %8049  ;;  %v8212_v26 = vld [vmem:[#allocation10 + $0x18] sm:$0xff]  }
 0xb24   : > { %v8051_v51 = vunpack.i.l.bf16 %v8050_v7 }
 0xb25   : > { %7773 = vmatmul.mubr.msk.bf16.vlgmr.msra.gmra.mxu0 %vm1978_vm2, %v4850_v42  ;;  %v5383_v53 = vsel %vm5319_vm3, %v5379_v61, %v8046_v27  ;;  %v11412_v27 = vld [vmem:[#allocation54_spill] sm:$0xff] }
 0xb26   : > { %v8055_v54 = vpop.permute.xlu1 %8054  ;;  %7779 = vmatpush3.bf16.msra.mxu1 %v8203_v62  ;;  %7797 = vmatpush3.bf16.msra.mxu0 %v8204_v16  ;;  %v11409_v16 = vld [vmem:[#allocation53_spill] sm:$0xff] }
 0xb27   : > { %v8057_v35 = vunpack.i.h.bf16 %v8055_v54  ;;  %v8056_v5 = vunpack.i.l.bf16 %v8055_v54  ;;  %7780 = vmatprep.subr.bf16.mxu1 %v8205_v59  ;;  %7798 = vmatprep.subr.bf16.mxu0 %v8206_v40  ;;  %v5380_v8 = vsel %vm1585_vm0, %v11409_v16, %v8027_v24  ;;  %v8060_v42 = vpop.permute.xlu0 %8059  ;;  %v8215_v24 = vld [vmem:[#allocation10 + $0x40] sm:$0xff]  }
 0xb28   : > { %v5384_v50 = vsel %vm5319_vm3, %v5380_v8, %v8047_v46  ;;  %v8062_v34 = vunpack.i.h.bf16 %v8060_v42  ;;  %v8061_v54 = vunpack.i.l.bf16 %v8060_v42  ;;  %v8217_v8 = vld [vmem:[#allocation10] sm:$0xff]   ;;  %v8220_v42 = vld [vmem:[#allocation11 + $0x68] sm:$0xff]  }
 0xb29   : > { %v5325_v9 = vsel %vm5324_vm4, %v5320_v32, %v8056_v5  ;;  %v5326_v39 = vsel %vm5324_vm4, %v5321_v28, %v8057_v35  ;;  %v11411_v32 = vld [vmem:[#allocation55_spill] sm:$0xff] }
 0xb2a   : > { %v8065_v0 = vpop.permute.xlu1 %8064  ;;  %v5329_v3 = vpack.c.bf16 %v5326_v39, %v5325_v9  ;;  %7781 = vmatpush3.bf16.msra.mxu1 %v8205_v59  ;;  %7799 = vmatpush3.bf16.msra.mxu0 %v8206_v40  ;;  %v8042_v40 = vunpack.i.h.bf16 %v10831_v20  ;;  %v5381_v20 = vsel %vm1585_vm0, %v11412_v27, %v8041_v58  ;;  %v11414_v39 = vld [vmem:[#allocation43_spill] sm:$0xff] }
 0xb2b   : > { %v8067_v36 = vunpack.i.h.bf16 %v8065_v0  ;;  %v8066_v37 = vunpack.i.l.bf16 %v8065_v0  ;;  %7782 = vmatprep.subr.bf16.mxu1 %v8207_v2  ;;  %7800 = vmatprep.subr.bf16.mxu0 %v8208_v1  ;;  %v8070_v28 = vpop.permute.xlu0 %8069  ;;  %v5317_v0 = vsel %vm1585_vm0, %v11414_v39, %v8031_v43  ;;  %v8227_v39 = vld [vmem:[#allocation11 + $0x48] sm:$0xff]  }
 0xb2c   : > { %7812 = vmatprep.mubr.bf16.mxu0 %v5329_v3  ;;  %v5382_v46 = vsel %vm1585_vm0, %v11411_v32, %v8042_v40  ;;  %v5385_v3 = vsel %vm5319_vm3, %v5381_v20, %v8061_v54  ;;  %v8072_v12 = vunpack.i.h.bf16 %v8070_v28  ;;  %v8071_v61 = vunpack.i.l.bf16 %v8070_v28  ;;  %v8221_v40 = vld [vmem:[#allocation11 + $0x60] sm:$0xff]   ;;  %v8223_v54 = vld [vmem:[#allocation11 + $0x58] sm:$0xff]  }
 0xb2d   : > { %v5387_v25 = vsel %vm5324_vm4, %v5383_v53, %v8066_v37  ;;  %v5388_v62 = vsel %vm5324_vm4, %v5384_v50, %v8067_v36  ;;  %v5386_v16 = vsel %vm5319_vm3, %v5382_v46, %v8062_v34  ;;  %v5322_v53 = vsel %vm5319_vm3, %v5317_v0, %v8051_v51  ;;  %v8225_v46 = vld [vmem:[#allocation11 + $0x50] sm:$0xff]  }
 0xb2e   : > { %v5391_v6 = vpack.c.bf16 %v5388_v62, %v5387_v25  ;;  %7783 = vmatpush3.bf16.msra.mxu1 %v8207_v2  ;;  %7801 = vmatpush3.bf16.msra.mxu0 %v8208_v1  ;;  %v8075_v59 = vpop.permute.xlu1 %8074  ;;  %v8052_v2 = vunpack.i.h.bf16 %v8050_v7  ;;  %v11413_v1 = vld [vmem:[#allocation44_spill] sm:$0xff]  ;;  %v5327_v25 = vsel %vm5324_vm4, %v5322_v53, %v8071_v61 }
 0xb2f   : > { %7784 = vmatprep.subr.bf16.mxu1 %v8209_v47  ;;  %7802 = vmatprep.subr.bf16.mxu0 %v8210_v11  ;;  %v8077_v35 = vunpack.i.h.bf16 %v8075_v59  ;;  %v8076_v5 = vunpack.i.l.bf16 %v8075_v59  ;;  %v5318_v9 = vsel %vm1585_vm0, %v11413_v1, %v8032_v55  ;;  %v8218_v7 = vld [vmem:[#allocation11 + $0x78] sm:$0xff]  }
 0xb30   : > { %7792 = vmatprep.mubr.bf16.mxu1 %v5391_v6  ;;  %v5323_v50 = vsel %vm5319_vm3, %v5318_v9, %v8052_v2  ;;  %v8219_v6 = vld [vmem:[#allocation11 + $0x70] sm:$0xff]   ;;  %v8222_v55 = vld [vmem:[#allocation11 + $0x38] sm:$0xff]   ;;  %v8226_v2 = vld [vmem:[#allocation11 + $0x28] sm:$0xff]  }
 0xb31   : > { %v5390_v36 = vsel %vm5324_vm4, %v5386_v16, %v8077_v35  ;;  %v5389_v37 = vsel %vm5324_vm4, %v5385_v3, %v8076_v5  ;;  %v5328_v62 = vsel %vm5324_vm4, %v5323_v50, %v8072_v12  ;;  %v8224_v35 = vld [vmem:[#allocation11 + $0x30] sm:$0xff]   ;;  %v8228_v16 = vld [vmem:[#allocation11 + $0x20] sm:$0xff]   ;;  %v8230_v50 = vld [vmem:[#allocation11 + $0x18] sm:$0xff]  }
 0xb32   : > { %7785 = vmatpush3.bf16.msra.mxu1 %v8209_v47  ;;  %7803 = vmatpush3.bf16.msra.mxu0 %v8210_v11  ;;  %v5392_v47 = vpack.c.bf16 %v5390_v36, %v5389_v37  ;;  %v5330_v11 = vpack.c.bf16 %v5328_v62, %v5327_v25  ;;  %v8229_v36 = vld [vmem:[#allocation11 + $0x40] sm:$0xff]  }
 0xb33   : > { %7786 = vmatprep.subr.bf16.mxu1 %v8211_v21  ;;  %7804 = vmatprep.subr.bf16.mxu0 %v8212_v26 }
 0xb36   : > { %7787 = vmatpush3.bf16.msra.mxu1 %v8211_v21  ;;  %7805 = vmatpush3.bf16.msra.mxu0 %v8212_v26 }
 0xb37   : > { %7788 = vmatprep.subr.bf16.mxu1 %v8213_v17  ;;  %7806 = vmatprep.subr.bf16.mxu0 %v8214_v63 }
 0xb3a   : > { %7789 = vmatpush3.bf16.msra.mxu1 %v8213_v17  ;;  %7807 = vmatpush3.bf16.msra.mxu0 %v8214_v63 }
 0xb3b   : > { %7790 = vmatprep.subr.bf16.mxu1 %v8215_v24  ;;  %7808 = vmatprep.subr.bf16.mxu0 %v8216_v57 }
 0xb3e   : > { %7791 = vmatpush3.bf16.msra.mxu1 %v8215_v24  ;;  %7809 = vmatpush3.bf16.msra.mxu0 %v8216_v57 }
 0xb3f   : > { %7810 = vmatprep.subr.bf16.mxu0 %v8217_v8  ;;  %7816 = vmatprep.subr.bf16.mxu1 %v8218_v7 }
 0xb41   : > { %7793 = vmatmul.mubr.bf16.vlgmr.msra.gmra.mxu1 %v5392_v47 }
 0xb42   : > { %7811 = vmatpush3.bf16.msra.mxu0 %v8217_v8  ;;  %7817 = vmatpush3.bf16.msra.mxu1 %v8218_v7 }
 0xb43   : > { %7818 = vmatprep.subr.bf16.mxu1 %v8219_v6  ;;  %7836 = vmatprep.subr.bf16.mxu0 %v8222_v55 }
 0xb45   : > { %7813 = vmatmul.mubr.bf16.vlgmr.msra.gmra.mxu0 %v5330_v11  ;;  %v8233_v11 = vld [vmem:[#allocation13 + $0x74] ss:$8 sps:$4 sm:$0xff]  }
 0xb46   : > { %7819 = vmatpush3.bf16.msra.mxu1 %v8219_v6  ;;  %7837 = vmatpush3.bf16.msra.mxu0 %v8222_v55 }
 0xb47   : > { %7820 = vmatprep.subr.bf16.mxu1 %v8220_v42  ;;  %7838 = vmatprep.subr.bf16.mxu0 %v8224_v35 }
 0xb4a   : > { %7821 = vmatpush3.bf16.msra.mxu1 %v8220_v42  ;;  %7839 = vmatpush3.bf16.msra.mxu0 %v8224_v35  ;;  %v8242_v35 = vld [vmem:[#allocation11] sm:$0xff]  }
 0xb4b   : > { %7822 = vmatprep.subr.bf16.mxu1 %v8221_v40  ;;  %7840 = vmatprep.subr.bf16.mxu0 %v8226_v2 }
 0xb4e   : > { %7823 = vmatpush3.bf16.msra.mxu1 %v8221_v40  ;;  %7841 = vmatpush3.bf16.msra.mxu0 %v8226_v2 }
 0xb4f   : > { %7824 = vmatprep.subr.bf16.mxu1 %v8223_v54  ;;  %7842 = vmatprep.subr.bf16.mxu0 %v8228_v16 }
 0xb52   : > { %7825 = vmatpush3.bf16.msra.mxu1 %v8223_v54  ;;  %7843 = vmatpush3.bf16.msra.mxu0 %v8228_v16 }
 0xb53   : > { %7826 = vmatprep.subr.bf16.mxu1 %v8225_v46  ;;  %7844 = vmatprep.subr.bf16.mxu0 %v8230_v50 }
 0xb56   : > { %7827 = vmatpush3.bf16.msra.mxu1 %v8225_v46  ;;  %7845 = vmatpush3.bf16.msra.mxu0 %v8230_v50 }
 0xb57   : > { %7828 = vmatprep.subr.bf16.mxu1 %v8227_v39 }
 0xb5a   : > { %7829 = vmatpush3.bf16.msra.mxu1 %v8227_v39 }
 0xb5b   : > { %7830 = vmatprep.subr.bf16.mxu1 %v8229_v36 }
 0xb5e   : > { %7831 = vmatpush3.bf16.msra.mxu1 %v8229_v36  ;;  %v8237_v36 = vld [vmem:[#allocation13 + $0x64] ss:$8 sps:$4 sm:$0xff]  }
 0xb5f   : > { %6041 = vmatprep.subr.bf16.mxu1 %v8233_v11  ;;  %v8241_v11 = vld [vmem:[#allocation13 + $0x54] ss:$8 sps:$4 sm:$0xff]  }
 0xbc8   : > { %v10865_v21 = vpop.f32.mrf.mxu1 }
 0xbca   : > { %v7732_v26 = vpop.f32.mrf.mxu1 }
 0xbcb   : > { %v8234_v26 = vld [vmem:[#allocation11 + $0x10] sm:$0xff]  }
 0xbcc   : > { %v10867_v17 = vpop.f32.mrf.mxu1  ;;  %7846 = vmatprep.subr.bf16.mxu0 %v8234_v26 }
 0xbcd   : > { %v10869_v63 = vpop.f32.mrf.mxu0  ;;  %7847 = vmatpush3.bf16.msra.mxu0 %v8234_v26 }
 0xbce   : > { %v7733_v59 = vpop.f32.mrf.mxu1 }
 0xbcf   : > { %v7738_v58 = vpop.f32.mrf.mxu0 }
 0xbd1   : > { %v10871_v43 = vpop.f32.mrf.mxu0  ;;  %v4976_v34 = vpop.f32.mrf.mxu1 }
 0xbd3   : > { %v7739_v24 = vpop.f32.mrf.mxu0  ;;  %v7744_v57 = vpop.f32.mrf.mxu1 }
 0xbd5   : > { %v4979_v5 = vpop.f32.mrf.mxu1  ;;  %v5020_v28 = vpop.f32.mrf.mxu0 }
 0xbd6   : > { %v8078_v32 = vpack.i.bf16 %v4979_v5, %v4976_v34  ;;  %v8238_v34 = vld [vmem:[#allocation11 + $0x8] sm:$0xff]  }
 0xbd7   : > { %v7745_v27 = vpop.f32.mrf.mxu1  ;;  %v7750_v20 = vpop.f32.mrf.mxu0  ;;  %7848 = vmatprep.subr.bf16.mxu0 %v8238_v34 }
 0xbd8   : > { %8079 = vrot.lane.b32.xlu0 %v8078_v32, %s8963_s7  ;;  %7849 = vmatpush3.bf16.msra.mxu0 %v8238_v34 }
 0xbd9   : > { %v5023_v1 = vpop.f32.mrf.mxu0  ;;  %v5064_v9 = vpop.f32.mrf.mxu1  ;;  %7850 = vmatprep.subr.bf16.mxu0 %v8242_v35 }
 0xbda   : > { %v8083_v51 = vpack.i.bf16 %v5023_v1, %v5020_v28 }
 0xbdb   : > { %v7751_v0 = vpop.f32.mrf.mxu0  ;;  %v7756_v3 = vpop.f32.mrf.mxu1 }
 0xbdc   : > { %8084 = vrot.lane.b32.xlu1 %v8083_v51, %s8963_s7  ;;  %7851 = vmatpush3.bf16.msra.mxu0 %v8242_v35  ;;  %v8231_v3 = vld [vmem:[#allocation13 + $0x70] ss:$8 sps:$4 sm:$0xff]  }
 0xbdd   : > { %v5067_v8 = vpop.f32.mrf.mxu1  ;;  %v5108_v12 = vpop.f32.mrf.mxu0 }
 0xbde   : > { %v8088_v61 = vpack.i.bf16 %v5067_v8, %v5064_v9 }
 0xbdf   : > { %v7757_v37 = vpop.f32.mrf.mxu1  ;;  %v7762_v53 = vpop.f32.mrf.mxu0 }
 0xbe0   : > { %8089 = vrot.lane.b32.xlu0 %v8088_v61, %s8962_s18  ;;  %v8235_v53 = vld [vmem:[#allocation13 + $0x60] ss:$8 sps:$4 sm:$0xff]  }
 0xbe1   : > { %v5111_v47 = vpop.f32.mrf.mxu0  ;;  %v5152_v25 = vpop.f32.mrf.mxu1 }
 0xbe2   : > { %v8093_v62 = vpack.i.bf16 %v5111_v47, %v5108_v12 }
 0xbe3   : > { %v7763_v7 = vpop.f32.mrf.mxu0  ;;  %v7768_v6 = vpop.f32.mrf.mxu1 }
 0xbe4   : > { %8094 = vrot.lane.b32.xlu1 %v8093_v62, %s8962_s18  ;;  %v11415_v7 = vmov 0  }
 0xbe5   : > { %v5155_v42 = vpop.f32.mrf.mxu1  ;;  %v5196_v59 = vpop.f32.mrf.mxu0 }
 0xbe6   : > { %v8098_v40 = vpack.i.bf16 %v5155_v42, %v5152_v25 }
 0xbe7   : > { %v7769_v58 = vpop.f32.mrf.mxu1  ;;  %v7774_v55 = vpop.f32.mrf.mxu0 }
 0xbe8   : > { %8099 = vrot.lane.b32.xlu0 %v8098_v40, %s8961_s4 }
 0xbe9   : > { %v5199_v54 = vpop.f32.mrf.mxu0 }
 0xbea   : > { %v8103_v24 = vpack.i.bf16 %v5199_v54, %v5196_v59 }
 0xbeb   : > { %v7775_v57 = vpop.f32.mrf.mxu0 }
 0xbec   : > { %8109 = vrot.lane.b32.xlu0 %v8108_v19, %s8963_s7  ;;  %8104 = vrot.lane.b32.xlu1 %v8103_v24, %s8961_s4 }
 0xbf0   : > { %8119 = vrot.lane.b32.xlu0 %v8118_v48, %s8962_s18  ;;  %8114 = vrot.lane.b32.xlu1 %v8113_v44, %s8963_s7  ;;  %s8966_s7 = smov [#allocation18]  }
 0xbf1   : > { %s8832_s11 = sshll.u32 %s8966_s7, 4  ;;  %s8833_s11 = int_to_ptr.vmem [resolvable:$false] %s8832_s11 }
 0xbf2   : > { %s8834_s13 = scalar_lea.vmem %s8833_s11, 1024  ;;  %p8835_p12 = scmp.lt.s32.totalorder %s11128_s17, %s8833_s11 }
 0xbf4   : > { %8129 = vrot.lane.b32.xlu0 %v8128_v38, %s8961_s4  ;;  %8124 = vrot.lane.b32.xlu1 %v8123_v49, %s8962_s18  ;;  %s6662_s18 = scalar_lea.sflag [#allocation19], %s9303_s2 }
 0xbf8   : > { %8134 = vrot.lane.b32.xlu1 %v8133_v15, %s8961_s4  ;;  %s11135_s4 = scalar_lea.hbm %s11419_s1, %s7123_s0 }
 0xc01   : > { %v7794_v54 = vpop.f32.mrf.mxu1 }
 0xc05   : > { %v10924_v6 = vpop.f32.mrf.mxu0 }
 0xc4a   : > { %v8080_v45 = vpop.permute.xlu0 %8079 }
 0xc4b   : > { %v8082_v13 = vunpack.i.h.bf16 %v8080_v45  ;;  %v8081_v14 = vunpack.i.l.bf16 %v8080_v45 }
 0xc4d   : > { %v5709_v48 = vsel %vm1585_vm0, %v10867_v17, %v8082_v13  ;;  %v5708_v56 = vsel %vm1585_vm0, %v10865_v21, %v8081_v14 }
 0xc4e   : > { %v8085_v4 = vpop.permute.xlu1 %8084 }
 0xc4f   : > { %v8087_v29 = vunpack.i.h.bf16 %v8085_v4  ;;  %v8086_v49 = vunpack.i.l.bf16 %v8085_v4  ;;  %v8245_v4 = vld [vmem:[#allocation13 + $0x44] ss:$8 sps:$4 sm:$0xff]  }
 0xc51   : > { %v5711_v21 = vsel %vm1585_vm0, %v10871_v43, %v8087_v29  ;;  %v5710_v20 = vsel %vm1585_vm0, %v10869_v63, %v8086_v49  ;;  %v8243_v49 = vld [vmem:[#allocation13 + $0x40] ss:$8 sps:$4 sm:$0xff]  }
 0xc52   : > { %v8090_v19 = vpop.permute.xlu0 %8089 }
 0xc53   : > { %v8092_v22 = vunpack.i.h.bf16 %v8090_v19  ;;  %v8091_v44 = vunpack.i.l.bf16 %v8090_v19  ;;  %v5572_v19 = vpop.f32.mrf.mxu0 }
 0xc55   : > { %v5713_v38 = vsel %vm5319_vm3, %v5709_v48, %v8092_v22  ;;  %v5712_v31 = vsel %vm5319_vm3, %v5708_v56, %v8091_v44  ;;  %v5475_v56 = vpop.f32.mrf.mxu1 }
 0xc56   : > { %v8095_v52 = vpop.permute.xlu1 %8094 }
 0xc57   : > { %v8097_v15 = vunpack.i.h.bf16 %v8095_v52  ;;  %v8096_v5 = vunpack.i.l.bf16 %v8095_v52 }
 0xc59   : > { %v5715_v9 = vsel %vm5319_vm3, %v5711_v21, %v8097_v15  ;;  %v5714_v51 = vsel %vm5319_vm3, %v5710_v20, %v8096_v5  ;;  %v8252_v21 = vld [vmem:[#allocation13 + $0x10] ss:$8 sps:$4 sm:$0xff]  }
 0xc5a   : > { %v8100_v33 = vpop.permute.xlu0 %8099 }
 0xc5b   : > { %v8102_v60 = vunpack.i.h.bf16 %v8100_v33  ;;  %v8101_v10 = vunpack.i.l.bf16 %v8100_v33 }
 0xc5d   : > { %v5716_v28 = vsel %vm5324_vm4, %v5712_v31, %v8101_v10  ;;  %v5717_v32 = vsel %vm5324_vm4, %v5713_v38, %v8102_v60  ;;  %v7815_v10 = vpop.f32.mrf.mxu0  ;;  %v8246_v38 = vld [vmem:[#allocation13 + $0x30] ss:$8 sps:$4 sm:$0xff]   ;;  %v8251_v31 = vld [vmem:[#allocation13 + $0x24] ss:$8 sps:$4 sm:$0xff]  }
 0xc5e   : > { %v8110_v46 = vpop.permute.xlu0 %8109  ;;  %v8105_v17 = vpop.permute.xlu1 %8104  ;;  %v5720_v27 = vpack.c.bf16 %v5717_v32, %v5716_v28  ;;  %v8249_v28 = vld [vmem:[#allocation13 + $0x20] ss:$8 sps:$4 sm:$0xff]  }
 0xc5f   : > { %v8107_v2 = vunpack.i.h.bf16 %v8105_v17  ;;  %v8106_v1 = vunpack.i.l.bf16 %v8105_v17  ;;  %v8112_v16 = vunpack.i.h.bf16 %v8110_v46  ;;  %v8111_v8 = vunpack.i.l.bf16 %v8110_v46  ;;  %v5575_v15 = vpop.f32.mrf.mxu0  ;;  %v8254_v46 = vld [vmem:[#allocation13 + $0x14] ss:$8 sps:$4 sm:$0xff]  }
 0xc60   : > { %7832 = vmatprep.mubr.bf16.mxu1 %v5720_v27  ;;  %v5573_v17 = vadd.f32 %v5572_v19, %v5475_v56  ;;  %v7047_v27 = vld [vmem:[%s11232_s10] ss:$0 sm:$0xff]  ;;  %v8279_v19 = vld [vmem:[#allocation14 + $0x8] sm:$0xff]  }
 0xc61   : > { %v5719_v39 = vsel %vm5324_vm4, %v5715_v9, %v8107_v2  ;;  %v5718_v0 = vsel %vm5324_vm4, %v5714_v51, %v8106_v1  ;;  %v5647_v50 = vsel %vm1585_vm0, %v10541_v23, %v8112_v16  ;;  %v5646_v47 = vsel %vm1585_vm0, %v10539_v18, %v8111_v8  ;;  %v8239_v18 = vld [vmem:[#allocation13 + $0x50] ss:$8 sps:$4 sm:$0xff]   ;;  %v8257_v2 = vld [vmem:[#allocation13 + $0x4] ss:$8 sps:$4 sm:$0xff]   ;;  %v8255_v9 = vld [vmem:[#allocation13] ss:$8 sps:$4 sm:$0xff]  }
 0xc62   : > { %v5721_v12 = vpack.c.bf16 %v5719_v39, %v5718_v0  ;;  %v8120_v61 = vpop.permute.xlu0 %8119  ;;  %v8115_v43 = vpop.permute.xlu1 %8114  ;;  %v5594_v1 = vadd.f32 %v7047_v27, %v5573_v17  ;;  %v8582_v39 = vld [vmem:[%s9310_s9 + $0x8] sm:$0xff]  ;;  %v5581_v16 = vadd.f32 %v10924_v6, %v7794_v54  ;;  %v8583_v8 = vld [vmem:[%s9310_s9] sm:$0xff]  ;;  %v8262_v6 = vld [vmem:[#allocation16 + $0x18] sm:$0xff]  }
 0xc63   : > { %v8122_v37 = vunpack.i.h.bf16 %v8120_v61  ;;  %v8121_v63 = vunpack.i.l.bf16 %v8120_v61  ;;  %v8117_v26 = vunpack.i.h.bf16 %v8115_v43  ;;  %v8116_v42 = vunpack.i.l.bf16 %v8115_v43  ;;  %v8272_v54 = vld [vmem:[#allocation14 + $0x60] sm:$0xff]  }
 0xc64   : > { %7833 = vmatmul.mubr.bf16.vlgmr.msra.gmra.mxu1 %v5721_v12  ;;  %v10946_v12 = vadd.f32 %v8583_v8, %v5594_v1  ;;  %v5949_v17 = vld [vmem:[%s11236_s14] sm:$0x3] }
 0xc65   : > { %6042 = vmatpush1.bf16.msra.mxu1 %v8231_v3  ;;  %6073 = vmatprep.mubr.bf16.mxu1 %v11415_v7  ;;  %v5650_v58 = vsel %vm5319_vm3, %v5646_v47, %v8121_v63  ;;  %v5651_v55 = vsel %vm5319_vm3, %v5647_v50, %v8122_v37  ;;  %v5649_v13 = vsel %vm1585_vm0, %v10545_v41, %v8117_v26  ;;  %v8248_v41 = vld [vmem:[#allocation13 + $0x34] ss:$8 sps:$4 sm:$0xff]   ;;  %v8264_v26 = vld [vmem:[#allocation16 + $0x8] sm:$0xff]  }
 0xc66   : > { %v8130_v25 = vpop.permute.xlu0 %8129  ;;  %v8125_v62 = vpop.permute.xlu1 %8124  ;;  %6043 = vmatprep.subr.bf16.mxu1 %v8237_v36  ;;  %v5648_v14 = vsel %vm1585_vm0, %v10543_v30, %v8116_v42  ;;  %v8258_v3 = vld [vmem:[#allocation16 + $0x38] sm:$0xff]   ;;  %v8259_v36 = vld [vmem:[#allocation16 + $0x30] sm:$0xff]   ;;  %v5596_v37 = vadd.f32 %v7047_v27, %v5581_v16  ;;  %v8265_v42 = vld [vmem:[#allocation16] sm:$0xff]  }
 0xc67   : > { %v8132_v59 = vunpack.i.h.bf16 %v8130_v25  ;;  %v8131_v40 = vunpack.i.l.bf16 %v8130_v25  ;;  %v8127_v23 = vunpack.i.h.bf16 %v8125_v62  ;;  %v8126_v34 = vunpack.i.l.bf16 %v8125_v62  ;;  %v7795_v30 = vpop.f32.mrf.mxu1  ;;  %v8584_v63 = vld [vmem:[%s9310_s9 + $0x18] sm:$0xff]  ;;  %v8585_v50 = vld [vmem:[%s9310_s9 + $0x10] sm:$0xff]  ;;  %v8260_v62 = vld [vmem:[#allocation16 + $0x28] sm:$0xff]   ;;  %s8828_s9 = scalar_lea.vmem %s11128_s17, 512 }
 0xc68   : > { %v5584_v51 = vadd.f32 %v7815_v10, %v7795_v30  ;;  %v10955_v47 = vadd.f32 %v8585_v50, %v5596_v37  ;;  %v7064_v30 = vld [vmem:[%s11234_s12] ss:$0 sm:$0xff]  ;;  %p8829_p9 = scmp.ne.s32.totalorder %s11128_s17, %s8828_s9  ;;  %p8836_p7 = scmp.lt.s32.totalorder %s8834_s13, %s8828_s9 }
 0xc69   : > { %6044 = vmatpush1.bf16.msra.mxu1 %v8235_v53  ;;  %v5654_v24 = vsel %vm5324_vm4, %v5650_v58, %v8131_v40  ;;  %v5655_v57 = vsel %vm5324_vm4, %v5651_v55, %v8132_v59  ;;  %v5652_v52 = vsel %vm5319_vm3, %v5648_v14, %v8126_v34  ;;  %v5653_v48 = vsel %vm5319_vm3, %v5649_v13, %v8127_v23  ;;  %v5478_v5 = vpop.f32.mrf.mxu1  ;;  %v8266_v59 = vld [vmem:[#allocation14 + $0x78] sm:$0xff]   ;;  %v8268_v58 = vld [vmem:[#allocation14 + $0x70] sm:$0xff]   ;;  %v8270_v23 = vld [vmem:[#allocation14 + $0x68] sm:$0xff]  }
 0xc6a   : > { %v8135_v35 = vpop.permute.xlu1 %8134  ;;  %6045 = vmatprep.subr.bf16.mxu1 %v8241_v11  ;;  %v5658_v45 = vpack.c.bf16 %v5655_v57, %v5654_v24  ;;  %v5576_v32 = vadd.f32 %v5575_v15, %v5478_v5  ;;  %v5597_v61 = vadd.f32 %v7047_v27, %v5584_v51  ;;  %v8261_v11 = vld [vmem:[#allocation16 + $0x20] sm:$0xff]   ;;  %v8267_v40 = vld [vmem:[#allocation14 + $0x38] sm:$0xff]   ;;  %7314 = vmatprep.subr.bf16.mxu0 %v8266_v59  ;;  %v8269_v55 = vld [vmem:[#allocation14 + $0x30] sm:$0xff]   ;;  %p8830_p6 = pnand %p8829_p9, %p11420_p10  ;;  %p8837_p4 = por %p8836_p7, %p8835_p12 }
 0xc6b   : > { %v8137_v22 = vunpack.i.h.bf16 %v8135_v35  ;;  %v8136_v44 = vunpack.i.l.bf16 %v8135_v35  ;;  %v8271_v34 = vld [vmem:[#allocation14 + $0x28] sm:$0xff]   ;;  %v8274_v24 = vld [vmem:[#allocation14 + $0x58] sm:$0xff]   ;;  %v8276_v35 = vld [vmem:[#allocation14 + $0x50] sm:$0xff]  }
 0xc6c   : > { %7852 = vmatprep.mubr.bf16.mxu0 %v5658_v45  ;;  %v5595_v20 = vadd.f32 %v7047_v27, %v5576_v32  ;;  %v10952_v53 = vadd.f32 %v8584_v63, %v5597_v61  ;;  %v8275_v57 = vld [vmem:[#allocation14 + $0x18] sm:$0xff]   ;;  %v8277_v45 = vld [vmem:[#allocation14 + $0x10] sm:$0xff]   ;;  %v8280_v13 = vld [vmem:[#allocation14 + $0x40] sm:$0xff]   ;;  %p8831_p3 = pneg %p8830_p6 }
 0xc6d   : > { %v5656_v33 = vsel %vm5324_vm4, %v5652_v52, %v8136_v44  ;;  %v5657_v29 = vsel %vm5324_vm4, %v5653_v48, %v8137_v22  ;;  %6046 = vmatpush1.bf16.msra.mxu1 %v8239_v18  ;;  %v8273_v18 = vld [vmem:[#allocation14 + $0x20] sm:$0xff]  }
 0xc6e   : > { %v5659_v60 = vpack.c.bf16 %v5657_v29, %v5656_v33  ;;  %6047 = vmatprep.subr.bf16.mxu1 %v8245_v4  ;;  %v10942_v0 = vadd.f32 %v8582_v39, %v5595_v20  ;;  %v5932_v25 = vpack.c.bf16 %v10952_v53, %v10955_v47  ;;  %v8278_v4 = vld [vmem:[#allocation14 + $0x48] sm:$0xff]   ;;  %v8281_v14 = vld [vmem:[#allocation14] sm:$0xff]   ;;  %p8838_p11 = pnand %p8837_p4, %p8831_p3 }
 0xc6f   : > { %v11416_v27 = vld [vmem:[#allocation33_spill] sm:$0xff]  ;;  %v11417_v20 = vld [vmem:[#allocation34_spill] sm:$0xff] }
 0xc70   : > { %7853 = vmatmul.mubr.bf16.vlgmr.msra.gmra.mxu0 %v5659_v60  ;;  %v5931_v43 = vpack.c.bf16 %v10942_v0, %v10946_v12 }
 0xc71   : > { %6048 = vmatpush1.bf16.msra.mxu1 %v8243_v49  ;;  %7315 = vmatpush3.bf16.msra.mxu0 %v8267_v40 }
 0xc72   : > { %6049 = vmatprep.subr.bf16.mxu1 %v8248_v41  ;;  %7316 = vmatprep.subr.bf16.mxu0 %v8268_v58 }
 0xc75   : > { %6050 = vmatpush1.bf16.msra.mxu1 %v8246_v38  ;;  %7317 = vmatpush3.bf16.msra.mxu0 %v8269_v55 }
 0xc76   : > { %6051 = vmatprep.subr.bf16.mxu1 %v8251_v31  ;;  %7318 = vmatprep.subr.bf16.mxu0 %v8270_v23 }
 0xc79   : > { %6052 = vmatpush1.bf16.msra.mxu1 %v8249_v28  ;;  %7319 = vmatpush3.bf16.msra.mxu0 %v8271_v34 }
 0xc7a   : > { %6053 = vmatprep.subr.bf16.mxu1 %v8254_v46  ;;  %7320 = vmatprep.subr.bf16.mxu0 %v8272_v54 }
 0xc7d   : > { %6054 = vmatpush1.bf16.msra.mxu1 %v8252_v21  ;;  %7321 = vmatpush3.bf16.msra.mxu0 %v8273_v18  ;;  %v5954_v21 = vrot.slane %v5949_v17, %v11416_v27 }
 0xc7e   : > { %6055 = vmatprep.subr.bf16.mxu1 %v8257_v2  ;;  %7322 = vmatprep.subr.bf16.mxu0 %v8274_v24  ;;  %v5958_v2 = vrot.slane %v5949_v17, %v11417_v20 }
 0xc81   : > { %6056 = vmatpush1.bf16.msra.mxu1 %v8255_v9  ;;  %7323 = vmatpush3.bf16.msra.mxu0 %v8275_v57 }
 0xc82   : > { %7856 = vmatprep.subr.bf16.mxu1 %v8258_v3  ;;  %7324 = vmatprep.subr.bf16.mxu0 %v8276_v35 }
 0xc84   : > { %6074 = vmatmul.mubr.bf16.vlgmr.msra.gmra.mxu1 %v5931_v43 }
 0xc85   : > { %6083 = vmatprep.mubr.bf16.mxu1 %v11415_v7  ;;  %7857 = vmatpush3.bf16.msra.mxu1 %v8258_v3  ;;  %v8263_v7 = vld [vmem:[#allocation16 + $0x10] sm:$0xff]  }
 0xc86   : > { %7858 = vmatprep.subr.bf16.mxu1 %v8259_v36  ;;  %7325 = vmatpush3.bf16.msra.mxu0 %v8277_v45 }
 0xc87   : > { %7326 = vmatprep.subr.bf16.mxu0 %v8278_v4 }
 0xc89   : > { %7859 = vmatpush3.bf16.msra.mxu1 %v8259_v36 }
 0xc8a   : > { %7860 = vmatprep.subr.bf16.mxu1 %v8260_v62  ;;  %7327 = vmatpush3.bf16.msra.mxu0 %v8279_v19 }
 0xc8b   : > { %7328 = vmatprep.subr.bf16.mxu0 %v8280_v13 }
 0xc8c   : > { %6084 = vmatmul.mubr.bf16.gmra.mxu1 %v5932_v25 }
 0xc8d   : > { %7861 = vmatpush3.bf16.msra.mxu1 %v8260_v62 }
 0xc8e   : > { %7862 = vmatprep.subr.bf16.mxu1 %v8261_v11  ;;  %7329 = vmatpush3.bf16.msra.mxu0 %v8281_v14 }
 0xc91   : > { %7863 = vmatpush3.bf16.msra.mxu1 %v8261_v11 }
 0xc92   : > { %7864 = vmatprep.subr.bf16.mxu1 %v8262_v6 }
 0xc95   : > { %7865 = vmatpush3.bf16.msra.mxu1 %v8262_v6 }
 0xc96   : > { %7866 = vmatprep.subr.bf16.mxu1 %v8263_v7 }
 0xc99   : > { %7867 = vmatpush3.bf16.msra.mxu1 %v8263_v7 }
 0xc9a   : > { %7868 = vmatprep.subr.bf16.mxu1 %v8264_v26 }
 0xc9d   : > { %7869 = vmatpush3.bf16.msra.mxu1 %v8264_v26 }
 0xc9e   : > { %7870 = vmatprep.subr.bf16.mxu1 %v8265_v42 }
 0xca1   : > { %7871 = vmatpush3.bf16.msra.mxu1 %v8265_v42 }
 0xd24   : > { %v7834_v22 = vpop.f32.mrf.mxu1 }
 0xd26   : > { %v5804_v44 = vpop.f32.mrf.mxu1 }
 0xd28   : > { %v7835_v48 = vpop.f32.mrf.mxu1 }
 0xd2a   : > { %v5807_v60 = vpop.f32.mrf.mxu1 }
 0xd30   : > { %v7854_v52 = vpop.f32.mrf.mxu0 }
 0xd31   : > { %v5910_v41 = vadd.f32 %v7854_v52, %v7834_v22 }
 0xd32   : > { %v5901_v56 = vpop.f32.mrf.mxu0 }
 0xd33   : > { %v5902_v29 = vadd.f32 %v5901_v56, %v5804_v44  ;;  %v5925_v28 = vadd.f32 %v7064_v30, %v5910_v41 }
 0xd34   : > { %v7855_v33 = vpop.f32.mrf.mxu0 }
 0xd35   : > { %v5913_v49 = vadd.f32 %v7855_v33, %v7835_v48  ;;  %v5923_v15 = vadd.f32 %v7064_v30, %v5902_v29 }
 0xd36   : > { %v5904_v10 = vpop.f32.mrf.mxu0 }
 0xd37   : > { %v5905_v38 = vadd.f32 %v5904_v10, %v5807_v60  ;;  %v5926_v31 = vadd.f32 %v7064_v30, %v5913_v49 }
 0xd39   : > { %v5924_v5 = vadd.f32 %v7064_v30, %v5905_v38  ;;  %v6499_v46 = vpack.c.bf16 %v5926_v31, %v5925_v28 }
 0xd3b   : > { %v6498_v32 = vpack.c.bf16 %v5924_v5, %v5923_v15 }
 0xd3d   : > { %7872 = vmatprep.mubr.bf16.mxu1 %v6498_v32 }
 0xd3e   : > { %7873 = vmatmul.mubr.bf16.vlgmr.msra.gmra.mxu1 %v6499_v46 }
 0xd44   : > { %v6075_v1 = vpop.f32.mrf.mxu1 }
 0xd45   : > { %v10967_v9 = vadd.f32 %v6075_v1, %v5954_v21 }
 0xd46   : > { %v6077_v51 = vpop.f32.mrf.mxu1 }
 0xd47   : > { %v10970_v39 = vmul.f32 0.70710677, %v10967_v9  ;;  %v10972_v3 = vadd.f32 %v6077_v51, %v5958_v2 }
 0xd48   : > { %v6079_v16 = vpop.f32.mrf.mxu1 }
 0xd49   : > { %v6126_v8 = vand.u32 2147483647, %v10970_v39  ;;  %v10976_v61 = vmul.f32 0.70710677, %v10972_v3  ;;  %v10978_v43 = vadd.f32 %v6079_v16, %v5954_v21  ;;  %vm6110_vm5 = vcmp.ge.f32.partialorder %v10970_v39, 0.0 }
 0xd4a   : > { %v6081_v36 = vpop.f32.mrf.mxu1 }
 0xd4b   : > { %v6134_v37 = vmul.f32 0.3275911, %v6126_v8  ;;  %v6127_v63 = vand.u32 2147483647, %v10976_v61  ;;  %v10982_v50 = vmul.f32 0.70710677, %v10978_v43  ;;  %v10984_v25 = vadd.f32 %v6081_v36, %v5958_v2 }
 0xd4c   : > { %v6085_v62 = vpop.f32.mrf.mxu1  ;;  %v6230_v24 = vsub.f32 0.0, %v6126_v8  ;;  %vm6111_vm6 = vcmp.ge.f32.partialorder %v10976_v61, 0.0 }
 0xd4d   : > { %v6142_v11 = vadd.f32 1.0, %v6134_v37  ;;  %v6135_v6 = vmul.f32 0.3275911, %v6127_v63  ;;  %v6128_v7 = vand.u32 2147483647, %v10982_v50  ;;  %v10991_v23 = vadd.f32 %v6085_v62, %v5954_v21 }
 0xd4e   : > { %v10988_v26 = vmul.f32 0.70710677, %v10984_v25  ;;  %v6087_v42 = vpop.f32.mrf.mxu1  ;;  %v6231_v4 = vsub.f32 0.0, %v6127_v63  ;;  %v6238_v22 = vmul.f32 %v6230_v24, %v6126_v8  ;;  %vm6112_vm7 = vcmp.ge.f32.partialorder %v10982_v50, 0.0 }
 0xd4f   : > { %8546 = vrcp.f32 %v6142_v11  ;;  %v6143_v59 = vadd.f32 1.0, %v6135_v6  ;;  %v6136_v40 = vmul.f32 0.3275911, %v6128_v7  ;;  %v10993_v18 = vadd.f32 %v6087_v42, %v5958_v2 }
 0xd50   : > { %v6129_v58 = vand.u32 2147483647, %v10988_v26  ;;  %v6089_v34 = vpop.f32.mrf.mxu1  ;;  %v10996_v57 = vmul.f32 0.70710677, %v10991_v23  ;;  %v6232_v48 = vsub.f32 0.0, %v6128_v7  ;;  %v6239_v29 = vmul.f32 %v6231_v4, %v6127_v63 }
 0xd51   : > { %8548 = vrcp.f32 %v6143_v59  ;;  %v6144_v55 = vadd.f32 1.0, %v6136_v40  ;;  %v10999_v45 = vmul.f32 0.70710677, %v10993_v18  ;;  %v11002_v13 = vadd.f32 %v6089_v34, %v5954_v21 }
 0xd52   : > { %v6137_v54 = vmul.f32 0.3275911, %v6129_v58  ;;  %v6130_v19 = vand.u32 2147483647, %v10996_v57  ;;  %v6091_v14 = vpop.f32.mrf.mxu1  ;;  %v6246_v38 = vmul.f32 1.442695, %v6238_v22  ;;  %v6240_v5 = vmul.f32 %v6232_v48, %v6128_v7 }
 0xd53   : > { %8550 = vrcp.f32 %v6144_v55  ;;  %v6131_v52 = vand.u32 2147483647, %v10999_v45  ;;  %v11006_v56 = vmul.f32 0.70710677, %v11002_v13  ;;  %v11008_v33 = vadd.f32 %v6091_v14, %v5958_v2 }
 0xd54   : > { %v6145_v35 = vadd.f32 1.0, %v6137_v54  ;;  %v6138_v44 = vmul.f32 0.3275911, %v6130_v19  ;;  %v6233_v28 = vsub.f32 0.0, %v6129_v58  ;;  %v6248_v46 = vmul.f32 1.442695, %v6239_v29 }
 0xd55   : > { %v6139_v60 = vmul.f32 0.3275911, %v6131_v52  ;;  %v6132_v41 = vand.u32 2147483647, %v11006_v56  ;;  %v11012_v10 = vmul.f32 0.70710677, %v11008_v33 }
 0xd56   : > { %8552 = vrcp.f32 %v6145_v35  ;;  %v6146_v49 = vadd.f32 1.0, %v6138_v44  ;;  %v6234_v2 = vsub.f32 0.0, %v6130_v19  ;;  %v6250_v37 = vmul.f32 1.442695, %v6240_v5 }
 0xd57   : > { %v6147_v31 = vadd.f32 1.0, %v6139_v60  ;;  %v6140_v32 = vmul.f32 0.3275911, %v6132_v41  ;;  %v11019_v17 = vand.u32 2147483647, %v11012_v10  ;;  %v6241_v63 = vmul.f32 %v6233_v28, %v6129_v58 }
 0xd58   : > { %8554 = vrcp.f32 %v6146_v49  ;;  %v6235_v6 = vsub.f32 0.0, %v6131_v52  ;;  %v8965_v42 = vmov -1.0   ;;  %v6242_v55 = vmul.f32 %v6234_v2, %v6130_v19 }
 0xd59   : > { %8556 = vrcp.f32 %v6147_v31  ;;  %v6148_v1 = vadd.f32 1.0, %v6140_v32  ;;  %v6141_v16 = vmul.f32 0.3275911, %v11019_v17  ;;  %v11033_v59 = vsel %vm6110_vm5, 1.0, %v8965_v42 }
 0xd5a   : > { %8558 = vpow2.f32 %v6246_v38  ;;  %v6236_v24 = vsub.f32 0.0, %v6132_v41  ;;  %v11042_v4 = vsel %vm6111_vm6, 1.0, %v8965_v42  ;;  %v6252_v14 = vmul.f32 1.442695, %v6241_v63 }
 0xd5b   : > { %8560 = vrcp.f32 %v6148_v1  ;;  %v6149_v7 = vadd.f32 1.0, %v6141_v16  ;;  %v6243_v44 = vmul.f32 %v6235_v6, %v6131_v52  ;;  %v6254_v49 = vmul.f32 1.442695, %v6242_v55 }
 0xd5c   : > { %v11014_v30 = vpop.eup %8546  ;;  %8562 = vpow2.f32 %v6248_v46  ;;  %v6244_v31 = vmul.f32 %v6236_v24, %v6132_v41  ;;  %v6237_v28 = vsub.f32 0.0, %v11019_v17  ;;  %v6120_v50 = vsel %vm6112_vm7, 1.0, %v8965_v42 }
 0xd5d   : > { %v6158_v15 = vmul.f32 1.0614054, %v11014_v30  ;;  %8564 = vrcp.f32 %v6149_v7  ;;  %vm6113_vm8 = vcmp.ge.f32.partialorder %v10988_v26, 0.0  ;;  %vm6114_vm9 = vcmp.ge.f32.partialorder %v10996_v57, 0.0 }
 0xd5e   : > { %v11021_v21 = vpop.eup %8548  ;;  %8566 = vpow2.f32 %v6250_v37  ;;  %v6258_v37 = vmul.f32 1.442695, %v6244_v31  ;;  %v6245_v7 = vmul.f32 %v6237_v28, %v11019_v17  ;;  %vm6115_vm10 = vcmp.ge.f32.partialorder %v10999_v45, 0.0 }
 0xd5f   : > { %v6166_v20 = vadd.f32 -1.4531521, %v6158_v15  ;;  %v6159_v51 = vmul.f32 1.0614054, %v11021_v21  ;;  %8568 = vpow2.f32 %v6252_v14  ;;  %vm6116_vm11 = vcmp.ge.f32.partialorder %v11006_v56, 0.0 }
 0xd60   : > { %v11026_v8 = vpop.eup %8550  ;;  %8570 = vpow2.f32 %v6254_v49  ;;  %v6124_v56 = vsel %vm6116_vm11, 1.0, %v8965_v42  ;;  %vm6117_vm12 = vcmp.ge.f32.partialorder %v11012_v10, 0.0  ;;  %v6098_v10 = vmul.f32 0.5, %v10991_v23 }
 0xd61   : > { %v6174_v36 = vmul.f32 %v11014_v30, %v6166_v20  ;;  %v6167_v62 = vadd.f32 -1.4531521, %v6159_v51  ;;  %v6160_v11 = vmul.f32 1.0614054, %v11026_v8  ;;  %v6256_v20 = vmul.f32 1.442695, %v6243_v44 }
 0xd63   : > { %v6182_v40 = vadd.f32 1.4214138, %v6174_v36  ;;  %v11035_v34 = vpop.eup %8552  ;;  %v6175_v54 = vmul.f32 %v11021_v21, %v6167_v62  ;;  %v6168_v58 = vadd.f32 -1.4531521, %v6160_v11  ;;  %8572 = vpow2.f32 %v6256_v20 }
 0xd64   : > { %v6161_v39 = vmul.f32 1.0614054, %v11035_v34  ;;  %8574 = vpow2.f32 %v6258_v37 }
 0xd65   : > { %v6190_v35 = vmul.f32 %v11014_v30, %v6182_v40  ;;  %v6183_v22 = vadd.f32 1.4214138, %v6175_v54  ;;  %v6176_v19 = vmul.f32 %v11026_v8, %v6168_v58  ;;  %v11048_v61 = vpop.eup %8554 }
 0xd66   : > { %v6169_v29 = vadd.f32 -1.4531521, %v6161_v39  ;;  %v6162_v46 = vmul.f32 1.0614054, %v11048_v61  ;;  %v11056_v41 = vpop.eup %8556 }
 0xd67   : > { %v6198_v48 = vadd.f32 -0.28449672, %v6190_v35  ;;  %v6191_v60 = vmul.f32 %v11021_v21, %v6183_v22  ;;  %v6184_v38 = vadd.f32 1.4214138, %v6176_v19  ;;  %v8559_v63 = vpop.eup %8558  ;;  %v6163_v6 = vmul.f32 1.0614054, %v11056_v41 }
 0xd68   : > { %v6177_v5 = vmul.f32 %v11035_v34, %v6169_v29  ;;  %v6170_v36 = vadd.f32 -1.4531521, %v6162_v46  ;;  %v11063_v40 = vpop.eup %8560 }
 0xd69   : > { %v6206_v15 = vmul.f32 %v11014_v30, %v6198_v48  ;;  %v6199_v32 = vadd.f32 -0.28449672, %v6191_v60  ;;  %v6192_v52 = vmul.f32 %v11026_v8, %v6184_v38  ;;  %v6171_v39 = vadd.f32 -1.4531521, %v6163_v6 }
 0xd6a   : > { %v6185_v1 = vadd.f32 1.4214138, %v6177_v5  ;;  %v6178_v58 = vmul.f32 %v11048_v61, %v6170_v36  ;;  %v6164_v14 = vmul.f32 1.0614054, %v11063_v40  ;;  %v6260_v60 = vmul.f32 1.442695, %v6245_v7 }
 0xd6b   : > { %v6214_v2 = vadd.f32 0.2548296, %v6206_v15  ;;  %v6207_v51 = vmul.f32 %v11021_v21, %v6199_v32  ;;  %v6200_v16 = vadd.f32 -0.28449672, %v6192_v52  ;;  %v6179_v29 = vmul.f32 %v11056_v41, %v6171_v39 }
 0xd6c   : > { %v6193_v11 = vmul.f32 %v11035_v34, %v6185_v1  ;;  %v6186_v44 = vadd.f32 1.4214138, %v6178_v58  ;;  %v6172_v49 = vadd.f32 -1.4531521, %v6164_v14  ;;  %8576 = vpow2.f32 %v6260_v60 }
 0xd6d   : > { %v6222_v62 = vmul.f32 %v11014_v30, %v6214_v2  ;;  %v6215_v55 = vadd.f32 0.2548296, %v6207_v51  ;;  %v6208_v54 = vmul.f32 %v11026_v8, %v6200_v16  ;;  %v8563_v30 = vpop.eup %8562  ;;  %v6187_v52 = vadd.f32 1.4214138, %v6179_v29 }
 0xd6e   : > { %v6201_v35 = vadd.f32 -0.28449672, %v6193_v11  ;;  %v11069_v17 = vpop.eup %8564  ;;  %v6194_v15 = vmul.f32 %v11048_v61, %v6186_v44  ;;  %v6180_v46 = vmul.f32 %v11063_v40, %v6172_v49  ;;  %v6095_v14 = vmul.f32 0.5, %v10972_v3 }
 0xd6f   : > { %v6262_v24 = vmul.f32 %v8559_v63, %v6222_v62  ;;  %v6223_v22 = vmul.f32 %v11021_v21, %v6215_v55  ;;  %v6216_v19 = vadd.f32 0.2548296, %v6208_v54  ;;  %v6165_v5 = vmul.f32 1.0614054, %v11069_v17  ;;  %v8567_v28 = vpop.eup %8566 }
 0xd70   : > { %v6209_v48 = vmul.f32 %v11035_v34, %v6201_v35  ;;  %v6202_v1 = vadd.f32 -0.28449672, %v6194_v15  ;;  %v6188_v36 = vadd.f32 1.4214138, %v6180_v46  ;;  %v8569_v37 = vpop.eup %8568  ;;  %v6097_v15 = vmul.f32 0.5, %v10984_v25 }
 0xd71   : > { %v6263_v38 = vmul.f32 %v8563_v30, %v6223_v22  ;;  %v6224_v31 = vmul.f32 %v11026_v8, %v6216_v19  ;;  %v6270_v21 = vsub.f32 1.0, %v6262_v24  ;;  %v6173_v51 = vadd.f32 -1.4531521, %v6165_v5  ;;  %v8571_v58 = vpop.eup %8570 }
 0xd72   : > { %v6217_v32 = vadd.f32 0.2548296, %v6209_v48  ;;  %v6195_v8 = vmul.f32 %v11056_v41, %v6187_v52  ;;  %v6210_v62 = vmul.f32 %v11048_v61, %v6202_v1  ;;  %v6196_v54 = vmul.f32 %v11063_v40, %v6188_v36  ;;  %v8573_v49 = vpop.eup %8572 }
 0xd73   : > { %v6271_v20 = vsub.f32 1.0, %v6263_v38  ;;  %v6264_v2 = vmul.f32 %v8567_v28, %v6224_v31  ;;  %v6181_v11 = vmul.f32 %v11069_v17, %v6173_v51  ;;  %v6278_v24 = vmul.f32 %v6270_v21, %v11033_v59  ;;  %v8575_v28 = vpop.eup %8574 }
 0xd74   : > { %v6225_v16 = vmul.f32 %v11035_v34, %v6217_v32  ;;  %v6203_v55 = vadd.f32 -0.28449672, %v6195_v8  ;;  %v6218_v35 = vadd.f32 0.2548296, %v6210_v62  ;;  %v6204_v19 = vadd.f32 -0.28449672, %v6196_v54 }
 0xd75   : > { %v6272_v63 = vsub.f32 1.0, %v6264_v2  ;;  %v6279_v6 = vmul.f32 %v6271_v20, %v11042_v4  ;;  %v6189_v39 = vadd.f32 1.4214138, %v6181_v11  ;;  %v6121_v4 = vsel %vm6113_vm8, 1.0, %v8965_v42 }
 0xd76   : > { %v6265_v7 = vmul.f32 %v8569_v37, %v6225_v16  ;;  %v6211_v22 = vmul.f32 %v11056_v41, %v6203_v55  ;;  %v6226_v48 = vmul.f32 %v11048_v61, %v6218_v35  ;;  %v6212_v38 = vmul.f32 %v11063_v40, %v6204_v19 }
 0xd77   : > { %v6280_v34 = vmul.f32 %v6272_v63, %v6120_v50  ;;  %v6197_v29 = vmul.f32 %v11069_v17, %v6189_v39  ;;  %v6287_v59 = vadd.f32 1.0, %v6279_v6  ;;  %v6286_v3 = vadd.f32 1.0, %v6278_v24 }
 0xd78   : > { %v6273_v30 = vsub.f32 1.0, %v6265_v7  ;;  %v6219_v60 = vadd.f32 0.2548296, %v6211_v22  ;;  %v6096_v31 = vmul.f32 0.5, %v10978_v43  ;;  %v6266_v26 = vmul.f32 %v8571_v58, %v6226_v48 }
 0xd79   : > { %v6288_v44 = vadd.f32 1.0, %v6280_v34  ;;  %v6205_v5 = vadd.f32 -0.28449672, %v6197_v29  ;;  %v6220_v61 = vadd.f32 0.2548296, %v6212_v38  ;;  %v6094_v52 = vmul.f32 0.5, %v10967_v9  ;;  %v8577_v62 = vpop.eup %8576 }
 0xd7a   : > { %v6281_v50 = vmul.f32 %v6273_v30, %v6121_v4  ;;  %v6227_v32 = vmul.f32 %v11056_v41, %v6219_v60  ;;  %v6295_v2 = vmul.f32 %v6287_v59, %v6095_v14  ;;  %v6274_v41 = vsub.f32 1.0, %v6266_v26  ;;  %v7098_v60 = vld [vmem:[%s11418_s5] ss:$0 sm:$0xff] }
 0xd7b   : > { %v6296_v46 = vmul.f32 %v6288_v44, %v6096_v31  ;;  %v6213_v20 = vmul.f32 %v11069_v17, %v6205_v5  ;;  %v6228_v43 = vmul.f32 %v11063_v40, %v6220_v61  ;;  %v6294_v25 = vmul.f32 %v6286_v3, %v6094_v52  ;;  %v8586_v31 = vld [vmem:[%s9318_s26 + $0x10] sm:$0xff] }
 0xd7c   : > { %v6289_v21 = vadd.f32 1.0, %v6281_v50  ;;  %v6267_v51 = vmul.f32 %v8573_v49, %v6227_v32  ;;  %v6122_v11 = vsel %vm6114_vm9, 1.0, %v8965_v42  ;;  %v6123_v40 = vsel %vm6115_vm10, 1.0, %v8965_v42 }
 0xd7d   : > { %v6221_v16 = vadd.f32 0.2548296, %v6213_v20  ;;  %v6268_v36 = vmul.f32 %v8575_v28, %v6228_v43  ;;  %v6302_v37 = vpack.c.bf16 %v6296_v46, %v6294_v25  ;;  %v6282_v55 = vmul.f32 %v6274_v41, %v6122_v11  ;;  %v8588_v46 = vld [vmem:[%s9318_s26 + $0x18] sm:$0xff]  ;;  %v8589_v43 = vld [vmem:[%s9318_s26 + $0x8] sm:$0xff] }
 0xd7e   : > { %v6297_v1 = vmul.f32 %v6289_v21, %v6097_v15  ;;  %v6275_v8 = vsub.f32 1.0, %v6267_v51  ;;  %v6125_v24 = vsel %vm6117_vm12, 1.0, %v8965_v42  ;;  %v6100_v39 = vmul.f32 0.5, %v11002_v13  ;;  %v6620_v13 = vld [vmem:[%s11241_s19] sm:$0x1] }
 0xd7f   : > { %v6229_v63 = vmul.f32 %v11069_v17, %v6221_v16  ;;  %v6276_v6 = vsub.f32 1.0, %v6268_v36  ;;  %v6290_v35 = vadd.f32 1.0, %v6282_v55  ;;  %v6099_v14 = vmul.f32 0.5, %v10993_v18  ;;  %v8587_v21 = vld [vmem:[%s9318_s26] sm:$0xff] }
 0xd80   : > { %v6303_v9 = vpack.c.bf16 %v6297_v1, %v6295_v2  ;;  %v6283_v45 = vmul.f32 %v6275_v8, %v6123_v40  ;;  %v6101_v30 = vmul.f32 0.5, %v11008_v33  ;;  %v7107_v18 = vmul.f32 -1.442695, %v6620_v13 }
 0xd81   : > { %v6269_v7 = vmul.f32 %v8577_v62, %v6229_v63  ;;  %v6284_v54 = vmul.f32 %v6276_v6, %v6124_v56  ;;  %v6298_v48 = vmul.f32 %v6290_v35, %v6098_v10 }
 0xd82   : > { %6473 = vmatprep.mubr.bf16.mxu0 %v6303_v9  ;;  %v6291_v34 = vadd.f32 1.0, %v6283_v45  ;;  %8578 = vpow2.f32 %v7107_v18 }
 0xd83   : > { %6474 = vmatmul.mubr.bf16.vlgmr.msra.gmra.mxu0 %v6302_v37  ;;  %v6277_v58 = vsub.f32 1.0, %v6269_v7  ;;  %v6292_v17 = vadd.f32 1.0, %v6284_v54 }
 0xd84   : > { %v6299_v44 = vmul.f32 %v6291_v34, %v6099_v14 }
 0xd85   : > { %v6285_v57 = vmul.f32 %v6277_v58, %v6125_v24  ;;  %v6300_v19 = vmul.f32 %v6292_v17, %v6100_v39 }
 0xd87   : > { %v6293_v22 = vadd.f32 1.0, %v6285_v57  ;;  %v6304_v49 = vpack.c.bf16 %v6300_v19, %v6298_v48 }
 0xd89   : > { %v6301_v4 = vmul.f32 %v6293_v22, %v6101_v30 }
 0xd8b   : > { %v6305_v29 = vpack.c.bf16 %v6301_v4, %v6299_v44 }
 0xd8d   : > { %6481 = vmatprep.mubr.bf16.mxu0 %v6305_v29 }
 0xd8e   : > { %6482 = vmatmul.mubr.bf16.gmra.mxu0 %v6304_v49 }
 0xd8f   : > { %v8579_v33 = vpop.eup %8578 }
 0xd90   : > { %v6624_v42 = vadd.f32 1.0, %v8579_v33 }
 0xd92   : > { %8580 = vrcp.f32 %v6624_v42 }
 0xd9f   : > { %v8581_v23 = vpop.eup %8580 }
 0xda0   : > { %v6637_v59 = vsub.f32 1.0, %v8581_v23  ;;  %v6631_v50 = vrot.slane %v8581_v23, %v11416_v27 }
 0xda2   : > { %v6642_v38 = vrot.slane %v6637_v59, %v11416_v27  ;;  %v6635_v15 = vmul.f32 %v8586_v31, %v6631_v50  ;;  %v6633_v26 = vmul.f32 %v8587_v21, %v6631_v50  ;;  %v6636_v20 = vmul.f32 %v8588_v46, %v6631_v50 }
 0xda3   : > { %v6634_v25 = vmul.f32 %v8589_v43, %v6631_v50 }
 0xdfe   : > { %v7874_v3 = vpop.f32.mrf.mxu1 }
 0xdff   : > { %v6614_v5 = vadd.f32 %v7874_v3, %v7098_v60 }
 0xe00   : > { %v6605_v28 = vpop.f32.mrf.mxu1 }
 0xe01   : > { %v6646_v32 = vmul.f32 %v6642_v38, %v6614_v5  ;;  %v6606_v61 = vadd.f32 %v7098_v60, %v6605_v28 }
 0xe02   : > { %v7875_v52 = vpop.f32.mrf.mxu1 }
 0xe03   : > { %v6650_v2 = vadd.f32 %v6646_v32, %v6635_v15  ;;  %v6644_v1 = vmul.f32 %v6642_v38, %v6606_v61  ;;  %v6617_v51 = vadd.f32 %v7875_v52, %v7098_v60 }
 0xe04   : > { %v6608_v27 = vpop.f32.mrf.mxu1 }
 0xe05   : > { %6654 = vst [vmem:[%s828_s22 + $0x10] sm:$0xff] %v6650_v2  ;;  %v6648_v16 = vadd.f32 %v6644_v1, %v6633_v26  ;;  %v6647_v41 = vmul.f32 %v6642_v38, %v6617_v51  ;;  %v6609_v8 = vadd.f32 %v7098_v60, %v6608_v27 }
 0xe07   : > { %6652 = vst [vmem:[%s828_s22] sm:$0xff] %v6648_v16  ;;  %v6651_v36 = vadd.f32 %v6647_v41, %v6636_v20  ;;  %v6645_v9 = vmul.f32 %v6642_v38, %v6609_v8 }
 0xe09   : > { %6655 = vst [vmem:[%s828_s22 + $0x18] sm:$0xff] %v6651_v36  ;;  %v6649_v37 = vadd.f32 %v6645_v9, %v6634_v25 }
 0xe0b   : > { %6653 = vst [vmem:[%s828_s22 + $0x8] sm:$0xff] %v6649_v37 }
 0xe0c   : > { %8841 = shalt.err (!%p8838_p11)
}
 0xe0d   : > { %s8842_s28 = scalar_lea.hbm %s11135_s4, 512  ;;  %s8846_s24 = scalar_lea.hbm %s11419_s1, 1024 }
 0xe0e   : > { %p8843_p13 = scmp.ne.s32.totalorder %s11135_s4, %s8842_s28  ;;  %p8847_p1 = scmp.lt.s32.totalorder %s11135_s4, %s11419_s1 }
 0xe0f   : > { %p8848_p2 = scmp.lt.s32.totalorder %s8846_s24, %s8842_s28 }
 0xe10   : > { %p8844_p0 = pnand %p8843_p13, %p11420_p10 }
 0xe11   : > { %p8849_p8 = por %p8848_p2, %p8847_p1 }
 0xe12   : > { %p8845_p5 = pneg %p8844_p0 }
 0xe14   : > { %p8850_p9 = pnand %p8849_p8, %p8845_p5 }
 0xe16   : > { %8853 = shalt.err (!%p8850_p9)
}
 0xe17   : > { %s8967_s3 = smov 128   ;;  %s8968_s26 = smov 8  }
 0xe18   : > { %7909 = dma.vmem_to_hbm [thread:$0]  (%p11420_p10), %s11128_s17, 512, %s11135_s4, %s6662_s18, %s8967_s3, %s8967_s3, %s8968_s26  }
 0xe19   : > { %s11421_s11 = sld [smem:[#allocation75_spill]]  ;;  %s821_s13 = scalar_lea.vmem [#allocation17], %s9306_s23 }
 0xe1a   : > { %s6676_s17 = sshll.u32 %s821_s13, 4  ;;  %s11422_s18 = sld [smem:[#allocation78_spill]]  ;;  %s11170_s17 = int_to_ptr.vmem [resolvable:$true] %s6676_s17 }
 0xe1b   : > { %s6657_s21 = scalar_lea.sflag [#allocation4], %s9303_s2  ;;  %s8854_s20 = scalar_lea.vmem %s11170_s17, 512 }
 0xe1c   : > { %p8855_p6 = scmp.ne.s32.totalorder %s11170_s17, %s8854_s20  ;;  %s8969_s24 = smov [#allocation17]  }
 0xe1d   : > { %s8858_s5 = sshll.u32 %s8969_s24, 4  ;;  %s8859_s5 = int_to_ptr.vmem [resolvable:$false] %s8858_s5 }
 0xe1e   : > { %p8856_p3 = pnand %p8855_p6, %p11420_p10  ;;  %s8860_s22 = scalar_lea.vmem %s8859_s5, 1024 }
 0xe1f   : > { %v7081_v62 = vld [vmem:[%s11421_s11] ss:$0 sm:$0xff]  ;;  %p8861_p7 = scmp.lt.s32.totalorder %s11170_s17, %s8859_s5  ;;  %p8862_p4 = scmp.lt.s32.totalorder %s8860_s22, %s8854_s20 }
 0xe20   : > { %s11178_s28 = scalar_lea.hbm %s11422_s18, %s7123_s0  ;;  %p8857_p12 = pneg %p8856_p3 }
 0xe21   : > { %p8863_p11 = por %p8862_p4, %p8861_p7 }
 0xe23   : > { %p8864_p13 = pnand %p8863_p11, %p8857_p12 }
 0xe43   : > { %v7330_v63 = vpop.f32.mrf.mxu0 }
 0xe45   : > { %v7331_v11 = vpop.f32.mrf.mxu0 }
 0xe46   : > { %v7332_v40 = vadd.f32 %v7331_v11, %v7330_v63 }
 0xe47   : > { %v7333_v6 = vpop.f32.mrf.mxu0 }
 0xe48   : > { %v6476_v45 = vadd.f32 %v7332_v40, %v7081_v62 }
 0xe49   : > { %v7334_v56 = vpop.f32.mrf.mxu0 }
 0xe4a   : > { %v6490_v7 = vadd.f32 %v6476_v45, %v10946_v12  ;;  %v7335_v55 = vadd.f32 %v7334_v56, %v7333_v6 }
 0xe4c   : > { %6494 = vst [vmem:[%s821_s13] sm:$0xff] %v6490_v7  ;;  %v6479_v54 = vadd.f32 %v7335_v55, %v7081_v62 }
 0xe4e   : > { %v6491_v58 = vadd.f32 %v6479_v54, %v10942_v0  ;;  %v7336_v17 = vpop.f32.mrf.mxu0 }
 0xe50   : > { %6495 = vst [vmem:[%s821_s13 + $0x8] sm:$0xff] %v6491_v58  ;;  %v7337_v24 = vpop.f32.mrf.mxu0 }
 0xe51   : > { %v7338_v34 = vadd.f32 %v7337_v24, %v7336_v17 }
 0xe52   : > { %v7339_v57 = vpop.f32.mrf.mxu0 }
 0xe53   : > { %v6484_v35 = vadd.f32 %v7338_v34, %v7081_v62 }
 0xe54   : > { %v7340_v39 = vpop.f32.mrf.mxu0 }
 0xe55   : > { %v6492_v14 = vadd.f32 %v6484_v35, %v10955_v47  ;;  %v7341_v12 = vadd.f32 %v7340_v39, %v7339_v57 }
 0xe57   : > { %6496 = vst [vmem:[%s821_s13 + $0x10] sm:$0xff] %v6492_v14  ;;  %v6487_v30 = vadd.f32 %v7341_v12, %v7081_v62 }
 0xe59   : > { %v6493_v0 = vadd.f32 %v6487_v30, %v10952_v53 }
 0xe5b   : > { %6497 = vst [vmem:[%s821_s13 + $0x18] sm:$0xff] %v6493_v0 }
 0xe5c   : > { %8867 = shalt.err (!%p8864_p13)
}
 0xe5d   : > { %s8868_s29 = scalar_lea.hbm %s11178_s28, 512  ;;  %s8872_s9 = scalar_lea.hbm %s11422_s18, 1024 }
 0xe5e   : > { %p8869_p0 = scmp.ne.s32.totalorder %s11178_s28, %s8868_s29  ;;  %p8873_p2 = scmp.lt.s32.totalorder %s11178_s28, %s11422_s18 }
 0xe5f   : > { %p8874_p8 = scmp.lt.s32.totalorder %s8872_s9, %s8868_s29 }
 0xe60   : > { %p8870_p5 = pnand %p8869_p0, %p11420_p10 }
 0xe61   : > { %p8875_p9 = por %p8874_p8, %p8873_p2 }
 0xe62   : > { %p8871_p1 = pneg %p8870_p5 }
 0xe64   : > { %p8876_p6 = pnand %p8875_p9, %p8871_p1 }
 0xe66   : > { %8879 = shalt.err (!%p8876_p6)
}
 0xe67   : > { %7908 = dma.vmem_to_hbm [thread:$0]  (%p11420_p10), %s11170_s17, 512, %s11178_s28, %s6657_s21, %s8967_s3, %s8967_s3, %s8968_s26  }
 0xe68 PF: > { %s11423_s13 = sld [smem:[#allocation28_spill]]  ;;  %p11426_p12 = scmp.ge.s32.totalorder %s8942_s27, 2 }
 0xe69   : > { %s11424_s23 = sld [smem:[#allocation32_spill]] }
 0xe6e   : > { %s6708_s4 = sand.u32 1, %s11423_s13  }
 0xe6f   : > { %p11425_p3 = scmp.ne.s32.totalorder %s11424_s23, 0  ;;  %s6709_s20 = scalar_lea.sflag [#allocation4], %s6708_s4 }
 0xe71   : > { %p7942_p7 = pnand %p11426_p12, %p11425_p3 }
 0xe73   : > { %p7943_p4 = pneg %p7942_p7 }
 0xe75   : > { %8921 = dma.done.wait (%p7943_p4), %s6709_s20, 512  }
 0xe76   : > { %8923 = vsyncadd (%p7943_p4), %s6709_s20, 4294966784  ;;  %s6718_s24 = scalar_lea.sflag [#allocation19], %s6708_s4 }
 0xe77   : > { %8925 = dma.done.wait (%p7943_p4), %s6718_s24, 512  }
 0xe78   : > { %8927 = vsyncadd (%p7943_p4), %s6718_s24, 4294966784  ;;  %s11427_s27 = sld [smem:[#allocation30_spill]]  ;;  %s11430_s2 = smov %s8934_s25 }
 0xe79   : > { %s11428_s16 = sld [smem:[#allocation29_spill]] }
 0xe7a   : > { %s11429_s26 = sld [smem:[#allocation31_spill]] }
 0xe7e   : > { %p44_p10 = scmp.ge.s32.totalorder %s11427_s27, 4  }
 0xe7f   : > { %s11431_s25 = smov %s11428_s16 }
 0xe80   :  { %46 = sbr.rel (!%p44_p10) target bundleno = 29 (0x1d), region = 203 }
 0xe85   :  { %6723 = vsyncpa [#allocation3], 1 }
 0xe86   :  { %6725 = vsyncpa [#allocation3 + $0x1], 1 }
 0xe87   :  { %6726 = vsyncpa [#allocation6], 1 }
 0xe88   :  { %6728 = vsyncpa [#allocation6 + $0x1], 1 }
 0xe89   :  { %6729 = vsyncpa [#allocation9], 1 }
 0xe8a   :  { %6730 = vsyncpa [#allocation12], 1 }
 0xe8b   :  { %6731 = vsyncpa [#allocation15], 1 }
 0xe8c   :  { %6732 = vsyncpa [#allocation4], 1 }
 0xe8d   :  { %6734 = vsyncpa [#allocation4 + $0x1], 1 }
 0xe8e   :  { %6735 = vsyncpa [#allocation19], 1 }
 0xe8f   :  { %6737 = vsyncpa [#allocation19 + $0x1], 1 }

</bundles_post_ra>
